<compile_context>
chip_gen: v7x
topology: tpu7x:2x2x1
jax: 0.10.0
libtpu: 0.0.40
codegen_flags: <defaults>
</compile_context>

<pallas_src>
import functools

import jax
import jax.numpy as jnp
from jax.experimental import pallas as pl
from jax.experimental.pallas import tpu as pltpu

INPUT_SIZE = 6
HIDDEN_1 = 50
HIDDEN_2 = 70
OUTPUT_SIZE = 2

HP1 = 128   # lane-padded hidden size, layer 1
HP2 = 128   # lane-padded hidden size, layer 2


# ----------------------------------------------------------------------------
# Kernel
# ----------------------------------------------------------------------------
def mylstm_kernel(x_ref,                       # (T*Bp, INPUT_SIZE)  time-major, batch-padded
                  wih1_ref, whh1_ref, b1_ref,  # (6,4*HP1) (HP1,4*HP1) (1,4*HP1)
                  wih2_ref, whh2_ref, b2_ref,  # (HP1,4*HP2) (HP2,4*HP2) (1,4*HP2)
                  wlin_ref, blin_ref,          # (HP2, OUTPUT_SIZE) (1, OUTPUT_SIZE)
                  out_ref,                     # (Bp, OUTPUT_SIZE)
                  xw1_s,                       # VMEM (T*Bp, 4*HP1) layer-1 input proj
                  h1seq_s,                     # VMEM (T*Bp, HP1)   layer-1 outputs
                  xw2_s,                       # VMEM (T*Bp, 4*HP2) layer-2 input proj
                  *, T, Bp):
    # ---- Pass 0: batched layer-1 input projection (single MXU matmul, bias folded)
    xw1_s[...] = (jnp.dot(x_ref[...], wih1_ref[...],
                          preferred_element_type=jnp.float32)
                  + b1_ref[...])

    # ---- Pass 1: layer-1 recurrence; states live in vregs, loop fully unrolled
    whh1 = whh1_ref[...]
    h1 = jnp.zeros((Bp, HP1), jnp.float32)
    c1 = jnp.zeros((Bp, HP1), jnp.float32)
    for t in range(T):
        g = xw1_s[pl.ds(t * Bp, Bp), :] + jnp.dot(
            h1, whh1, preferred_element_type=jnp.float32)
        sig = jax.nn.sigmoid(g[:, :3 * HP1])          # [i | f | o] in one EUP pass
        i = sig[:, 0 * HP1:1 * HP1]
        f = sig[:, 1 * HP1:2 * HP1]
        o = sig[:, 2 * HP1:3 * HP1]
        gg = jnp.tanh(g[:, 3 * HP1:4 * HP1])
        c1 = f * c1 + i * gg
        h1 = o * jnp.tanh(c1)
        h1seq_s[pl.ds(t * Bp, Bp), :] = h1

    # ---- Pass 2: batched layer-2 input projection over the whole h1 sequence
    xw2_s[...] = (jnp.dot(h1seq_s[...], wih2_ref[...],
                          preferred_element_type=jnp.float32)
                  + b2_ref[...])

    # ---- Pass 3: layer-2 recurrence
    whh2 = whh2_ref[...]
    h2 = jnp.zeros((Bp, HP2), jnp.float32)
    c2 = jnp.zeros((Bp, HP2), jnp.float32)
    for t in range(T):
        g = xw2_s[pl.ds(t * Bp, Bp), :] + jnp.dot(
            h2, whh2, preferred_element_type=jnp.float32)
        sig = jax.nn.sigmoid(g[:, :3 * HP2])
        i = sig[:, 0 * HP2:1 * HP2]
        f = sig[:, 1 * HP2:2 * HP2]
        o = sig[:, 2 * HP2:3 * HP2]
        gg = jnp.tanh(g[:, 3 * HP2:4 * HP2])
        c2 = f * c2 + i * gg
        h2 = o * jnp.tanh(c2)

    # ---- Head: ReLU + Linear (padded lanes of h2 are exactly 0)
    h_out = jnp.maximum(h2, 0.0)
    out_ref[...] = (jnp.dot(h_out, wlin_ref[...],
                            preferred_element_type=jnp.float32)
                    + blin_ref[...])


# ----------------------------------------------------------------------------
# Parameter layout transform (PyTorch layout -> kernel layout)
# ----------------------------------------------------------------------------
def _pad_gate_cols(w, hidden, hp):
    """w: (rows, 4*hidden) in PyTorch gate order [i, f, g, o].
    Returns (rows, 4*hp) in kernel gate order [i, f, o, g], each gate block
    zero-padded to hp lanes (so slices are lane-aligned)."""
    i_ = w[:, 0 * hidden:1 * hidden]
    f_ = w[:, 1 * hidden:2 * hidden]
    g_ = w[:, 2 * hidden:3 * hidden]
    o_ = w[:, 3 * hidden:4 * hidden]
    pad = lambda a: jnp.pad(a, ((0, 0), (0, hp - hidden)))
    return jnp.concatenate([pad(i_), pad(f_), pad(o_), pad(g_)], axis=1)


def _pad_rows(w, rows_p):
    return jnp.pad(w, ((0, rows_p - w.shape[0]), (0, 0)))


def prepare_kernel_params(params):
    return {
        "w_ih1": _pad_gate_cols(params["w_ih1"], HIDDEN_1, HP1),               # (6, 512)
        "w_hh1": _pad_rows(_pad_gate_cols(params["w_hh1"], HIDDEN_1, HP1), HP1),  # (128, 512)
        "b1":    _pad_gate_cols(params["b1"], HIDDEN_1, HP1),                  # (1, 512)
        "w_ih2": _pad_rows(_pad_gate_cols(params["w_ih2"], HIDDEN_2, HP2), HP1),  # (128, 512)
        "w_hh2": _pad_rows(_pad_gate_cols(params["w_hh2"], HIDDEN_2, HP2), HP2),  # (128, 512)
        "b2":    _pad_gate_cols(params["b2"], HIDDEN_2, HP2),                  # (1, 512)
        "w_lin": _pad_rows(params["w_lin"], HP2),                              # (128, 2)
        "b_lin": params["b_lin"],                                              # (1, 2)
    }


# ----------------------------------------------------------------------------
# Wrapper
# ----------------------------------------------------------------------------
def mylstm_forward(x, params):
    """x: (B, T, INPUT_SIZE) float32 (PyTorch batch_first convention)."""
    B, T, _ = x.shape
    Bp = ((B + 7) // 8) * 8          # pad batch to sublane multiple

    kp = prepare_kernel_params(params)

    x_tm = jnp.transpose(x, (1, 0, 2))                    # (T, B, I) time-major
    x_tm = jnp.pad(x_tm, ((0, 0), (0, Bp - B), (0, 0)))   # (T, Bp, I)
    x_flat = x_tm.reshape(T * Bp, INPUT_SIZE)             # (T*Bp, I)

    kernel = functools.partial(mylstm_kernel, T=T, Bp=Bp)

    out_p = pl.pallas_call(
        kernel,
        out_shape=jax.ShapeDtypeStruct((Bp, OUTPUT_SIZE), jnp.float32),
        in_specs=[pl.BlockSpec(memory_space=pltpu.MemorySpace.VMEM)] * 9,
        out_specs=pl.BlockSpec(memory_space=pltpu.MemorySpace.VMEM),
        scratch_shapes=[
            pltpu.VMEM((T * Bp, 4 * HP1), jnp.float32),   # xw1  (layer-1 input proj)
            pltpu.VMEM((T * Bp, HP1), jnp.float32),       # h1 sequence
            pltpu.VMEM((T * Bp, 4 * HP2), jnp.float32),   # xw2  (layer-2 input proj)
        ],
        # If T / B ever become large: stream x / xw1 from HBM with a grid over
        # time chunks and add a parallel batch grid axis for v7x's 2nd core.
    )(x_flat,
      kp["w_ih1"], kp["w_hh1"], kp["b1"],
      kp["w_ih2"], kp["w_hh2"], kp["b2"],
      kp["w_lin"], kp["b_lin"])

    return out_p[:B]


# ----------------------------------------------------------------------------
# Deterministic synthetic parameters (PyTorch-style layout & init)
# ----------------------------------------------------------------------------
def init_params(key):
    ks = jax.random.split(key, 10)

    def unif(k, shape, bound):
        return jax.random.uniform(k, shape, jnp.float32, -bound, bound)

    b1_bound = 1.0 / jnp.sqrt(HIDDEN_1)
    b2_bound = 1.0 / jnp.sqrt(HIDDEN_2)
    return {
        # layer-1 LSTM, stored as (in, 4H) / (H, 4H), gate order [i,f,g,o];
        # bias = b_ih + b_hh folded into one row vector.
        "w_ih1": unif(ks[0], (INPUT_SIZE, 4 * HIDDEN_1), b1_bound),
        "w_hh1": unif(ks[1], (HIDDEN_1, 4 * HIDDEN_1), b1_bound),
        "b1":    unif(ks[2], (1, 4 * HIDDEN_1), b1_bound),
        # layer-2 LSTM
        "w_ih2": unif(ks[3], (HIDDEN_1, 4 * HIDDEN_2), b2_bound),
        "w_hh2": unif(ks[4], (HIDDEN_2, 4 * HIDDEN_2), b2_bound),
        "b2":    unif(ks[5], (1, 4 * HIDDEN_2), b2_bound),
        # linear head: (in, out)
        "w_lin": unif(ks[6], (HIDDEN_2, OUTPUT_SIZE), b2_bound),
        "b_lin": unif(ks[7], (1, OUTPUT_SIZE), b2_bound),
    }


# ----------------------------------------------------------------------------
# Pure-JAX reference (uses the original, unpadded PyTorch-layout params)
# ----------------------------------------------------------------------------
def mylstm_reference(x, params):
    B, T, _ = x.shape
    h1 = jnp.zeros((B, HIDDEN_1), jnp.float32)
    c1 = jnp.zeros((B, HIDDEN_1), jnp.float32)
    h2 = jnp.zeros((B, HIDDEN_2), jnp.float32)
    c2 = jnp.zeros((B, HIDDEN_2), jnp.float32)

    def cell(x_t, h, c, w_ih, w_hh, b, hid):
        g = x_t @ w_ih + h @ w_hh + b
        i = jax.nn.sigmoid(g[:, 0 * hid:1 * hid])
        f = jax.nn.sigmoid(g[:, 1 * hid:2 * hid])
        gg = jnp.tanh(g[:, 2 * hid:3 * hid])
        o = jax.nn.sigmoid(g[:, 3 * hid:4 * hid])
        c_new = f * c + i * gg
        h_new = o * jnp.tanh(c_new)
        return h_new, c_new

    for t in range(T):
        h1, c1 = cell(x[:, t, :], h1, c1,
                      params["w_ih1"], params["w_hh1"], params["b1"], HIDDEN_1)
        h2, c2 = cell(h1, h2, c2,
                      params["w_ih2"], params["w_hh2"], params["b2"], HIDDEN_2)
    h_out = jnp.maximum(h2, 0.0)
    return h_out @ params["w_lin"] + params["b_lin"]


if __name__ == "__main__":
    key = jax.random.PRNGKey(0)
    k_x, k_p = jax.random.split(key)

    B, T = 4, 8
    x = jax.random.normal(k_x, (B, T, INPUT_SIZE), jnp.float32)
    params = init_params(k_p)

    y = jax.jit(mylstm_forward)(x, params)
    y = jax.block_until_ready(y)

    y_ref = mylstm_reference(x, params)
    assert y.shape == (B, OUTPUT_SIZE)
    assert jnp.allclose(y, y_ref, rtol=1e-3, atol=1e-3), (y, y_ref)

    print("KERNEL_OK")
</pallas_src>

<mosaic_0001>
module attributes {stable_mosaic.version = 11 : i64} {
  func.func @mylstm_kernel(%arg0: memref<64x6xf32, #tpu.memory_space<vmem>>, %arg1: memref<6x512xf32, #tpu.memory_space<vmem>>, %arg2: memref<128x512xf32, #tpu.memory_space<vmem>>, %arg3: memref<1x512xf32, #tpu.memory_space<vmem>>, %arg4: memref<128x512xf32, #tpu.memory_space<vmem>>, %arg5: memref<128x512xf32, #tpu.memory_space<vmem>>, %arg6: memref<1x512xf32, #tpu.memory_space<vmem>>, %arg7: memref<128x2xf32, #tpu.memory_space<vmem>>, %arg8: memref<1x2xf32, #tpu.memory_space<vmem>>, %arg9: memref<8x2xf32, #tpu.memory_space<vmem>>, %arg10: memref<64x512xf32, #tpu.memory_space<vmem>>, %arg11: memref<64x128xf32, #tpu.memory_space<vmem>>, %arg12: memref<64x512xf32, #tpu.memory_space<vmem>>) attributes {dimension_semantics = [], scalar_prefetch = 0 : i64, scratch_operands = 3 : i64, tpu.core_type = #tpu.core_type<tc>} {
    %c0 = arith.constant 0 : index
    %c0_0 = arith.constant 0 : index
    %0 = vector.load %arg0[%c0, %c0_0] : memref<64x6xf32, #tpu.memory_space<vmem>>, vector<64x6xf32>
    %c0_1 = arith.constant 0 : index
    %c0_2 = arith.constant 0 : index
    %1 = vector.load %arg1[%c0_1, %c0_2] : memref<6x512xf32, #tpu.memory_space<vmem>>, vector<6x512xf32>
    %cst = arith.constant dense<0.000000e+00> : vector<64x512xf32>
    %2 = tpu.matmul %0, %1, %cst {dimension_numbers = #tpu.dot_dimension_numbers<[1], [0], [0], [1], [0, 0, 1, 1], [], []>} : vector<64x6xf32>, vector<6x512xf32>, vector<64x512xf32> -> vector<64x512xf32>
    %c0_3 = arith.constant 0 : index
    %c0_4 = arith.constant 0 : index
    %3 = vector.load %arg3[%c0_3, %c0_4] : memref<1x512xf32, #tpu.memory_space<vmem>>, vector<1x512xf32>
    %4 = vector.broadcast %3 : vector<1x512xf32> to vector<64x512xf32>
    %5 = arith.addf %2, %4 : vector<64x512xf32>
    %c0_5 = arith.constant 0 : index
    %c0_6 = arith.constant 0 : index
    %6 = vector.load %arg10[%c0_5, %c0_6] : memref<64x512xf32, #tpu.memory_space<vmem>>, vector<64x512xf32>
    tpu.vector_store %arg10[%c0_5, %c0_6], %5 {strides = array<i32>} : memref<64x512xf32, #tpu.memory_space<vmem>>, vector<64x512xf32>,
    %c0_7 = arith.constant 0 : index
    %c0_8 = arith.constant 0 : index
    %7 = vector.load %arg2[%c0_7, %c0_8] : memref<128x512xf32, #tpu.memory_space<vmem>>, vector<128x512xf32>
    %cst_9 = arith.constant 0.000000e+00 : f32
    %8 = vector.broadcast %cst_9 : f32 to vector<8x128xf32>
    %cst_10 = arith.constant 0.000000e+00 : f32
    %9 = vector.broadcast %cst_10 : f32 to vector<8x128xf32>
    %c0_11 = arith.constant 0 : index
    %c0_12 = arith.constant 0 : index
    %10 = vector.load %arg10[%c0_11, %c0_12] : memref<64x512xf32, #tpu.memory_space<vmem>>, vector<8x512xf32>
    %cst_13 = arith.constant dense<0.000000e+00> : vector<8x512xf32>
    %11 = tpu.matmul %8, %7, %cst_13 {dimension_numbers = #tpu.dot_dimension_numbers<[1], [0], [0], [1], [0, 0, 1, 1], [], []>} : vector<8x128xf32>, vector<128x512xf32>, vector<8x512xf32> -> vector<8x512xf32>
    %12 = arith.addf %10, %11 : vector<8x512xf32>
    %13 = vector.extract_strided_slice %12 {offsets = [0, 0], sizes = [8, 384], strides = [1, 1]} : vector<8x512xf32> to vector<8x384xf32>
    %14 = arith.negf %13 : vector<8x384xf32>
    %15 = math.exp %14 : vector<8x384xf32>
    %cst_14 = arith.constant 1.000000e+00 : f32
    %16 = vector.broadcast %cst_14 : f32 to vector<8x384xf32>
    %17 = arith.addf %16, %15 : vector<8x384xf32>
    %18 = arith.divf %16, %17 : vector<8x384xf32>
    %19 = vector.extract_strided_slice %18 {offsets = [0, 0], sizes = [8, 128], strides = [1, 1]} : vector<8x384xf32> to vector<8x128xf32>
    %20 = vector.extract_strided_slice %18 {offsets = [0, 128], sizes = [8, 128], strides = [1, 1]} : vector<8x384xf32> to vector<8x128xf32>
    %21 = vector.extract_strided_slice %18 {offsets = [0, 256], sizes = [8, 128], strides = [1, 1]} : vector<8x384xf32> to vector<8x128xf32>
    %22 = vector.extract_strided_slice %12 {offsets = [0, 384], sizes = [8, 128], strides = [1, 1]} : vector<8x512xf32> to vector<8x128xf32>
    %23 = math.tanh %22 : vector<8x128xf32>
    %24 = arith.mulf %20, %9 : vector<8x128xf32>
    %25 = arith.mulf %19, %23 : vector<8x128xf32>
    %26 = arith.addf %24, %25 : vector<8x128xf32>
    %27 = math.tanh %26 : vector<8x128xf32>
    %28 = arith.mulf %21, %27 : vector<8x128xf32>
    %c0_15 = arith.constant 0 : index
    %c0_16 = arith.constant 0 : index
    %29 = vector.load %arg11[%c0_15, %c0_16] : memref<64x128xf32, #tpu.memory_space<vmem>>, vector<8x128xf32>
    tpu.vector_store %arg11[%c0_15, %c0_16], %28 {strides = array<i32>} : memref<64x128xf32, #tpu.memory_space<vmem>>, vector<8x128xf32>,
    %c8 = arith.constant 8 : index
    %c0_17 = arith.constant 0 : index
    %30 = vector.load %arg10[%c8, %c0_17] : memref<64x512xf32, #tpu.memory_space<vmem>>, vector<8x512xf32>
    %cst_18 = arith.constant dense<0.000000e+00> : vector<8x512xf32>
    %31 = tpu.matmul %28, %7, %cst_18 {dimension_numbers = #tpu.dot_dimension_numbers<[1], [0], [0], [1], [0, 0, 1, 1], [], []>} : vector<8x128xf32>, vector<128x512xf32>, vector<8x512xf32> -> vector<8x512xf32>
    %32 = arith.addf %30, %31 : vector<8x512xf32>
    %33 = vector.extract_strided_slice %32 {offsets = [0, 0], sizes = [8, 384], strides = [1, 1]} : vector<8x512xf32> to vector<8x384xf32>
    %34 = arith.negf %33 : vector<8x384xf32>
    %35 = math.exp %34 : vector<8x384xf32>
    %cst_19 = arith.constant 1.000000e+00 : f32
    %36 = vector.broadcast %cst_19 : f32 to vector<8x384xf32>
    %37 = arith.addf %36, %35 : vector<8x384xf32>
    %38 = arith.divf %36, %37 : vector<8x384xf32>
    %39 = vector.extract_strided_slice %38 {offsets = [0, 0], sizes = [8, 128], strides = [1, 1]} : vector<8x384xf32> to vector<8x128xf32>
    %40 = vector.extract_strided_slice %38 {offsets = [0, 128], sizes = [8, 128], strides = [1, 1]} : vector<8x384xf32> to vector<8x128xf32>
    %41 = vector.extract_strided_slice %38 {offsets = [0, 256], sizes = [8, 128], strides = [1, 1]} : vector<8x384xf32> to vector<8x128xf32>
    %42 = vector.extract_strided_slice %32 {offsets = [0, 384], sizes = [8, 128], strides = [1, 1]} : vector<8x512xf32> to vector<8x128xf32>
    %43 = math.tanh %42 : vector<8x128xf32>
    %44 = arith.mulf %40, %26 : vector<8x128xf32>
    %45 = arith.mulf %39, %43 : vector<8x128xf32>
    %46 = arith.addf %44, %45 : vector<8x128xf32>
    %47 = math.tanh %46 : vector<8x128xf32>
    %48 = arith.mulf %41, %47 : vector<8x128xf32>
    %c8_20 = arith.constant 8 : index
    %c0_21 = arith.constant 0 : index
    %49 = vector.load %arg11[%c8_20, %c0_21] : memref<64x128xf32, #tpu.memory_space<vmem>>, vector<8x128xf32>
    tpu.vector_store %arg11[%c8_20, %c0_21], %48 {strides = array<i32>} : memref<64x128xf32, #tpu.memory_space<vmem>>, vector<8x128xf32>,
    %c16 = arith.constant 16 : index
    %c0_22 = arith.constant 0 : index
    %50 = vector.load %arg10[%c16, %c0_22] : memref<64x512xf32, #tpu.memory_space<vmem>>, vector<8x512xf32>
    %cst_23 = arith.constant dense<0.000000e+00> : vector<8x512xf32>
    %51 = tpu.matmul %48, %7, %cst_23 {dimension_numbers = #tpu.dot_dimension_numbers<[1], [0], [0], [1], [0, 0, 1, 1], [], []>} : vector<8x128xf32>, vector<128x512xf32>, vector<8x512xf32> -> vector<8x512xf32>
    %52 = arith.addf %50, %51 : vector<8x512xf32>
    %53 = vector.extract_strided_slice %52 {offsets = [0, 0], sizes = [8, 384], strides = [1, 1]} : vector<8x512xf32> to vector<8x384xf32>
    %54 = arith.negf %53 : vector<8x384xf32>
    %55 = math.exp %54 : vector<8x384xf32>
    %cst_24 = arith.constant 1.000000e+00 : f32
    %56 = vector.broadcast %cst_24 : f32 to vector<8x384xf32>
    %57 = arith.addf %56, %55 : vector<8x384xf32>
    %58 = arith.divf %56, %57 : vector<8x384xf32>
    %59 = vector.extract_strided_slice %58 {offsets = [0, 0], sizes = [8, 128], strides = [1, 1]} : vector<8x384xf32> to vector<8x128xf32>
    %60 = vector.extract_strided_slice %58 {offsets = [0, 128], sizes = [8, 128], strides = [1, 1]} : vector<8x384xf32> to vector<8x128xf32>
    %61 = vector.extract_strided_slice %58 {offsets = [0, 256], sizes = [8, 128], strides = [1, 1]} : vector<8x384xf32> to vector<8x128xf32>
    %62 = vector.extract_strided_slice %52 {offsets = [0, 384], sizes = [8, 128], strides = [1, 1]} : vector<8x512xf32> to vector<8x128xf32>
    %63 = math.tanh %62 : vector<8x128xf32>
    %64 = arith.mulf %60, %46 : vector<8x128xf32>
    %65 = arith.mulf %59, %63 : vector<8x128xf32>
    %66 = arith.addf %64, %65 : vector<8x128xf32>
    %67 = math.tanh %66 : vector<8x128xf32>
    %68 = arith.mulf %61, %67 : vector<8x128xf32>
    %c16_25 = arith.constant 16 : index
    %c0_26 = arith.constant 0 : index
    %69 = vector.load %arg11[%c16_25, %c0_26] : memref<64x128xf32, #tpu.memory_space<vmem>>, vector<8x128xf32>
    tpu.vector_store %arg11[%c16_25, %c0_26], %68 {strides = array<i32>} : memref<64x128xf32, #tpu.memory_space<vmem>>, vector<8x128xf32>,
    %c24 = arith.constant 24 : index
    %c0_27 = arith.constant 0 : index
    %70 = vector.load %arg10[%c24, %c0_27] : memref<64x512xf32, #tpu.memory_space<vmem>>, vector<8x512xf32>
    %cst_28 = arith.constant dense<0.000000e+00> : vector<8x512xf32>
    %71 = tpu.matmul %68, %7, %cst_28 {dimension_numbers = #tpu.dot_dimension_numbers<[1], [0], [0], [1], [0, 0, 1, 1], [], []>} : vector<8x128xf32>, vector<128x512xf32>, vector<8x512xf32> -> vector<8x512xf32>
    %72 = arith.addf %70, %71 : vector<8x512xf32>
    %73 = vector.extract_strided_slice %72 {offsets = [0, 0], sizes = [8, 384], strides = [1, 1]} : vector<8x512xf32> to vector<8x384xf32>
    %74 = arith.negf %73 : vector<8x384xf32>
    %75 = math.exp %74 : vector<8x384xf32>
    %cst_29 = arith.constant 1.000000e+00 : f32
    %76 = vector.broadcast %cst_29 : f32 to vector<8x384xf32>
    %77 = arith.addf %76, %75 : vector<8x384xf32>
    %78 = arith.divf %76, %77 : vector<8x384xf32>
    %79 = vector.extract_strided_slice %78 {offsets = [0, 0], sizes = [8, 128], strides = [1, 1]} : vector<8x384xf32> to vector<8x128xf32>
    %80 = vector.extract_strided_slice %78 {offsets = [0, 128], sizes = [8, 128], strides = [1, 1]} : vector<8x384xf32> to vector<8x128xf32>
    %81 = vector.extract_strided_slice %78 {offsets = [0, 256], sizes = [8, 128], strides = [1, 1]} : vector<8x384xf32> to vector<8x128xf32>
    %82 = vector.extract_strided_slice %72 {offsets = [0, 384], sizes = [8, 128], strides = [1, 1]} : vector<8x512xf32> to vector<8x128xf32>
    %83 = math.tanh %82 : vector<8x128xf32>
    %84 = arith.mulf %80, %66 : vector<8x128xf32>
    %85 = arith.mulf %79, %83 : vector<8x128xf32>
    %86 = arith.addf %84, %85 : vector<8x128xf32>
    %87 = math.tanh %86 : vector<8x128xf32>
    %88 = arith.mulf %81, %87 : vector<8x128xf32>
    %c24_30 = arith.constant 24 : index
    %c0_31 = arith.constant 0 : index
    %89 = vector.load %arg11[%c24_30, %c0_31] : memref<64x128xf32, #tpu.memory_space<vmem>>, vector<8x128xf32>
    tpu.vector_store %arg11[%c24_30, %c0_31], %88 {strides = array<i32>} : memref<64x128xf32, #tpu.memory_space<vmem>>, vector<8x128xf32>,
    %c32 = arith.constant 32 : index
    %c0_32 = arith.constant 0 : index
    %90 = vector.load %arg10[%c32, %c0_32] : memref<64x512xf32, #tpu.memory_space<vmem>>, vector<8x512xf32>
    %cst_33 = arith.constant dense<0.000000e+00> : vector<8x512xf32>
    %91 = tpu.matmul %88, %7, %cst_33 {dimension_numbers = #tpu.dot_dimension_numbers<[1], [0], [0], [1], [0, 0, 1, 1], [], []>} : vector<8x128xf32>, vector<128x512xf32>, vector<8x512xf32> -> vector<8x512xf32>
    %92 = arith.addf %90, %91 : vector<8x512xf32>
    %93 = vector.extract_strided_slice %92 {offsets = [0, 0], sizes = [8, 384], strides = [1, 1]} : vector<8x512xf32> to vector<8x384xf32>
    %94 = arith.negf %93 : vector<8x384xf32>
    %95 = math.exp %94 : vector<8x384xf32>
    %cst_34 = arith.constant 1.000000e+00 : f32
    %96 = vector.broadcast %cst_34 : f32 to vector<8x384xf32>
    %97 = arith.addf %96, %95 : vector<8x384xf32>
    %98 = arith.divf %96, %97 : vector<8x384xf32>
    %99 = vector.extract_strided_slice %98 {offsets = [0, 0], sizes = [8, 128], strides = [1, 1]} : vector<8x384xf32> to vector<8x128xf32>
    %100 = vector.extract_strided_slice %98 {offsets = [0, 128], sizes = [8, 128], strides = [1, 1]} : vector<8x384xf32> to vector<8x128xf32>
    %101 = vector.extract_strided_slice %98 {offsets = [0, 256], sizes = [8, 128], strides = [1, 1]} : vector<8x384xf32> to vector<8x128xf32>
    %102 = vector.extract_strided_slice %92 {offsets = [0, 384], sizes = [8, 128], strides = [1, 1]} : vector<8x512xf32> to vector<8x128xf32>
    %103 = math.tanh %102 : vector<8x128xf32>
    %104 = arith.mulf %100, %86 : vector<8x128xf32>
    %105 = arith.mulf %99, %103 : vector<8x128xf32>
    %106 = arith.addf %104, %105 : vector<8x128xf32>
    %107 = math.tanh %106 : vector<8x128xf32>
    %108 = arith.mulf %101, %107 : vector<8x128xf32>
    %c32_35 = arith.constant 32 : index
    %c0_36 = arith.constant 0 : index
    %109 = vector.load %arg11[%c32_35, %c0_36] : memref<64x128xf32, #tpu.memory_space<vmem>>, vector<8x128xf32>
    tpu.vector_store %arg11[%c32_35, %c0_36], %108 {strides = array<i32>} : memref<64x128xf32, #tpu.memory_space<vmem>>, vector<8x128xf32>,
    %c40 = arith.constant 40 : index
    %c0_37 = arith.constant 0 : index
    %110 = vector.load %arg10[%c40, %c0_37] : memref<64x512xf32, #tpu.memory_space<vmem>>, vector<8x512xf32>
    %cst_38 = arith.constant dense<0.000000e+00> : vector<8x512xf32>
    %111 = tpu.matmul %108, %7, %cst_38 {dimension_numbers = #tpu.dot_dimension_numbers<[1], [0], [0], [1], [0, 0, 1, 1], [], []>} : vector<8x128xf32>, vector<128x512xf32>, vector<8x512xf32> -> vector<8x512xf32>
    %112 = arith.addf %110, %111 : vector<8x512xf32>
    %113 = vector.extract_strided_slice %112 {offsets = [0, 0], sizes = [8, 384], strides = [1, 1]} : vector<8x512xf32> to vector<8x384xf32>
    %114 = arith.negf %113 : vector<8x384xf32>
    %115 = math.exp %114 : vector<8x384xf32>
    %cst_39 = arith.constant 1.000000e+00 : f32
    %116 = vector.broadcast %cst_39 : f32 to vector<8x384xf32>
    %117 = arith.addf %116, %115 : vector<8x384xf32>
    %118 = arith.divf %116, %117 : vector<8x384xf32>
    %119 = vector.extract_strided_slice %118 {offsets = [0, 0], sizes = [8, 128], strides = [1, 1]} : vector<8x384xf32> to vector<8x128xf32>
    %120 = vector.extract_strided_slice %118 {offsets = [0, 128], sizes = [8, 128], strides = [1, 1]} : vector<8x384xf32> to vector<8x128xf32>
    %121 = vector.extract_strided_slice %118 {offsets = [0, 256], sizes = [8, 128], strides = [1, 1]} : vector<8x384xf32> to vector<8x128xf32>
    %122 = vector.extract_strided_slice %112 {offsets = [0, 384], sizes = [8, 128], strides = [1, 1]} : vector<8x512xf32> to vector<8x128xf32>
    %123 = math.tanh %122 : vector<8x128xf32>
    %124 = arith.mulf %120, %106 : vector<8x128xf32>
    %125 = arith.mulf %119, %123 : vector<8x128xf32>
    %126 = arith.addf %124, %125 : vector<8x128xf32>
    %127 = math.tanh %126 : vector<8x128xf32>
    %128 = arith.mulf %121, %127 : vector<8x128xf32>
    %c40_40 = arith.constant 40 : index
    %c0_41 = arith.constant 0 : index
    %129 = vector.load %arg11[%c40_40, %c0_41] : memref<64x128xf32, #tpu.memory_space<vmem>>, vector<8x128xf32>
    tpu.vector_store %arg11[%c40_40, %c0_41], %128 {strides = array<i32>} : memref<64x128xf32, #tpu.memory_space<vmem>>, vector<8x128xf32>,
    %c48 = arith.constant 48 : index
    %c0_42 = arith.constant 0 : index
    %130 = vector.load %arg10[%c48, %c0_42] : memref<64x512xf32, #tpu.memory_space<vmem>>, vector<8x512xf32>
    %cst_43 = arith.constant dense<0.000000e+00> : vector<8x512xf32>
    %131 = tpu.matmul %128, %7, %cst_43 {dimension_numbers = #tpu.dot_dimension_numbers<[1], [0], [0], [1], [0, 0, 1, 1], [], []>} : vector<8x128xf32>, vector<128x512xf32>, vector<8x512xf32> -> vector<8x512xf32>
    %132 = arith.addf %130, %131 : vector<8x512xf32>
    %133 = vector.extract_strided_slice %132 {offsets = [0, 0], sizes = [8, 384], strides = [1, 1]} : vector<8x512xf32> to vector<8x384xf32>
    %134 = arith.negf %133 : vector<8x384xf32>
    %135 = math.exp %134 : vector<8x384xf32>
    %cst_44 = arith.constant 1.000000e+00 : f32
    %136 = vector.broadcast %cst_44 : f32 to vector<8x384xf32>
    %137 = arith.addf %136, %135 : vector<8x384xf32>
    %138 = arith.divf %136, %137 : vector<8x384xf32>
    %139 = vector.extract_strided_slice %138 {offsets = [0, 0], sizes = [8, 128], strides = [1, 1]} : vector<8x384xf32> to vector<8x128xf32>
    %140 = vector.extract_strided_slice %138 {offsets = [0, 128], sizes = [8, 128], strides = [1, 1]} : vector<8x384xf32> to vector<8x128xf32>
    %141 = vector.extract_strided_slice %138 {offsets = [0, 256], sizes = [8, 128], strides = [1, 1]} : vector<8x384xf32> to vector<8x128xf32>
    %142 = vector.extract_strided_slice %132 {offsets = [0, 384], sizes = [8, 128], strides = [1, 1]} : vector<8x512xf32> to vector<8x128xf32>
    %143 = math.tanh %142 : vector<8x128xf32>
    %144 = arith.mulf %140, %126 : vector<8x128xf32>
    %145 = arith.mulf %139, %143 : vector<8x128xf32>
    %146 = arith.addf %144, %145 : vector<8x128xf32>
    %147 = math.tanh %146 : vector<8x128xf32>
    %148 = arith.mulf %141, %147 : vector<8x128xf32>
    %c48_45 = arith.constant 48 : index
    %c0_46 = arith.constant 0 : index
    %149 = vector.load %arg11[%c48_45, %c0_46] : memref<64x128xf32, #tpu.memory_space<vmem>>, vector<8x128xf32>
    tpu.vector_store %arg11[%c48_45, %c0_46], %148 {strides = array<i32>} : memref<64x128xf32, #tpu.memory_space<vmem>>, vector<8x128xf32>,
    %c56 = arith.constant 56 : index
    %c0_47 = arith.constant 0 : index
    %150 = vector.load %arg10[%c56, %c0_47] : memref<64x512xf32, #tpu.memory_space<vmem>>, vector<8x512xf32>
    %cst_48 = arith.constant dense<0.000000e+00> : vector<8x512xf32>
    %151 = tpu.matmul %148, %7, %cst_48 {dimension_numbers = #tpu.dot_dimension_numbers<[1], [0], [0], [1], [0, 0, 1, 1], [], []>} : vector<8x128xf32>, vector<128x512xf32>, vector<8x512xf32> -> vector<8x512xf32>
    %152 = arith.addf %150, %151 : vector<8x512xf32>
    %153 = vector.extract_strided_slice %152 {offsets = [0, 0], sizes = [8, 384], strides = [1, 1]} : vector<8x512xf32> to vector<8x384xf32>
    %154 = arith.negf %153 : vector<8x384xf32>
    %155 = math.exp %154 : vector<8x384xf32>
    %cst_49 = arith.constant 1.000000e+00 : f32
    %156 = vector.broadcast %cst_49 : f32 to vector<8x384xf32>
    %157 = arith.addf %156, %155 : vector<8x384xf32>
    %158 = arith.divf %156, %157 : vector<8x384xf32>
    %159 = vector.extract_strided_slice %158 {offsets = [0, 0], sizes = [8, 128], strides = [1, 1]} : vector<8x384xf32> to vector<8x128xf32>
    %160 = vector.extract_strided_slice %158 {offsets = [0, 128], sizes = [8, 128], strides = [1, 1]} : vector<8x384xf32> to vector<8x128xf32>
    %161 = vector.extract_strided_slice %158 {offsets = [0, 256], sizes = [8, 128], strides = [1, 1]} : vector<8x384xf32> to vector<8x128xf32>
    %162 = vector.extract_strided_slice %152 {offsets = [0, 384], sizes = [8, 128], strides = [1, 1]} : vector<8x512xf32> to vector<8x128xf32>
    %163 = math.tanh %162 : vector<8x128xf32>
    %164 = arith.mulf %160, %146 : vector<8x128xf32>
    %165 = arith.mulf %159, %163 : vector<8x128xf32>
    %166 = arith.addf %164, %165 : vector<8x128xf32>
    %167 = math.tanh %166 : vector<8x128xf32>
    %168 = arith.mulf %161, %167 : vector<8x128xf32>
    %c56_50 = arith.constant 56 : index
    %c0_51 = arith.constant 0 : index
    %169 = vector.load %arg11[%c56_50, %c0_51] : memref<64x128xf32, #tpu.memory_space<vmem>>, vector<8x128xf32>
    tpu.vector_store %arg11[%c56_50, %c0_51], %168 {strides = array<i32>} : memref<64x128xf32, #tpu.memory_space<vmem>>, vector<8x128xf32>,
    %c0_52 = arith.constant 0 : index
    %c0_53 = arith.constant 0 : index
    %170 = vector.load %arg11[%c0_52, %c0_53] : memref<64x128xf32, #tpu.memory_space<vmem>>, vector<64x128xf32>
    %c0_54 = arith.constant 0 : index
    %c0_55 = arith.constant 0 : index
    %171 = vector.load %arg4[%c0_54, %c0_55] : memref<128x512xf32, #tpu.memory_space<vmem>>, vector<128x512xf32>
    %cst_56 = arith.constant dense<0.000000e+00> : vector<64x512xf32>
    %172 = tpu.matmul %170, %171, %cst_56 {dimension_numbers = #tpu.dot_dimension_numbers<[1], [0], [0], [1], [0, 0, 1, 1], [], []>} : vector<64x128xf32>, vector<128x512xf32>, vector<64x512xf32> -> vector<64x512xf32>
    %c0_57 = arith.constant 0 : index
    %c0_58 = arith.constant 0 : index
    %173 = vector.load %arg6[%c0_57, %c0_58] : memref<1x512xf32, #tpu.memory_space<vmem>>, vector<1x512xf32>
    %174 = vector.broadcast %173 : vector<1x512xf32> to vector<64x512xf32>
    %175 = arith.addf %172, %174 : vector<64x512xf32>
    %c0_59 = arith.constant 0 : index
    %c0_60 = arith.constant 0 : index
    %176 = vector.load %arg12[%c0_59, %c0_60] : memref<64x512xf32, #tpu.memory_space<vmem>>, vector<64x512xf32>
    tpu.vector_store %arg12[%c0_59, %c0_60], %175 {strides = array<i32>} : memref<64x512xf32, #tpu.memory_space<vmem>>, vector<64x512xf32>,
    %c0_61 = arith.constant 0 : index
    %c0_62 = arith.constant 0 : index
    %177 = vector.load %arg5[%c0_61, %c0_62] : memref<128x512xf32, #tpu.memory_space<vmem>>, vector<128x512xf32>
    %cst_63 = arith.constant 0.000000e+00 : f32
    %178 = vector.broadcast %cst_63 : f32 to vector<8x128xf32>
    %cst_64 = arith.constant 0.000000e+00 : f32
    %179 = vector.broadcast %cst_64 : f32 to vector<8x128xf32>
    %c0_65 = arith.constant 0 : index
    %c0_66 = arith.constant 0 : index
    %180 = vector.load %arg12[%c0_65, %c0_66] : memref<64x512xf32, #tpu.memory_space<vmem>>, vector<8x512xf32>
    %cst_67 = arith.constant dense<0.000000e+00> : vector<8x512xf32>
    %181 = tpu.matmul %178, %177, %cst_67 {dimension_numbers = #tpu.dot_dimension_numbers<[1], [0], [0], [1], [0, 0, 1, 1], [], []>} : vector<8x128xf32>, vector<128x512xf32>, vector<8x512xf32> -> vector<8x512xf32>
    %182 = arith.addf %180, %181 : vector<8x512xf32>
    %183 = vector.extract_strided_slice %182 {offsets = [0, 0], sizes = [8, 384], strides = [1, 1]} : vector<8x512xf32> to vector<8x384xf32>
    %184 = arith.negf %183 : vector<8x384xf32>
    %185 = math.exp %184 : vector<8x384xf32>
    %cst_68 = arith.constant 1.000000e+00 : f32
    %186 = vector.broadcast %cst_68 : f32 to vector<8x384xf32>
    %187 = arith.addf %186, %185 : vector<8x384xf32>
    %188 = arith.divf %186, %187 : vector<8x384xf32>
    %189 = vector.extract_strided_slice %188 {offsets = [0, 0], sizes = [8, 128], strides = [1, 1]} : vector<8x384xf32> to vector<8x128xf32>
    %190 = vector.extract_strided_slice %188 {offsets = [0, 128], sizes = [8, 128], strides = [1, 1]} : vector<8x384xf32> to vector<8x128xf32>
    %191 = vector.extract_strided_slice %188 {offsets = [0, 256], sizes = [8, 128], strides = [1, 1]} : vector<8x384xf32> to vector<8x128xf32>
    %192 = vector.extract_strided_slice %182 {offsets = [0, 384], sizes = [8, 128], strides = [1, 1]} : vector<8x512xf32> to vector<8x128xf32>
    %193 = math.tanh %192 : vector<8x128xf32>
    %194 = arith.mulf %190, %179 : vector<8x128xf32>
    %195 = arith.mulf %189, %193 : vector<8x128xf32>
    %196 = arith.addf %194, %195 : vector<8x128xf32>
    %197 = math.tanh %196 : vector<8x128xf32>
    %198 = arith.mulf %191, %197 : vector<8x128xf32>
    %c8_69 = arith.constant 8 : index
    %c0_70 = arith.constant 0 : index
    %199 = vector.load %arg12[%c8_69, %c0_70] : memref<64x512xf32, #tpu.memory_space<vmem>>, vector<8x512xf32>
    %cst_71 = arith.constant dense<0.000000e+00> : vector<8x512xf32>
    %200 = tpu.matmul %198, %177, %cst_71 {dimension_numbers = #tpu.dot_dimension_numbers<[1], [0], [0], [1], [0, 0, 1, 1], [], []>} : vector<8x128xf32>, vector<128x512xf32>, vector<8x512xf32> -> vector<8x512xf32>
    %201 = arith.addf %199, %200 : vector<8x512xf32>
    %202 = vector.extract_strided_slice %201 {offsets = [0, 0], sizes = [8, 384], strides = [1, 1]} : vector<8x512xf32> to vector<8x384xf32>
    %203 = arith.negf %202 : vector<8x384xf32>
    %204 = math.exp %203 : vector<8x384xf32>
    %cst_72 = arith.constant 1.000000e+00 : f32
    %205 = vector.broadcast %cst_72 : f32 to vector<8x384xf32>
    %206 = arith.addf %205, %204 : vector<8x384xf32>
    %207 = arith.divf %205, %206 : vector<8x384xf32>
    %208 = vector.extract_strided_slice %207 {offsets = [0, 0], sizes = [8, 128], strides = [1, 1]} : vector<8x384xf32> to vector<8x128xf32>
    %209 = vector.extract_strided_slice %207 {offsets = [0, 128], sizes = [8, 128], strides = [1, 1]} : vector<8x384xf32> to vector<8x128xf32>
    %210 = vector.extract_strided_slice %207 {offsets = [0, 256], sizes = [8, 128], strides = [1, 1]} : vector<8x384xf32> to vector<8x128xf32>
    %211 = vector.extract_strided_slice %201 {offsets = [0, 384], sizes = [8, 128], strides = [1, 1]} : vector<8x512xf32> to vector<8x128xf32>
    %212 = math.tanh %211 : vector<8x128xf32>
    %213 = arith.mulf %209, %196 : vector<8x128xf32>
    %214 = arith.mulf %208, %212 : vector<8x128xf32>
    %215 = arith.addf %213, %214 : vector<8x128xf32>
    %216 = math.tanh %215 : vector<8x128xf32>
    %217 = arith.mulf %210, %216 : vector<8x128xf32>
    %c16_73 = arith.constant 16 : index
    %c0_74 = arith.constant 0 : index
    %218 = vector.load %arg12[%c16_73, %c0_74] : memref<64x512xf32, #tpu.memory_space<vmem>>, vector<8x512xf32>
    %cst_75 = arith.constant dense<0.000000e+00> : vector<8x512xf32>
    %219 = tpu.matmul %217, %177, %cst_75 {dimension_numbers = #tpu.dot_dimension_numbers<[1], [0], [0], [1], [0, 0, 1, 1], [], []>} : vector<8x128xf32>, vector<128x512xf32>, vector<8x512xf32> -> vector<8x512xf32>
    %220 = arith.addf %218, %219 : vector<8x512xf32>
    %221 = vector.extract_strided_slice %220 {offsets = [0, 0], sizes = [8, 384], strides = [1, 1]} : vector<8x512xf32> to vector<8x384xf32>
    %222 = arith.negf %221 : vector<8x384xf32>
    %223 = math.exp %222 : vector<8x384xf32>
    %cst_76 = arith.constant 1.000000e+00 : f32
    %224 = vector.broadcast %cst_76 : f32 to vector<8x384xf32>
    %225 = arith.addf %224, %223 : vector<8x384xf32>
    %226 = arith.divf %224, %225 : vector<8x384xf32>
    %227 = vector.extract_strided_slice %226 {offsets = [0, 0], sizes = [8, 128], strides = [1, 1]} : vector<8x384xf32> to vector<8x128xf32>
    %228 = vector.extract_strided_slice %226 {offsets = [0, 128], sizes = [8, 128], strides = [1, 1]} : vector<8x384xf32> to vector<8x128xf32>
    %229 = vector.extract_strided_slice %226 {offsets = [0, 256], sizes = [8, 128], strides = [1, 1]} : vector<8x384xf32> to vector<8x128xf32>
    %230 = vector.extract_strided_slice %220 {offsets = [0, 384], sizes = [8, 128], strides = [1, 1]} : vector<8x512xf32> to vector<8x128xf32>
    %231 = math.tanh %230 : vector<8x128xf32>
    %232 = arith.mulf %228, %215 : vector<8x128xf32>
    %233 = arith.mulf %227, %231 : vector<8x128xf32>
    %234 = arith.addf %232, %233 : vector<8x128xf32>
    %235 = math.tanh %234 : vector<8x128xf32>
    %236 = arith.mulf %229, %235 : vector<8x128xf32>
    %c24_77 = arith.constant 24 : index
    %c0_78 = arith.constant 0 : index
    %237 = vector.load %arg12[%c24_77, %c0_78] : memref<64x512xf32, #tpu.memory_space<vmem>>, vector<8x512xf32>
    %cst_79 = arith.constant dense<0.000000e+00> : vector<8x512xf32>
    %238 = tpu.matmul %236, %177, %cst_79 {dimension_numbers = #tpu.dot_dimension_numbers<[1], [0], [0], [1], [0, 0, 1, 1], [], []>} : vector<8x128xf32>, vector<128x512xf32>, vector<8x512xf32> -> vector<8x512xf32>
    %239 = arith.addf %237, %238 : vector<8x512xf32>
    %240 = vector.extract_strided_slice %239 {offsets = [0, 0], sizes = [8, 384], strides = [1, 1]} : vector<8x512xf32> to vector<8x384xf32>
    %241 = arith.negf %240 : vector<8x384xf32>
    %242 = math.exp %241 : vector<8x384xf32>
    %cst_80 = arith.constant 1.000000e+00 : f32
    %243 = vector.broadcast %cst_80 : f32 to vector<8x384xf32>
    %244 = arith.addf %243, %242 : vector<8x384xf32>
    %245 = arith.divf %243, %244 : vector<8x384xf32>
    %246 = vector.extract_strided_slice %245 {offsets = [0, 0], sizes = [8, 128], strides = [1, 1]} : vector<8x384xf32> to vector<8x128xf32>
    %247 = vector.extract_strided_slice %245 {offsets = [0, 128], sizes = [8, 128], strides = [1, 1]} : vector<8x384xf32> to vector<8x128xf32>
    %248 = vector.extract_strided_slice %245 {offsets = [0, 256], sizes = [8, 128], strides = [1, 1]} : vector<8x384xf32> to vector<8x128xf32>
    %249 = vector.extract_strided_slice %239 {offsets = [0, 384], sizes = [8, 128], strides = [1, 1]} : vector<8x512xf32> to vector<8x128xf32>
    %250 = math.tanh %249 : vector<8x128xf32>
    %251 = arith.mulf %247, %234 : vector<8x128xf32>
    %252 = arith.mulf %246, %250 : vector<8x128xf32>
    %253 = arith.addf %251, %252 : vector<8x128xf32>
    %254 = math.tanh %253 : vector<8x128xf32>
    %255 = arith.mulf %248, %254 : vector<8x128xf32>
    %c32_81 = arith.constant 32 : index
    %c0_82 = arith.constant 0 : index
    %256 = vector.load %arg12[%c32_81, %c0_82] : memref<64x512xf32, #tpu.memory_space<vmem>>, vector<8x512xf32>
    %cst_83 = arith.constant dense<0.000000e+00> : vector<8x512xf32>
    %257 = tpu.matmul %255, %177, %cst_83 {dimension_numbers = #tpu.dot_dimension_numbers<[1], [0], [0], [1], [0, 0, 1, 1], [], []>} : vector<8x128xf32>, vector<128x512xf32>, vector<8x512xf32> -> vector<8x512xf32>
    %258 = arith.addf %256, %257 : vector<8x512xf32>
    %259 = vector.extract_strided_slice %258 {offsets = [0, 0], sizes = [8, 384], strides = [1, 1]} : vector<8x512xf32> to vector<8x384xf32>
    %260 = arith.negf %259 : vector<8x384xf32>
    %261 = math.exp %260 : vector<8x384xf32>
    %cst_84 = arith.constant 1.000000e+00 : f32
    %262 = vector.broadcast %cst_84 : f32 to vector<8x384xf32>
    %263 = arith.addf %262, %261 : vector<8x384xf32>
    %264 = arith.divf %262, %263 : vector<8x384xf32>
    %265 = vector.extract_strided_slice %264 {offsets = [0, 0], sizes = [8, 128], strides = [1, 1]} : vector<8x384xf32> to vector<8x128xf32>
    %266 = vector.extract_strided_slice %264 {offsets = [0, 128], sizes = [8, 128], strides = [1, 1]} : vector<8x384xf32> to vector<8x128xf32>
    %267 = vector.extract_strided_slice %264 {offsets = [0, 256], sizes = [8, 128], strides = [1, 1]} : vector<8x384xf32> to vector<8x128xf32>
    %268 = vector.extract_strided_slice %258 {offsets = [0, 384], sizes = [8, 128], strides = [1, 1]} : vector<8x512xf32> to vector<8x128xf32>
    %269 = math.tanh %268 : vector<8x128xf32>
    %270 = arith.mulf %266, %253 : vector<8x128xf32>
    %271 = arith.mulf %265, %269 : vector<8x128xf32>
    %272 = arith.addf %270, %271 : vector<8x128xf32>
    %273 = math.tanh %272 : vector<8x128xf32>
    %274 = arith.mulf %267, %273 : vector<8x128xf32>
    %c40_85 = arith.constant 40 : index
    %c0_86 = arith.constant 0 : index
    %275 = vector.load %arg12[%c40_85, %c0_86] : memref<64x512xf32, #tpu.memory_space<vmem>>, vector<8x512xf32>
    %cst_87 = arith.constant dense<0.000000e+00> : vector<8x512xf32>
    %276 = tpu.matmul %274, %177, %cst_87 {dimension_numbers = #tpu.dot_dimension_numbers<[1], [0], [0], [1], [0, 0, 1, 1], [], []>} : vector<8x128xf32>, vector<128x512xf32>, vector<8x512xf32> -> vector<8x512xf32>
    %277 = arith.addf %275, %276 : vector<8x512xf32>
    %278 = vector.extract_strided_slice %277 {offsets = [0, 0], sizes = [8, 384], strides = [1, 1]} : vector<8x512xf32> to vector<8x384xf32>
    %279 = arith.negf %278 : vector<8x384xf32>
    %280 = math.exp %279 : vector<8x384xf32>
    %cst_88 = arith.constant 1.000000e+00 : f32
    %281 = vector.broadcast %cst_88 : f32 to vector<8x384xf32>
    %282 = arith.addf %281, %280 : vector<8x384xf32>
    %283 = arith.divf %281, %282 : vector<8x384xf32>
    %284 = vector.extract_strided_slice %283 {offsets = [0, 0], sizes = [8, 128], strides = [1, 1]} : vector<8x384xf32> to vector<8x128xf32>
    %285 = vector.extract_strided_slice %283 {offsets = [0, 128], sizes = [8, 128], strides = [1, 1]} : vector<8x384xf32> to vector<8x128xf32>
    %286 = vector.extract_strided_slice %283 {offsets = [0, 256], sizes = [8, 128], strides = [1, 1]} : vector<8x384xf32> to vector<8x128xf32>
    %287 = vector.extract_strided_slice %277 {offsets = [0, 384], sizes = [8, 128], strides = [1, 1]} : vector<8x512xf32> to vector<8x128xf32>
    %288 = math.tanh %287 : vector<8x128xf32>
    %289 = arith.mulf %285, %272 : vector<8x128xf32>
    %290 = arith.mulf %284, %288 : vector<8x128xf32>
    %291 = arith.addf %289, %290 : vector<8x128xf32>
    %292 = math.tanh %291 : vector<8x128xf32>
    %293 = arith.mulf %286, %292 : vector<8x128xf32>
    %c48_89 = arith.constant 48 : index
    %c0_90 = arith.constant 0 : index
    %294 = vector.load %arg12[%c48_89, %c0_90] : memref<64x512xf32, #tpu.memory_space<vmem>>, vector<8x512xf32>
    %cst_91 = arith.constant dense<0.000000e+00> : vector<8x512xf32>
    %295 = tpu.matmul %293, %177, %cst_91 {dimension_numbers = #tpu.dot_dimension_numbers<[1], [0], [0], [1], [0, 0, 1, 1], [], []>} : vector<8x128xf32>, vector<128x512xf32>, vector<8x512xf32> -> vector<8x512xf32>
    %296 = arith.addf %294, %295 : vector<8x512xf32>
    %297 = vector.extract_strided_slice %296 {offsets = [0, 0], sizes = [8, 384], strides = [1, 1]} : vector<8x512xf32> to vector<8x384xf32>
    %298 = arith.negf %297 : vector<8x384xf32>
    %299 = math.exp %298 : vector<8x384xf32>
    %cst_92 = arith.constant 1.000000e+00 : f32
    %300 = vector.broadcast %cst_92 : f32 to vector<8x384xf32>
    %301 = arith.addf %300, %299 : vector<8x384xf32>
    %302 = arith.divf %300, %301 : vector<8x384xf32>
    %303 = vector.extract_strided_slice %302 {offsets = [0, 0], sizes = [8, 128], strides = [1, 1]} : vector<8x384xf32> to vector<8x128xf32>
    %304 = vector.extract_strided_slice %302 {offsets = [0, 128], sizes = [8, 128], strides = [1, 1]} : vector<8x384xf32> to vector<8x128xf32>
    %305 = vector.extract_strided_slice %302 {offsets = [0, 256], sizes = [8, 128], strides = [1, 1]} : vector<8x384xf32> to vector<8x128xf32>
    %306 = vector.extract_strided_slice %296 {offsets = [0, 384], sizes = [8, 128], strides = [1, 1]} : vector<8x512xf32> to vector<8x128xf32>
    %307 = math.tanh %306 : vector<8x128xf32>
    %308 = arith.mulf %304, %291 : vector<8x128xf32>
    %309 = arith.mulf %303, %307 : vector<8x128xf32>
    %310 = arith.addf %308, %309 : vector<8x128xf32>
    %311 = math.tanh %310 : vector<8x128xf32>
    %312 = arith.mulf %305, %311 : vector<8x128xf32>
    %c56_93 = arith.constant 56 : index
    %c0_94 = arith.constant 0 : index
    %313 = vector.load %arg12[%c56_93, %c0_94] : memref<64x512xf32, #tpu.memory_space<vmem>>, vector<8x512xf32>
    %cst_95 = arith.constant dense<0.000000e+00> : vector<8x512xf32>
    %314 = tpu.matmul %312, %177, %cst_95 {dimension_numbers = #tpu.dot_dimension_numbers<[1], [0], [0], [1], [0, 0, 1, 1], [], []>} : vector<8x128xf32>, vector<128x512xf32>, vector<8x512xf32> -> vector<8x512xf32>
    %315 = arith.addf %313, %314 : vector<8x512xf32>
    %316 = vector.extract_strided_slice %315 {offsets = [0, 0], sizes = [8, 384], strides = [1, 1]} : vector<8x512xf32> to vector<8x384xf32>
    %317 = arith.negf %316 : vector<8x384xf32>
    %318 = math.exp %317 : vector<8x384xf32>
    %cst_96 = arith.constant 1.000000e+00 : f32
    %319 = vector.broadcast %cst_96 : f32 to vector<8x384xf32>
    %320 = arith.addf %319, %318 : vector<8x384xf32>
    %321 = arith.divf %319, %320 : vector<8x384xf32>
    %322 = vector.extract_strided_slice %321 {offsets = [0, 0], sizes = [8, 128], strides = [1, 1]} : vector<8x384xf32> to vector<8x128xf32>
    %323 = vector.extract_strided_slice %321 {offsets = [0, 128], sizes = [8, 128], strides = [1, 1]} : vector<8x384xf32> to vector<8x128xf32>
    %324 = vector.extract_strided_slice %321 {offsets = [0, 256], sizes = [8, 128], strides = [1, 1]} : vector<8x384xf32> to vector<8x128xf32>
    %325 = vector.extract_strided_slice %315 {offsets = [0, 384], sizes = [8, 128], strides = [1, 1]} : vector<8x512xf32> to vector<8x128xf32>
    %326 = math.tanh %325 : vector<8x128xf32>
    %327 = arith.mulf %323, %310 : vector<8x128xf32>
    %328 = arith.mulf %322, %326 : vector<8x128xf32>
    %329 = arith.addf %327, %328 : vector<8x128xf32>
    %330 = math.tanh %329 : vector<8x128xf32>
    %331 = arith.mulf %324, %330 : vector<8x128xf32>
    %cst_97 = arith.constant 0.000000e+00 : f32
    %332 = vector.broadcast %cst_97 : f32 to vector<8x128xf32>
    %333 = arith.maximumf %331, %332 : vector<8x128xf32>
    %c0_98 = arith.constant 0 : index
    %c0_99 = arith.constant 0 : index
    %334 = vector.load %arg7[%c0_98, %c0_99] : memref<128x2xf32, #tpu.memory_space<vmem>>, vector<128x2xf32>
    %cst_100 = arith.constant dense<0.000000e+00> : vector<8x2xf32>
    %335 = tpu.matmul %333, %334, %cst_100 {dimension_numbers = #tpu.dot_dimension_numbers<[1], [0], [0], [1], [0, 0, 1, 1], [], []>} : vector<8x128xf32>, vector<128x2xf32>, vector<8x2xf32> -> vector<8x2xf32>
    %c0_101 = arith.constant 0 : index
    %c0_102 = arith.constant 0 : index
    %336 = vector.load %arg8[%c0_101, %c0_102] : memref<1x2xf32, #tpu.memory_space<vmem>>, vector<1x2xf32>
    %337 = vector.broadcast %336 : vector<1x2xf32> to vector<8x2xf32>
    %338 = arith.addf %335, %337 : vector<8x2xf32>
    %c0_103 = arith.constant 0 : index
    %c0_104 = arith.constant 0 : index
    %339 = vector.load %arg9[%c0_103, %c0_104] : memref<8x2xf32, #tpu.memory_space<vmem>>, vector<8x2xf32>
    tpu.vector_store %arg9[%c0_103, %c0_104], %338 {strides = array<i32>} : memref<8x2xf32, #tpu.memory_space<vmem>>, vector<8x2xf32>,
    return
  }
}

</mosaic_0001>

<bundles_post_ra>
// kernel: mylstm_forward.1
= control target key start
LH: loop header
LB: loop body
LE: loop exit
PB: predicated region body
PF: predicated region fallthrough
CT: control target
= control target key end

     0   :  { %vm91_vm0 = vcmask 1045504   ;;  %vm66_vm1 = vcmask 48128   ;;  %v5354_v3 = vmov 0.0   ;;  %vm5356_vm2 = vmmov 0   ;;  %s7008_s1 = inlined_call_operand.vmem [shape: f32[6,512], index: 1, kind: input, shape index: {}]   ;;  %s7009_s0 = inlined_call_operand.vmem [shape: f32[64,6], index: 0, kind: input, shape index: {}]   ;;  %s7010_s2 = inlined_call_operand.vmem [shape: f32[128,512], index: 2, kind: input, shape index: {}]   ;;  %s7011_s3 = inlined_call_operand.vmem [shape: f32[1,512], index: 3, kind: input, shape index: {}]   ;;  %s7012_s4 = inlined_call_operand.vmem [shape: f32[128,512], index: 4, kind: input, shape index: {}]   ;;  %s7013_s5 = inlined_call_operand.vmem [shape: f32[128,512], index: 5, kind: input, shape index: {}]   ;;  %s7014_s6 = inlined_call_operand.vmem [shape: f32[1,512], index: 6, kind: input, shape index: {}]   ;;  %s7015_s7 = inlined_call_operand.vmem [shape: f32[128,2], index: 7, kind: input, shape index: {}]   ;;  %s7016_s8 = inlined_call_operand.vmem [shape: f32[1,2], index: 8, kind: input, shape index: {}]   ;;  %s7017_s9 = inlined_call_operand.vmem [shape: f32[8,2], index: 9, kind: output, shape index: {}]  }
   0x1   :  { %v41_v0 = vld [vmem:[%s7008_s1 + $0x8] sm:$0x3f]  ;;  %v43_v1 = vld [vmem:[%s7008_s1 + $0x18] sm:$0x3f]  ;;  %v40_v2 = vld [vmem:[%s7008_s1] sm:$0x3f]  ;;  %168 = vmatprep.mubr.f32.mxu0 %v5354_v3  ;;  %281 = vmatprep.mubr.f32.mxu1 %v5354_v3 }
   0x2   :  { %3734 = vmatprep.subr.msk.mxu0 %vm91_vm0, %v41_v0  ;;  %3744 = vmatprep.subr.msk.mxu1 %vm91_vm0, %v43_v1  ;;  %v42_v4 = vld [vmem:[%s7008_s1 + $0x10] sm:$0x3f]  ;;  %v32_v5 = vld [vmem:[%s7009_s0] sm:$0xff]  ;;  %v363_v6 = vld [vmem:[%s7010_s2 + $0x8] sm:$0xff]  ;;  %vm3728_vm3 = vcmask 15360  }
   0x3   :  { %3735 = vmatpush1.msk.msra.mxu0 %vm91_vm0, %v40_v2  ;;  %3745 = vmatpush1.msk.msra.mxu1 %vm91_vm0, %v42_v4  ;;  %v367_v7 = vld [vmem:[%s7010_s2 + $0x28] sm:$0xff]  ;;  %v365_v8 = vld [vmem:[%s7010_s2 + $0x18] sm:$0xff]  ;;  %v362_v12 = vld [vmem:[%s7010_s2] sm:$0xff] }
   0x4   :  { %v369_v9 = vld [vmem:[%s7010_s2 + $0x38] sm:$0xff]  ;;  %3736 = vmatmul.mubr.msk.f32.vlgmr.msra.gmra.mrb[0].mxu0 %vm66_vm1, %v32_v5  ;;  %3746 = vmatmul.mubr.msk.f32.vlgmr.msra.gmra.mrb[0].mxu1 %vm66_vm1, %v32_v5  ;;  %v5442_v10 = vpack.c.bf16 %v367_v7, %v363_v6  ;;  %v366_v13 = vld [vmem:[%s7010_s2 + $0x20] sm:$0xff]  ;;  %v364_v14 = vld [vmem:[%s7010_s2 + $0x10] sm:$0xff] }
   0x5   :  { %v5444_v11 = vpack.c.bf16 %v369_v9, %v365_v8  ;;  %v5455_v15 = vpack.c.bf16 %v366_v13, %v362_v12  ;;  %v368_v16 = vld [vmem:[%s7010_s2 + $0x30] sm:$0xff]  ;;  %174 = vmatprep.mubr.f32.mxu0 %v5354_v3  ;;  %287 = vmatprep.mubr.f32.mxu1 %v5354_v3  ;;  %v33_v17 = vld [vmem:[%s7009_s0 + $0x8] sm:$0xff]  ;;  %v373_v21 = vld [vmem:[%s7010_s2 + $0x58] sm:$0xff] }
   0x6   :  { %v371_v18 = vld [vmem:[%s7010_s2 + $0x48] sm:$0xff]  ;;  %3856 = vmatprep.subr.bf16.mxu0 %v5442_v10  ;;  %v5470_v19 = vpack.c.bf16 %v368_v16, %v364_v14  ;;  %v377_v22 = vld [vmem:[%s7010_s2 + $0x78] sm:$0xff]  ;;  %v370_v25 = vld [vmem:[%s7010_s2 + $0x40] sm:$0xff] }
   0x7   :  { %3888 = vmatprep.subr.bf16.mxu1 %v5444_v11  ;;  %v375_v20 = vld [vmem:[%s7010_s2 + $0x68] sm:$0xff]  ;;  %3858 = vmatpush1.bf16.msra.mxu0 %v5455_v15  ;;  %v5484_v24 = vpack.c.bf16 %v377_v22, %v373_v21  ;;  %v374_v26 = vld [vmem:[%s7010_s2 + $0x60] sm:$0xff]  ;;  %v372_v27 = vld [vmem:[%s7010_s2 + $0x50] sm:$0xff] }
   0x8   :  { %v5482_v23 = vpack.c.bf16 %v375_v20, %v371_v18  ;;  %3890 = vmatpush1.bf16.msra.mxu1 %v5470_v19  ;;  %3737 = vmatmul.mubr.msk.f32.gmra.mrb[2].mxu0 %vm66_vm1, %v33_v17  ;;  %v5497_v28 = vpack.c.bf16 %v374_v26, %v370_v25  ;;  %v376_v29 = vld [vmem:[%s7010_s2 + $0x70] sm:$0xff]  ;;  %v379_v31 = vld [vmem:[%s7010_s2 + $0x88] sm:$0xff]  ;;  %v381_v34 = vld [vmem:[%s7010_s2 + $0x98] sm:$0xff] }
   0x9   :  { %v34_v30 = vld [vmem:[%s7009_s0 + $0x10] sm:$0xff]  ;;  %3747 = vmatmul.mubr.msk.f32.gmra.mrb[2].mxu1 %vm66_vm1, %v33_v17  ;;  %v5510_v32 = vpack.c.bf16 %v376_v29, %v372_v27  ;;  %v383_v33 = vld [vmem:[%s7010_s2 + $0xa8] sm:$0xff]  ;;  %v385_v35 = vld [vmem:[%s7010_s2 + $0xb8] sm:$0xff]  ;;  %3892 = vmatprep.subr.bf16.mxu1 %v5484_v24 }
   0xa   :  { %3860 = vmatprep.subr.bf16.mxu0 %v5482_v23  ;;  %180 = vmatprep.mubr.f32.mxu0 %v5354_v3  ;;  %v5523_v36 = vpack.c.bf16 %v383_v33, %v379_v31  ;;  %v5525_v37 = vpack.c.bf16 %v385_v35, %v381_v34  ;;  %v378_v38 = vld [vmem:[%s7010_s2 + $0x80] sm:$0xff]  ;;  %v380_v40 = vld [vmem:[%s7010_s2 + $0x90] sm:$0xff]  ;;  %v35_v43 = vld [vmem:[%s7009_s0 + $0x18] sm:$0xff] }
   0xb   :  { %v382_v39 = vld [vmem:[%s7010_s2 + $0xa0] sm:$0xff]  ;;  %3862 = vmatpush1.bf16.msra.mxu0 %v5497_v28  ;;  %293 = vmatprep.mubr.f32.mxu1 %v5354_v3  ;;  %v384_v42 = vld [vmem:[%s7010_s2 + $0xb0] sm:$0xff]  ;;  %v387_v44 = vld [vmem:[%s7010_s2 + $0xc8] sm:$0xff] }
   0xc   :  { %v5538_v41 = vpack.c.bf16 %v382_v39, %v378_v38  ;;  %3894 = vmatpush1.bf16.msra.mxu1 %v5510_v32  ;;  %3738 = vmatmul.mubr.msk.f32.gmra.mrb[4].mxu0 %vm66_vm1, %v34_v30  ;;  %v5551_v45 = vpack.c.bf16 %v384_v42, %v380_v40  ;;  %v391_v46 = vld [vmem:[%s7010_s2 + $0xe8] sm:$0xff]  ;;  %v389_v47 = vld [vmem:[%s7010_s2 + $0xd8] sm:$0xff]  ;;  %v386_v50 = vld [vmem:[%s7010_s2 + $0xc0] sm:$0xff] }
   0xd   :  { %v393_v48 = vld [vmem:[%s7010_s2 + $0xf8] sm:$0xff]  ;;  %3748 = vmatmul.mubr.msk.f32.gmra.mrb[4].mxu1 %vm66_vm1, %v34_v30  ;;  %3864 = vmatprep.subr.bf16.mxu0 %v5523_v36  ;;  %v5564_v49 = vpack.c.bf16 %v391_v46, %v387_v44  ;;  %v390_v51 = vld [vmem:[%s7010_s2 + $0xe0] sm:$0xff]  ;;  %v388_v52 = vld [vmem:[%s7010_s2 + $0xd0] sm:$0xff] }
   0xe   :  { %3896 = vmatprep.subr.bf16.mxu1 %v5525_v37  ;;  %186 = vmatprep.mubr.f32.mxu0 %v5354_v3  ;;  %v5577_v53 = vpack.c.bf16 %v393_v48, %v389_v47  ;;  %v392_v54 = vld [vmem:[%s7010_s2 + $0xf0] sm:$0xff]  ;;  %v395_v55 = vld [vmem:[%s7010_s2 + $0x108] sm:$0xff]  ;;  %v5587_v56 = vpack.c.bf16 %v390_v51, %v386_v50  ;;  %v397_v58 = vld [vmem:[%s7010_s2 + $0x118] sm:$0xff] }
   0xf   :  { %3866 = vmatpush1.bf16.msra.mxu0 %v5538_v41  ;;  %299 = vmatprep.mubr.f32.mxu1 %v5354_v3  ;;  %v399_v57 = vld [vmem:[%s7010_s2 + $0x128] sm:$0xff]  ;;  %v401_v59 = vld [vmem:[%s7010_s2 + $0x138] sm:$0xff]  ;;  %v5600_v60 = vpack.c.bf16 %v392_v54, %v388_v52  ;;  %v394_v61 = vld [vmem:[%s7010_s2 + $0x100] sm:$0xff] }
  0x10   :  { %3898 = vmatpush1.bf16.msra.mxu1 %v5551_v45  ;;  %3739 = vmatmul.mubr.msk.f32.gmra.mrb[6].mxu0 %vm66_vm1, %v35_v43  ;;  %v398_v62 = vld [vmem:[%s7010_s2 + $0x120] sm:$0xff]  ;;  %v5613_v0 = vpack.c.bf16 %v399_v57, %v395_v55  ;;  %v396_v1 = vld [vmem:[%s7010_s2 + $0x110] sm:$0xff]  ;;  %v5623_v4 = vpack.c.bf16 %v401_v59, %v397_v58  ;;  %v403_v5 = vld [vmem:[%s7010_s2 + $0x148] sm:$0xff] }
  0x11   :  { %3749 = vmatmul.mubr.msk.f32.gmra.mrb[6].mxu1 %vm66_vm1, %v35_v43  ;;  %3868 = vmatprep.subr.bf16.mxu0 %v5564_v49  ;;  %v36_v63 = vld [vmem:[%s7009_s0 + $0x20] sm:$0xff]  ;;  %v400_v2 = vld [vmem:[%s7010_s2 + $0x130] sm:$0xff]  ;;  %v407_v6 = vld [vmem:[%s7010_s2 + $0x168] sm:$0xff]  ;;  %v5633_v7 = vpack.c.bf16 %v398_v62, %v394_v61  ;;  %v46_v62 = vlaneseq }
  0x12   :  { %3900 = vmatprep.subr.bf16.mxu1 %v5577_v53  ;;  %192 = vmatprep.mubr.f32.mxu0 %v5354_v3  ;;  %v405_v8 = vld [vmem:[%s7010_s2 + $0x158] sm:$0xff]  ;;  %v5643_v12 = vpack.c.bf16 %v400_v2, %v396_v1  ;;  %v402_v13 = vld [vmem:[%s7010_s2 + $0x140] sm:$0xff]  ;;  %v37_v16 = vld [vmem:[%s7009_s0 + $0x28] sm:$0xff]  ;;  %v5656_v17 = vpack.c.bf16 %v407_v6, %v403_v5 }
  0x13   :  { %3870 = vmatpush1.bf16.msra.mxu0 %v5587_v56  ;;  %305 = vmatprep.mubr.f32.mxu1 %v5354_v3  ;;  %v409_v9 = vld [vmem:[%s7010_s2 + $0x178] sm:$0xff]  ;;  %v406_v14 = vld [vmem:[%s7010_s2 + $0x160] sm:$0xff]  ;;  %v404_v18 = vld [vmem:[%s7010_s2 + $0x150] sm:$0xff] }
  0x14   :  { %3902 = vmatpush1.bf16.msra.mxu1 %v5600_v60  ;;  %3740 = vmatmul.mubr.msk.f32.gmra.mrb[8].mxu0 %vm66_vm1, %v36_v63  ;;  %v408_v20 = vld [vmem:[%s7010_s2 + $0x170] sm:$0xff]  ;;  %v5666_v21 = vpack.c.bf16 %v409_v9, %v405_v8  ;;  %v411_v22 = vld [vmem:[%s7010_s2 + $0x188] sm:$0xff]  ;;  %v5676_v26 = vpack.c.bf16 %v406_v14, %v402_v13  ;;  %v413_v27 = vld [vmem:[%s7010_s2 + $0x198] sm:$0xff] }
  0x15   :  { %3750 = vmatmul.mubr.msk.f32.gmra.mrb[8].mxu1 %vm66_vm1, %v36_v63  ;;  %3872 = vmatprep.subr.bf16.mxu0 %v5613_v0  ;;  %v415_v25 = vld [vmem:[%s7010_s2 + $0x1a8] sm:$0xff]  ;;  %v417_v29 = vld [vmem:[%s7010_s2 + $0x1b8] sm:$0xff]  ;;  %v5686_v30 = vpack.c.bf16 %v408_v20, %v404_v18  ;;  %v410_v31 = vld [vmem:[%s7010_s2 + $0x180] sm:$0xff]  ;;  %v5807_v63 = vshrl.u32 %v46_v62, 7 }
  0x16   :  { %3904 = vmatprep.subr.bf16.mxu1 %v5623_v4  ;;  %198 = vmatprep.mubr.f32.mxu0 %v5354_v3  ;;  %v414_v33 = vld [vmem:[%s7010_s2 + $0x1a0] sm:$0xff]  ;;  %v38_v34 = vld [vmem:[%s7009_s0 + $0x30] sm:$0xff]  ;;  %v5699_v35 = vpack.c.bf16 %v415_v25, %v411_v22  ;;  %v5709_v40 = vpack.c.bf16 %v417_v29, %v413_v27  ;;  %v419_v42 = vld [vmem:[%s7010_s2 + $0x1c8] sm:$0xff] }
  0x17   :  { %3874 = vmatpush1.bf16.msra.mxu0 %v5633_v7  ;;  %311 = vmatprep.mubr.f32.mxu1 %v5354_v3  ;;  %v412_v38 = vld [vmem:[%s7010_s2 + $0x190] sm:$0xff]  ;;  %v423_v43 = vld [vmem:[%s7010_s2 + $0x1e8] sm:$0xff]  ;;  %v5719_v44 = vpack.c.bf16 %v414_v33, %v410_v31  ;;  %v421_v46 = vld [vmem:[%s7010_s2 + $0x1d8] sm:$0xff]  ;;  %v48_v1 = vsub.s32 0, %v5807_v63  ;;  %v52_v5 = vsub.s32 1, %v5807_v63  ;;  %v56_v13 = vsub.s32 2, %v5807_v63 }
  0x18   :  { %3906 = vmatpush1.bf16.msra.mxu1 %v5643_v12  ;;  %3741 = vmatmul.mubr.msk.f32.gmra.mrb[10].mxu0 %vm66_vm1, %v37_v16  ;;  %v416_v39 = vld [vmem:[%s7010_s2 + $0x1b0] sm:$0xff]  ;;  %v425_v47 = vld [vmem:[%s7010_s2 + $0x1f8] sm:$0xff]  ;;  %v418_v50 = vld [vmem:[%s7010_s2 + $0x1c0] sm:$0xff]  ;;  %v5742_v54 = vpack.c.bf16 %v423_v43, %v419_v42  ;;  %v60_v31 = vsub.s32 3, %v5807_v63 }
  0x19   :  { %3751 = vmatmul.mubr.msk.f32.gmra.mrb[10].mxu1 %vm66_vm1, %v37_v16  ;;  %3876 = vmatprep.subr.bf16.mxu0 %v5656_v17  ;;  %v5729_v48 = vpack.c.bf16 %v416_v39, %v412_v38  ;;  %v422_v51 = vld [vmem:[%s7010_s2 + $0x1e0] sm:$0xff]  ;;  %v39_v52 = vld [vmem:[%s7009_s0 + $0x38] sm:$0xff]  ;;  %v420_v55 = vld [vmem:[%s7010_s2 + $0x1d0] sm:$0xff]  ;;  %v5752_v58 = vpack.c.bf16 %v425_v47, %v421_v46 }
  0x1a   :  { %3908 = vmatprep.subr.bf16.mxu1 %v5666_v21  ;;  %204 = vmatprep.mubr.f32.mxu0 %v5354_v3  ;;  %v424_v57 = vld [vmem:[%s7010_s2 + $0x1f0] sm:$0xff]  ;;  %v5756_v59 = vpack.c.bf16 %v422_v51, %v418_v50  ;;  %v44_v2 = vld [vmem:[%s7011_s3] sm:$0xf] }
  0x1b   :  { %3878 = vmatpush1.bf16.msra.mxu0 %v5676_v26  ;;  %317 = vmatprep.mubr.f32.mxu1 %v5354_v3  ;;  %v5760_v61 = vpack.c.bf16 %v424_v57, %v420_v55  ;;  %v5816_v6 = vrot.slane %v44_v2, %v48_v1  ;;  %v5820_v8 = vrot.slane %v44_v2, %v52_v5 }
  0x1c   :  { %3910 = vmatpush1.bf16.msra.mxu1 %v5686_v30  ;;  %3742 = vmatmul.mubr.msk.f32.gmra.mrb[12].mxu0 %vm66_vm1, %v38_v34  ;;  %v5827_v27 = vrot.slane %v44_v2, %v56_v13 }
  0x1d   :  { %3752 = vmatmul.mubr.msk.f32.gmra.mrb[12].mxu1 %vm66_vm1, %v38_v34  ;;  %3880 = vmatprep.subr.bf16.mxu0 %v5699_v35  ;;  %v5833_v34 = vrot.slane %v44_v2, %v60_v31 }
  0x1e   :  { %3912 = vmatprep.subr.bf16.mxu1 %v5709_v40  ;;  %210 = vmatprep.mubr.f32.mxu0 %v5354_v3 }
  0x1f   :  { %3882 = vmatpush1.bf16.msra.mxu0 %v5719_v44  ;;  %323 = vmatprep.mubr.f32.mxu1 %v5354_v3 }
  0x20   :  { %3914 = vmatpush1.bf16.msra.mxu1 %v5729_v48  ;;  %3743 = vmatmul.mubr.msk.f32.gmra.mrb[14].mxu0 %vm66_vm1, %v39_v52 }
  0x21   :  { %3753 = vmatmul.mubr.msk.f32.gmra.mrb[14].mxu1 %vm66_vm1, %v39_v52  ;;  %3884 = vmatprep.subr.bf16.mxu0 %v5742_v54 }
  0x22   :  { %3916 = vmatprep.subr.bf16.mxu1 %v5752_v58  ;;  %494 = vmatprep.mubr.f32.mxu0 %v5354_v3 }
  0x23   :  { %3886 = vmatpush1.bf16.msra.mxu0 %v5756_v59  ;;  %565 = vmatprep.mubr.f32.mxu1 %v5354_v3 }
  0x24   :  { %3918 = vmatpush1.bf16.msra.mxu1 %v5760_v61  ;;  %3920 = vmatprep.subr.bf16.mxu0 %v5442_v10 }
  0x25   :  { %3952 = vmatprep.subr.bf16.mxu1 %v5444_v11 }
  0x26   :  { %495 = vmatmul.mubr.f32.vlgmr.msra.gmra.mrb[0].mxu0 %v5354_v3 }
  0x27   :  { %566 = vmatmul.mubr.f32.vlgmr.msra.gmra.mrb[0].mxu1 %v5354_v3  ;;  %3922 = vmatpush1.bf16.msra.mxu0 %v5455_v15 }
  0x28   :  { %3954 = vmatpush1.bf16.msra.mxu1 %v5470_v19  ;;  %3924 = vmatprep.subr.bf16.mxu0 %v5482_v23 }
  0x29   :  { %3956 = vmatprep.subr.bf16.mxu1 %v5484_v24  ;;  %669 = vmatprep.mubr.f32.mxu0 %v5354_v3 }
  0x2a   :  { %740 = vmatprep.mubr.f32.mxu1 %v5354_v3 }
  0x2b   :  { %3926 = vmatpush1.bf16.msra.mxu0 %v5497_v28 }
  0x2c   :  { %3958 = vmatpush1.bf16.msra.mxu1 %v5510_v32  ;;  %3928 = vmatprep.subr.bf16.mxu0 %v5523_v36 }
  0x2d   :  { %3960 = vmatprep.subr.bf16.mxu1 %v5525_v37 }
  0x2f   :  { %3930 = vmatpush1.bf16.msra.mxu0 %v5538_v41 }
  0x30   :  { %3962 = vmatpush1.bf16.msra.mxu1 %v5551_v45  ;;  %3932 = vmatprep.subr.bf16.mxu0 %v5564_v49 }
  0x31   :  { %3964 = vmatprep.subr.bf16.mxu1 %v5577_v53 }
  0x33   :  { %3934 = vmatpush1.bf16.msra.mxu0 %v5587_v56 }
  0x34   :  { %3966 = vmatpush1.bf16.msra.mxu1 %v5600_v60  ;;  %3936 = vmatprep.subr.bf16.mxu0 %v5613_v0 }
  0x35   :  { %3968 = vmatprep.subr.bf16.mxu1 %v5623_v4 }
  0x37   :  { %3938 = vmatpush1.bf16.msra.mxu0 %v5633_v7 }
  0x38   :  { %3970 = vmatpush1.bf16.msra.mxu1 %v5643_v12  ;;  %3940 = vmatprep.subr.bf16.mxu0 %v5656_v17 }
  0x39   :  { %3972 = vmatprep.subr.bf16.mxu1 %v5666_v21 }
  0x3b   :  { %3942 = vmatpush1.bf16.msra.mxu0 %v5676_v26 }
  0x3c   :  { %3974 = vmatpush1.bf16.msra.mxu1 %v5686_v30  ;;  %3944 = vmatprep.subr.bf16.mxu0 %v5699_v35 }
  0x3d   :  { %3976 = vmatprep.subr.bf16.mxu1 %v5709_v40 }
  0x3f   :  { %3946 = vmatpush1.bf16.msra.mxu0 %v5719_v44 }
  0x40   :  { %3978 = vmatpush1.bf16.msra.mxu1 %v5729_v48  ;;  %3948 = vmatprep.subr.bf16.mxu0 %v5742_v54 }
  0x41   :  { %3980 = vmatprep.subr.bf16.mxu1 %v5752_v58 }
  0x43   :  { %3950 = vmatpush1.bf16.msra.mxu0 %v5756_v59 }
  0x44   :  { %3982 = vmatpush1.bf16.msra.mxu1 %v5760_v61  ;;  %3984 = vmatprep.subr.bf16.mxu0 %v5442_v10 }
  0x45   :  { %4016 = vmatprep.subr.bf16.mxu1 %v5444_v11 }
  0xf9   :  { %v496_v9 = vpop.f32.mrb[0].mxu0 }
  0xfa   :  { %v4967_v14 = vadd.f32 %v496_v9, %v5816_v6  ;;  %v567_v16 = vpop.f32.mrb[0].mxu1  ;;  %v498_v18 = vpop.f32.mrb[1].mxu0 }
  0xfb   :  { %v4968_v20 = vadd.f32 %v498_v18, %v5820_v8  ;;  %v569_v22 = vpop.f32.mrb[1].mxu1  ;;  %v4983_v33 = vadd.f32 %v567_v16, %v5827_v27 }
  0xfc   :  { %v3754_v25 = vmul.f32 -1.442695, %v4967_v14  ;;  %v4984_v39 = vadd.f32 %v569_v22, %v5833_v34 }
  0xfd   :  { %v3755_v29 = vmul.f32 -1.442695, %v4968_v20  ;;  %v3756_v38 = vmul.f32 -1.442695, %v4983_v33 }
  0xfe   :  { %5098 = vpow2.f32 %v3754_v25 }
  0xff   :  { %5100 = vpow2.f32 %v3755_v29 }
 0x100   :  { %5102 = vpow2.f32 %v3756_v38 }
 0x101   :  { %5104 = vtanh.f32 %v4984_v39 }
 0x108   :  { %v5099_v42 = vpop.eup %5098 }
 0x109   :  { %v585_v43 = vadd.f32 1.0, %v5099_v42  ;;  %v5101_v46 = vpop.eup %5100 }
 0x10a   :  { %v586_v47 = vadd.f32 1.0, %v5101_v46  ;;  %v5103_v50 = vpop.eup %5102 }
 0x10b   :  { %5106 = vrcp.f32 %v585_v43  ;;  %v5105_v51 = vpop.eup %5104  ;;  %v587_v62 = vadd.f32 1.0, %v5103_v50 }
 0x10c   :  { %5108 = vrcp.f32 %v586_v47 }
 0x10d   :  { %5110 = vrcp.f32 %v587_v62 }
 0x115   :  { %v5107_v52 = vpop.eup %5106 }
 0x116   :  { %v596_v55 = vmul.f32 %v5107_v52, %v5105_v51  ;;  %v5109_v57 = vpop.eup %5108 }
 0x117   :  { %v595_v9 = vmul.f32 0.0, %v5109_v57  ;;  %v5111_v14 = vpop.eup %5110 }
 0x119   :  { %v5836_v2 = vadd.f32 %v596_v55, %v595_v9 }
 0x11b   :  { %5112 = vtanh.f32 %v5836_v2 }
 0x125   :  { %v5113_v16 = vpop.eup %5112 }
 0x126   :  { %v5839_v18 = vmul.f32 %v5113_v16, %v5111_v14 }
 0x128   :  { %670 = vmatmul.mubr.f32.vlgmr.msra.gmra.mrb[2].mxu0 %v5839_v18  ;;  %741 = vmatmul.mubr.f32.vlgmr.msra.gmra.mrb[2].mxu1 %v5839_v18 }
 0x129   :  { %3986 = vmatpush1.bf16.msra.mxu0 %v5455_v15  ;;  %4018 = vmatpush1.bf16.msra.mxu1 %v5470_v19 }
 0x12a   :  { %3988 = vmatprep.subr.bf16.mxu0 %v5482_v23  ;;  %4020 = vmatprep.subr.bf16.mxu1 %v5484_v24 }
 0x12b   :  { %844 = vmatprep.mubr.f32.mxu0 %v5354_v3  ;;  %915 = vmatprep.mubr.f32.mxu1 %v5354_v3 }
 0x12d   :  { %3990 = vmatpush1.bf16.msra.mxu0 %v5497_v28  ;;  %4022 = vmatpush1.bf16.msra.mxu1 %v5510_v32 }
 0x12e   :  { %3992 = vmatprep.subr.bf16.mxu0 %v5523_v36  ;;  %4024 = vmatprep.subr.bf16.mxu1 %v5525_v37 }
 0x131   :  { %3994 = vmatpush1.bf16.msra.mxu0 %v5538_v41  ;;  %4026 = vmatpush1.bf16.msra.mxu1 %v5551_v45 }
 0x132   :  { %3996 = vmatprep.subr.bf16.mxu0 %v5564_v49  ;;  %4028 = vmatprep.subr.bf16.mxu1 %v5577_v53 }
 0x135   :  { %3998 = vmatpush1.bf16.msra.mxu0 %v5587_v56  ;;  %4030 = vmatpush1.bf16.msra.mxu1 %v5600_v60 }
 0x136   :  { %4000 = vmatprep.subr.bf16.mxu0 %v5613_v0  ;;  %4032 = vmatprep.subr.bf16.mxu1 %v5623_v4 }
 0x139   :  { %4002 = vmatpush1.bf16.msra.mxu0 %v5633_v7  ;;  %4034 = vmatpush1.bf16.msra.mxu1 %v5643_v12 }
 0x13a   :  { %4004 = vmatprep.subr.bf16.mxu0 %v5656_v17  ;;  %4036 = vmatprep.subr.bf16.mxu1 %v5666_v21 }
 0x13d   :  { %4006 = vmatpush1.bf16.msra.mxu0 %v5676_v26  ;;  %4038 = vmatpush1.bf16.msra.mxu1 %v5686_v30 }
 0x13e   :  { %4008 = vmatprep.subr.bf16.mxu0 %v5699_v35  ;;  %4040 = vmatprep.subr.bf16.mxu1 %v5709_v40 }
 0x141   :  { %4010 = vmatpush1.bf16.msra.mxu0 %v5719_v44  ;;  %4042 = vmatpush1.bf16.msra.mxu1 %v5729_v48 }
 0x142   :  { %4012 = vmatprep.subr.bf16.mxu0 %v5742_v54  ;;  %4044 = vmatprep.subr.bf16.mxu1 %v5752_v58 }
 0x145   :  { %4014 = vmatpush1.bf16.msra.mxu0 %v5756_v59  ;;  %4046 = vmatpush1.bf16.msra.mxu1 %v5760_v61 }
 0x146   :  { %4048 = vmatprep.subr.bf16.mxu0 %v5442_v10  ;;  %4080 = vmatprep.subr.bf16.mxu1 %v5444_v11 }
 0x1fb   :  { %v671_v20 = vpop.f32.mrb[2].mxu0  ;;  %v742_v22 = vpop.f32.mrb[2].mxu1 }
 0x1fc   :  { %v4969_v25 = vadd.f32 %v671_v20, %v5816_v6  ;;  %v673_v29 = vpop.f32.mrb[3].mxu0  ;;  %v744_v33 = vpop.f32.mrb[3].mxu1  ;;  %v4985_v43 = vadd.f32 %v742_v22, %v5827_v27 }
 0x1fd   :  { %v4970_v38 = vadd.f32 %v673_v29, %v5820_v8  ;;  %v4986_v46 = vadd.f32 %v744_v33, %v5833_v34 }
 0x1fe   :  { %v3757_v39 = vmul.f32 -1.442695, %v4969_v25  ;;  %v3759_v47 = vmul.f32 -1.442695, %v4985_v43 }
 0x1ff   :  { %v3758_v42 = vmul.f32 -1.442695, %v4970_v38 }
 0x200   :  { %5114 = vpow2.f32 %v3757_v39 }
 0x201   :  { %5116 = vpow2.f32 %v3758_v42 }
 0x202   :  { %5118 = vtanh.f32 %v4986_v46 }
 0x203   :  { %5120 = vpow2.f32 %v3759_v47 }
 0x20a   :  { %v5115_v50 = vpop.eup %5114 }
 0x20b   :  { %v760_v51 = vadd.f32 1.0, %v5115_v50  ;;  %v5117_v52 = vpop.eup %5116 }
 0x20c   :  { %v761_v55 = vadd.f32 1.0, %v5117_v52  ;;  %v5119_v57 = vpop.eup %5118 }
 0x20d   :  { %5122 = vrcp.f32 %v760_v51  ;;  %v5121_v62 = vpop.eup %5120 }
 0x20e   :  { %5124 = vrcp.f32 %v761_v55  ;;  %v762_v20 = vadd.f32 1.0, %v5121_v62 }
 0x210   :  { %5126 = vrcp.f32 %v762_v20 }
 0x217   :  { %v5123_v9 = vpop.eup %5122 }
 0x218   :  { %v771_v14 = vmul.f32 %v5123_v9, %v5119_v57  ;;  %v5125_v16 = vpop.eup %5124 }
 0x219   :  { %v770_v25 = vmul.f32 %v5125_v16, %v5836_v2 }
 0x21a   :  { %v5127_v29 = vpop.eup %5126 }
 0x21b   :  { %v5882_v22 = vadd.f32 %v771_v14, %v770_v25 }
 0x21d   :  { %5128 = vtanh.f32 %v5882_v22 }
 0x227   :  { %v5129_v33 = vpop.eup %5128 }
 0x228   :  { %v5885_v38 = vmul.f32 %v5129_v33, %v5127_v29 }
 0x22a   :  { %845 = vmatmul.mubr.f32.vlgmr.msra.gmra.mrb[4].mxu0 %v5885_v38  ;;  %916 = vmatmul.mubr.f32.vlgmr.msra.gmra.mrb[4].mxu1 %v5885_v38 }
 0x22b   :  { %4050 = vmatpush1.bf16.msra.mxu0 %v5455_v15  ;;  %4082 = vmatpush1.bf16.msra.mxu1 %v5470_v19 }
 0x22c   :  { %4052 = vmatprep.subr.bf16.mxu0 %v5482_v23  ;;  %4084 = vmatprep.subr.bf16.mxu1 %v5484_v24 }
 0x22d   :  { %1019 = vmatprep.mubr.f32.mxu0 %v5354_v3  ;;  %1090 = vmatprep.mubr.f32.mxu1 %v5354_v3 }
 0x22f   :  { %4054 = vmatpush1.bf16.msra.mxu0 %v5497_v28  ;;  %4086 = vmatpush1.bf16.msra.mxu1 %v5510_v32 }
 0x230   :  { %4056 = vmatprep.subr.bf16.mxu0 %v5523_v36  ;;  %4088 = vmatprep.subr.bf16.mxu1 %v5525_v37 }
 0x233   :  { %4058 = vmatpush1.bf16.msra.mxu0 %v5538_v41  ;;  %4090 = vmatpush1.bf16.msra.mxu1 %v5551_v45 }
 0x234   :  { %4060 = vmatprep.subr.bf16.mxu0 %v5564_v49  ;;  %4092 = vmatprep.subr.bf16.mxu1 %v5577_v53 }
 0x237   :  { %4062 = vmatpush1.bf16.msra.mxu0 %v5587_v56  ;;  %4094 = vmatpush1.bf16.msra.mxu1 %v5600_v60 }
 0x238   :  { %4064 = vmatprep.subr.bf16.mxu0 %v5613_v0  ;;  %4096 = vmatprep.subr.bf16.mxu1 %v5623_v4 }
 0x23b   :  { %4066 = vmatpush1.bf16.msra.mxu0 %v5633_v7  ;;  %4098 = vmatpush1.bf16.msra.mxu1 %v5643_v12 }
 0x23c   :  { %4068 = vmatprep.subr.bf16.mxu0 %v5656_v17  ;;  %4100 = vmatprep.subr.bf16.mxu1 %v5666_v21 }
 0x23f   :  { %4070 = vmatpush1.bf16.msra.mxu0 %v5676_v26  ;;  %4102 = vmatpush1.bf16.msra.mxu1 %v5686_v30 }
 0x240   :  { %4072 = vmatprep.subr.bf16.mxu0 %v5699_v35  ;;  %4104 = vmatprep.subr.bf16.mxu1 %v5709_v40 }
 0x243   :  { %4074 = vmatpush1.bf16.msra.mxu0 %v5719_v44  ;;  %4106 = vmatpush1.bf16.msra.mxu1 %v5729_v48 }
 0x244   :  { %4076 = vmatprep.subr.bf16.mxu0 %v5742_v54  ;;  %4108 = vmatprep.subr.bf16.mxu1 %v5752_v58 }
 0x247   :  { %4078 = vmatpush1.bf16.msra.mxu0 %v5756_v59  ;;  %4110 = vmatpush1.bf16.msra.mxu1 %v5760_v61 }
 0x248   :  { %4112 = vmatprep.subr.bf16.mxu0 %v5442_v10  ;;  %4144 = vmatprep.subr.bf16.mxu1 %v5444_v11 }
 0x2fd   :  { %v846_v2 = vpop.f32.mrb[4].mxu0  ;;  %v917_v39 = vpop.f32.mrb[4].mxu1 }
 0x2fe   :  { %v4971_v42 = vadd.f32 %v846_v2, %v5816_v6  ;;  %v848_v43 = vpop.f32.mrb[5].mxu0  ;;  %v919_v46 = vpop.f32.mrb[5].mxu1  ;;  %v4987_v52 = vadd.f32 %v917_v39, %v5827_v27 }
 0x2ff   :  { %v4972_v47 = vadd.f32 %v848_v43, %v5820_v8  ;;  %v4988_v55 = vadd.f32 %v919_v46, %v5833_v34 }
 0x300   :  { %v3760_v50 = vmul.f32 -1.442695, %v4971_v42  ;;  %v3762_v57 = vmul.f32 -1.442695, %v4987_v52 }
 0x301   :  { %v3761_v51 = vmul.f32 -1.442695, %v4972_v47 }
 0x302   :  { %5130 = vpow2.f32 %v3760_v50 }
 0x303   :  { %5132 = vpow2.f32 %v3761_v51 }
 0x304   :  { %5134 = vtanh.f32 %v4988_v55 }
 0x305   :  { %5136 = vpow2.f32 %v3762_v57 }
 0x30c   :  { %v5131_v62 = vpop.eup %5130 }
 0x30d   :  { %v935_v9 = vadd.f32 1.0, %v5131_v62  ;;  %v5133_v14 = vpop.eup %5132 }
 0x30e   :  { %v936_v16 = vadd.f32 1.0, %v5133_v14  ;;  %v5135_v20 = vpop.eup %5134 }
 0x30f   :  { %5138 = vrcp.f32 %v935_v9  ;;  %v5137_v25 = vpop.eup %5136 }
 0x310   :  { %5140 = vrcp.f32 %v936_v16  ;;  %v937_v42 = vadd.f32 1.0, %v5137_v25 }
 0x312   :  { %5142 = vrcp.f32 %v937_v42 }
 0x319   :  { %v5139_v29 = vpop.eup %5138 }
 0x31a   :  { %v946_v33 = vmul.f32 %v5139_v29, %v5135_v20  ;;  %v5141_v2 = vpop.eup %5140 }
 0x31b   :  { %v945_v43 = vmul.f32 %v5141_v2, %v5882_v22 }
 0x31c   :  { %v5143_v46 = vpop.eup %5142 }
 0x31d   :  { %v5928_v39 = vadd.f32 %v946_v33, %v945_v43 }
 0x31f   :  { %5144 = vtanh.f32 %v5928_v39 }
 0x329   :  { %v5145_v47 = vpop.eup %5144 }
 0x32a   :  { %v5931_v50 = vmul.f32 %v5145_v47, %v5143_v46 }
 0x32c   :  { %1020 = vmatmul.mubr.f32.vlgmr.msra.gmra.mrb[6].mxu0 %v5931_v50  ;;  %1091 = vmatmul.mubr.f32.vlgmr.msra.gmra.mrb[6].mxu1 %v5931_v50 }
 0x32d   :  { %4114 = vmatpush1.bf16.msra.mxu0 %v5455_v15  ;;  %4146 = vmatpush1.bf16.msra.mxu1 %v5470_v19 }
 0x32e   :  { %4116 = vmatprep.subr.bf16.mxu0 %v5482_v23  ;;  %4148 = vmatprep.subr.bf16.mxu1 %v5484_v24 }
 0x32f   :  { %1194 = vmatprep.mubr.f32.mxu0 %v5354_v3  ;;  %1265 = vmatprep.mubr.f32.mxu1 %v5354_v3 }
 0x331   :  { %4118 = vmatpush1.bf16.msra.mxu0 %v5497_v28  ;;  %4150 = vmatpush1.bf16.msra.mxu1 %v5510_v32 }
 0x332   :  { %4120 = vmatprep.subr.bf16.mxu0 %v5523_v36  ;;  %4152 = vmatprep.subr.bf16.mxu1 %v5525_v37 }
 0x335   :  { %4122 = vmatpush1.bf16.msra.mxu0 %v5538_v41  ;;  %4154 = vmatpush1.bf16.msra.mxu1 %v5551_v45 }
 0x336   :  { %4124 = vmatprep.subr.bf16.mxu0 %v5564_v49  ;;  %4156 = vmatprep.subr.bf16.mxu1 %v5577_v53 }
 0x339   :  { %4126 = vmatpush1.bf16.msra.mxu0 %v5587_v56  ;;  %4158 = vmatpush1.bf16.msra.mxu1 %v5600_v60 }
 0x33a   :  { %4128 = vmatprep.subr.bf16.mxu0 %v5613_v0  ;;  %4160 = vmatprep.subr.bf16.mxu1 %v5623_v4 }
 0x33d   :  { %4130 = vmatpush1.bf16.msra.mxu0 %v5633_v7  ;;  %4162 = vmatpush1.bf16.msra.mxu1 %v5643_v12 }
 0x33e   :  { %4132 = vmatprep.subr.bf16.mxu0 %v5656_v17  ;;  %4164 = vmatprep.subr.bf16.mxu1 %v5666_v21 }
 0x341   :  { %4134 = vmatpush1.bf16.msra.mxu0 %v5676_v26  ;;  %4166 = vmatpush1.bf16.msra.mxu1 %v5686_v30 }
 0x342   :  { %4136 = vmatprep.subr.bf16.mxu0 %v5699_v35  ;;  %4168 = vmatprep.subr.bf16.mxu1 %v5709_v40 }
 0x345   :  { %4138 = vmatpush1.bf16.msra.mxu0 %v5719_v44  ;;  %4170 = vmatpush1.bf16.msra.mxu1 %v5729_v48 }
 0x346   :  { %4140 = vmatprep.subr.bf16.mxu0 %v5742_v54  ;;  %4172 = vmatprep.subr.bf16.mxu1 %v5752_v58 }
 0x349   :  { %4142 = vmatpush1.bf16.msra.mxu0 %v5756_v59  ;;  %4174 = vmatpush1.bf16.msra.mxu1 %v5760_v61 }
 0x34a   :  { %4176 = vmatprep.subr.bf16.mxu0 %v5442_v10  ;;  %4208 = vmatprep.subr.bf16.mxu1 %v5444_v11 }
 0x3ff   :  { %v1021_v22 = vpop.f32.mrb[6].mxu0  ;;  %v1092_v51 = vpop.f32.mrb[6].mxu1 }
 0x400   :  { %v4973_v52 = vadd.f32 %v1021_v22, %v5816_v6  ;;  %v1023_v55 = vpop.f32.mrb[7].mxu0  ;;  %v1094_v57 = vpop.f32.mrb[7].mxu1  ;;  %v4989_v16 = vadd.f32 %v1092_v51, %v5827_v27 }
 0x401   :  { %v4974_v62 = vadd.f32 %v1023_v55, %v5820_v8  ;;  %v4990_v20 = vadd.f32 %v1094_v57, %v5833_v34 }
 0x402   :  { %v3763_v9 = vmul.f32 -1.442695, %v4973_v52  ;;  %v3765_v25 = vmul.f32 -1.442695, %v4989_v16 }
 0x403   :  { %v3764_v14 = vmul.f32 -1.442695, %v4974_v62 }
 0x404   :  { %5146 = vpow2.f32 %v3763_v9 }
 0x405   :  { %5148 = vpow2.f32 %v3764_v14 }
 0x406   :  { %5150 = vtanh.f32 %v4990_v20 }
 0x407   :  { %5152 = vpow2.f32 %v3765_v25 }
 0x40e   :  { %v5147_v29 = vpop.eup %5146 }
 0x40f   :  { %v1110_v33 = vadd.f32 1.0, %v5147_v29  ;;  %v5149_v2 = vpop.eup %5148 }
 0x410   :  { %v1111_v42 = vadd.f32 1.0, %v5149_v2  ;;  %v5151_v43 = vpop.eup %5150 }
 0x411   :  { %5154 = vrcp.f32 %v1110_v33  ;;  %v5153_v46 = vpop.eup %5152 }
 0x412   :  { %5156 = vrcp.f32 %v1111_v42  ;;  %v1112_v55 = vadd.f32 1.0, %v5153_v46 }
 0x414   :  { %5158 = vrcp.f32 %v1112_v55 }
 0x41b   :  { %v5155_v47 = vpop.eup %5154 }
 0x41c   :  { %v1121_v22 = vmul.f32 %v5155_v47, %v5151_v43  ;;  %v5157_v52 = vpop.eup %5156 }
 0x41d   :  { %v1120_v62 = vmul.f32 %v5157_v52, %v5928_v39 }
 0x41e   :  { %v5159_v57 = vpop.eup %5158 }
 0x41f   :  { %v5974_v51 = vadd.f32 %v1121_v22, %v1120_v62 }
 0x421   :  { %5160 = vtanh.f32 %v5974_v51 }
 0x42b   :  { %v5161_v9 = vpop.eup %5160 }
 0x42c   :  { %v5977_v14 = vmul.f32 %v5161_v9, %v5159_v57 }
 0x42e   :  { %1195 = vmatmul.mubr.f32.vlgmr.msra.gmra.mrb[8].mxu0 %v5977_v14  ;;  %1266 = vmatmul.mubr.f32.vlgmr.msra.gmra.mrb[8].mxu1 %v5977_v14 }
 0x42f   :  { %4178 = vmatpush1.bf16.msra.mxu0 %v5455_v15  ;;  %4210 = vmatpush1.bf16.msra.mxu1 %v5470_v19 }
 0x430   :  { %4180 = vmatprep.subr.bf16.mxu0 %v5482_v23  ;;  %4212 = vmatprep.subr.bf16.mxu1 %v5484_v24 }
 0x431   :  { %1369 = vmatprep.mubr.f32.mxu0 %v5354_v3  ;;  %1440 = vmatprep.mubr.f32.mxu1 %v5354_v3 }
 0x433   :  { %4182 = vmatpush1.bf16.msra.mxu0 %v5497_v28  ;;  %4214 = vmatpush1.bf16.msra.mxu1 %v5510_v32 }
 0x434   :  { %4184 = vmatprep.subr.bf16.mxu0 %v5523_v36  ;;  %4216 = vmatprep.subr.bf16.mxu1 %v5525_v37 }
 0x437   :  { %4186 = vmatpush1.bf16.msra.mxu0 %v5538_v41  ;;  %4218 = vmatpush1.bf16.msra.mxu1 %v5551_v45 }
 0x438   :  { %4188 = vmatprep.subr.bf16.mxu0 %v5564_v49  ;;  %4220 = vmatprep.subr.bf16.mxu1 %v5577_v53 }
 0x43b   :  { %4190 = vmatpush1.bf16.msra.mxu0 %v5587_v56  ;;  %4222 = vmatpush1.bf16.msra.mxu1 %v5600_v60 }
 0x43c   :  { %4192 = vmatprep.subr.bf16.mxu0 %v5613_v0  ;;  %4224 = vmatprep.subr.bf16.mxu1 %v5623_v4 }
 0x43f   :  { %4194 = vmatpush1.bf16.msra.mxu0 %v5633_v7  ;;  %4226 = vmatpush1.bf16.msra.mxu1 %v5643_v12 }
 0x440   :  { %4196 = vmatprep.subr.bf16.mxu0 %v5656_v17  ;;  %4228 = vmatprep.subr.bf16.mxu1 %v5666_v21 }
 0x443   :  { %4198 = vmatpush1.bf16.msra.mxu0 %v5676_v26  ;;  %4230 = vmatpush1.bf16.msra.mxu1 %v5686_v30 }
 0x444   :  { %4200 = vmatprep.subr.bf16.mxu0 %v5699_v35  ;;  %4232 = vmatprep.subr.bf16.mxu1 %v5709_v40 }
 0x447   :  { %4202 = vmatpush1.bf16.msra.mxu0 %v5719_v44  ;;  %4234 = vmatpush1.bf16.msra.mxu1 %v5729_v48 }
 0x448   :  { %4204 = vmatprep.subr.bf16.mxu0 %v5742_v54  ;;  %4236 = vmatprep.subr.bf16.mxu1 %v5752_v58 }
 0x44b   :  { %4206 = vmatpush1.bf16.msra.mxu0 %v5756_v59  ;;  %4238 = vmatpush1.bf16.msra.mxu1 %v5760_v61 }
 0x44c   :  { %4240 = vmatprep.subr.bf16.mxu0 %v5442_v10  ;;  %4272 = vmatprep.subr.bf16.mxu1 %v5444_v11 }
 0x501   :  { %v1196_v39 = vpop.f32.mrb[8].mxu0  ;;  %v1267_v16 = vpop.f32.mrb[8].mxu1 }
 0x502   :  { %v4975_v20 = vadd.f32 %v1196_v39, %v5816_v6  ;;  %v1198_v25 = vpop.f32.mrb[9].mxu0  ;;  %v1269_v29 = vpop.f32.mrb[9].mxu1  ;;  %v4991_v43 = vadd.f32 %v1267_v16, %v5827_v27 }
 0x503   :  { %v4976_v33 = vadd.f32 %v1198_v25, %v5820_v8  ;;  %v4992_v46 = vadd.f32 %v1269_v29, %v5833_v34 }
 0x504   :  { %v3766_v2 = vmul.f32 -1.442695, %v4975_v20  ;;  %v3768_v47 = vmul.f32 -1.442695, %v4991_v43 }
 0x505   :  { %v3767_v42 = vmul.f32 -1.442695, %v4976_v33 }
 0x506   :  { %5162 = vpow2.f32 %v3766_v2 }
 0x507   :  { %5164 = vpow2.f32 %v3767_v42 }
 0x508   :  { %5166 = vtanh.f32 %v4992_v46 }
 0x509   :  { %5168 = vpow2.f32 %v3768_v47 }
 0x510   :  { %v5163_v22 = vpop.eup %5162 }
 0x511   :  { %v1285_v52 = vadd.f32 1.0, %v5163_v22  ;;  %v5165_v55 = vpop.eup %5164 }
 0x512   :  { %v1286_v62 = vadd.f32 1.0, %v5165_v55  ;;  %v5167_v57 = vpop.eup %5166 }
 0x513   :  { %5170 = vrcp.f32 %v1285_v52  ;;  %v5169_v9 = vpop.eup %5168 }
 0x514   :  { %5172 = vrcp.f32 %v1286_v62  ;;  %v1287_v33 = vadd.f32 1.0, %v5169_v9 }
 0x516   :  { %5174 = vrcp.f32 %v1287_v33 }
 0x51d   :  { %v5171_v39 = vpop.eup %5170 }
 0x51e   :  { %v1296_v20 = vmul.f32 %v5171_v39, %v5167_v57  ;;  %v5173_v25 = vpop.eup %5172 }
 0x51f   :  { %v1295_v2 = vmul.f32 %v5173_v25, %v5974_v51 }
 0x520   :  { %v5175_v29 = vpop.eup %5174 }
 0x521   :  { %v6020_v16 = vadd.f32 %v1296_v20, %v1295_v2 }
 0x523   :  { %5176 = vtanh.f32 %v6020_v16 }
 0x52d   :  { %v5177_v42 = vpop.eup %5176 }
 0x52e   :  { %v6023_v43 = vmul.f32 %v5177_v42, %v5175_v29 }
 0x530   :  { %1370 = vmatmul.mubr.f32.vlgmr.msra.gmra.mrb[10].mxu0 %v6023_v43  ;;  %1441 = vmatmul.mubr.f32.vlgmr.msra.gmra.mrb[10].mxu1 %v6023_v43 }
 0x531   :  { %4242 = vmatpush1.bf16.msra.mxu0 %v5455_v15  ;;  %4274 = vmatpush1.bf16.msra.mxu1 %v5470_v19 }
 0x532   :  { %4244 = vmatprep.subr.bf16.mxu0 %v5482_v23  ;;  %4276 = vmatprep.subr.bf16.mxu1 %v5484_v24 }
 0x533   :  { %1544 = vmatprep.mubr.f32.mxu0 %v5354_v3  ;;  %1615 = vmatprep.mubr.f32.mxu1 %v5354_v3 }
 0x535   :  { %4246 = vmatpush1.bf16.msra.mxu0 %v5497_v28  ;;  %4278 = vmatpush1.bf16.msra.mxu1 %v5510_v32 }
 0x536   :  { %4248 = vmatprep.subr.bf16.mxu0 %v5523_v36  ;;  %4280 = vmatprep.subr.bf16.mxu1 %v5525_v37 }
 0x539   :  { %4250 = vmatpush1.bf16.msra.mxu0 %v5538_v41  ;;  %4282 = vmatpush1.bf16.msra.mxu1 %v5551_v45 }
 0x53a   :  { %4252 = vmatprep.subr.bf16.mxu0 %v5564_v49  ;;  %4284 = vmatprep.subr.bf16.mxu1 %v5577_v53 }
 0x53d   :  { %4254 = vmatpush1.bf16.msra.mxu0 %v5587_v56  ;;  %4286 = vmatpush1.bf16.msra.mxu1 %v5600_v60 }
 0x53e   :  { %4256 = vmatprep.subr.bf16.mxu0 %v5613_v0  ;;  %4288 = vmatprep.subr.bf16.mxu1 %v5623_v4 }
 0x541   :  { %4258 = vmatpush1.bf16.msra.mxu0 %v5633_v7  ;;  %4290 = vmatpush1.bf16.msra.mxu1 %v5643_v12 }
 0x542   :  { %4260 = vmatprep.subr.bf16.mxu0 %v5656_v17  ;;  %4292 = vmatprep.subr.bf16.mxu1 %v5666_v21 }
 0x545   :  { %4262 = vmatpush1.bf16.msra.mxu0 %v5676_v26  ;;  %4294 = vmatpush1.bf16.msra.mxu1 %v5686_v30 }
 0x546   :  { %4264 = vmatprep.subr.bf16.mxu0 %v5699_v35  ;;  %4296 = vmatprep.subr.bf16.mxu1 %v5709_v40 }
 0x549   :  { %4266 = vmatpush1.bf16.msra.mxu0 %v5719_v44  ;;  %4298 = vmatpush1.bf16.msra.mxu1 %v5729_v48 }
 0x54a   :  { %4268 = vmatprep.subr.bf16.mxu0 %v5742_v54  ;;  %4300 = vmatprep.subr.bf16.mxu1 %v5752_v58 }
 0x54d   :  { %4270 = vmatpush1.bf16.msra.mxu0 %v5756_v59  ;;  %4302 = vmatpush1.bf16.msra.mxu1 %v5760_v61 }
 0x54e   :  { %4304 = vmatprep.subr.bf16.mxu0 %v5442_v10  ;;  %4336 = vmatprep.subr.bf16.mxu1 %v5444_v11 }
 0x603   :  { %v1371_v51 = vpop.f32.mrb[10].mxu0  ;;  %v1442_v46 = vpop.f32.mrb[10].mxu1 }
 0x604   :  { %v4977_v47 = vadd.f32 %v1371_v51, %v5816_v6  ;;  %v1373_v22 = vpop.f32.mrb[11].mxu0  ;;  %v1444_v52 = vpop.f32.mrb[11].mxu1  ;;  %v4993_v9 = vadd.f32 %v1442_v46, %v5827_v27 }
 0x605   :  { %v4978_v55 = vadd.f32 %v1373_v22, %v5820_v8  ;;  %v4994_v39 = vadd.f32 %v1444_v52, %v5833_v34 }
 0x606   :  { %v3769_v62 = vmul.f32 -1.442695, %v4977_v47  ;;  %v3771_v20 = vmul.f32 -1.442695, %v4993_v9  ;;  %v1836_v9 = vld [vmem:[%s7012_s4 + $0x10] sm:$0xff] }
 0x607   :  { %v3770_v57 = vmul.f32 -1.442695, %v4978_v55 }
 0x608   :  { %5178 = vpow2.f32 %v3769_v62 }
 0x609   :  { %5180 = vpow2.f32 %v3770_v57 }
 0x60a   :  { %5182 = vtanh.f32 %v4994_v39  ;;  %v1840_v39 = vld [vmem:[%s7012_s4 + $0x30] sm:$0xff] }
 0x60b   :  { %5184 = vpow2.f32 %v3771_v20  ;;  %v1843_v20 = vld [vmem:[%s7012_s4 + $0x48] sm:$0xff] }
 0x612   :  { %v5179_v10 = vpop.eup %5178 }
 0x613   :  { %v1460_v25 = vadd.f32 1.0, %v5179_v10  ;;  %v5181_v11 = vpop.eup %5180  ;;  %v1847_v10 = vld [vmem:[%s7012_s4 + $0x68] sm:$0xff] }
 0x614   :  { %v1461_v33 = vadd.f32 1.0, %v5181_v11  ;;  %v5183_v2 = vpop.eup %5182  ;;  %v1849_v11 = vld [vmem:[%s7012_s4 + $0x78] sm:$0xff] }
 0x615   :  { %5186 = vrcp.f32 %v1460_v25  ;;  %v5185_v29 = vpop.eup %5184  ;;  %v1845_v25 = vld [vmem:[%s7012_s4 + $0x58] sm:$0xff] }
 0x616   :  { %5188 = vrcp.f32 %v1461_v33  ;;  %v1462_v22 = vadd.f32 1.0, %v5185_v29 }
 0x618   :  { %5190 = vrcp.f32 %v1462_v22 }
 0x61f   :  { %v5187_v42 = vpop.eup %5186 }
 0x620   :  { %v1471_v51 = vmul.f32 %v5187_v42, %v5183_v2  ;;  %v5189_v47 = vpop.eup %5188  ;;  %v4401_v42 = vpack.c.bf16 %v1840_v39, %v1836_v9  ;;  %v1866_v9 = vld [vmem:[%s7012_s4 + $0x100] sm:$0xff] }
 0x621   :  { %v1470_v55 = vmul.f32 %v5189_v47, %v6020_v16  ;;  %v1838_v16 = vld [vmem:[%s7012_s4 + $0x20] sm:$0xff] }
 0x622   :  { %v5191_v52 = vpop.eup %5190  ;;  %v1846_v47 = vld [vmem:[%s7012_s4 + $0x60] sm:$0xff] }
 0x623   :  { %v6066_v46 = vadd.f32 %v1471_v51, %v1470_v55  ;;  %v1842_v51 = vld [vmem:[%s7012_s4 + $0x40] sm:$0xff]  ;;  %v4371_v55 = vpack.c.bf16 %v1847_v10, %v1843_v20 }
 0x624   :  { %v1870_v39 = vld [vmem:[%s7012_s4 + $0x120] sm:$0xff] }
 0x625   :  { %5192 = vtanh.f32 %v6066_v46 }
 0x62f   :  { %v5193_v62 = vpop.eup %5192 }
 0x630   :  { %v6069_v57 = vmul.f32 %v5193_v62, %v5191_v52  ;;  %v1844_v52 = vld [vmem:[%s7012_s4 + $0x50] sm:$0xff] }
 0x631   :  { %v1848_v62 = vld [vmem:[%s7012_s4 + $0x70] sm:$0xff] }
 0x632   :  { %1545 = vmatmul.mubr.f32.vlgmr.msra.gmra.mrb[12].mxu0 %v6069_v57  ;;  %1616 = vmatmul.mubr.f32.vlgmr.msra.gmra.mrb[12].mxu1 %v6069_v57 }
 0x633   :  { %4306 = vmatpush1.bf16.msra.mxu0 %v5455_v15  ;;  %4338 = vmatpush1.bf16.msra.mxu1 %v5470_v19  ;;  %v1835_v15 = vld [vmem:[%s7012_s4 + $0x8] sm:$0xff] }
 0x634   :  { %4308 = vmatprep.subr.bf16.mxu0 %v5482_v23  ;;  %4340 = vmatprep.subr.bf16.mxu1 %v5484_v24  ;;  %v1839_v19 = vld [vmem:[%s7012_s4 + $0x28] sm:$0xff]  ;;  %v1837_v23 = vld [vmem:[%s7012_s4 + $0x18] sm:$0xff] }
 0x635   :  { %1719 = vmatprep.mubr.f32.mxu0 %v5354_v3  ;;  %1790 = vmatprep.mubr.f32.mxu1 %v5354_v3  ;;  %v4367_v24 = vpack.c.bf16 %v1839_v19, %v1835_v15  ;;  %v1851_v15 = vld [vmem:[%s7012_s4 + $0x88] sm:$0xff] }
 0x636   :  { %v1855_v19 = vld [vmem:[%s7012_s4 + $0xa8] sm:$0xff] }
 0x637   :  { %4310 = vmatpush1.bf16.msra.mxu0 %v5497_v28  ;;  %4342 = vmatpush1.bf16.msra.mxu1 %v5510_v32  ;;  %v1841_v28 = vld [vmem:[%s7012_s4 + $0x38] sm:$0xff] }
 0x638   :  { %4312 = vmatprep.subr.bf16.mxu0 %v5523_v36  ;;  %4344 = vmatprep.subr.bf16.mxu1 %v5525_v37  ;;  %v4399_v32 = vpack.c.bf16 %v1841_v28, %v1837_v23  ;;  %v1853_v23 = vld [vmem:[%s7012_s4 + $0x98] sm:$0xff]  ;;  %v4373_v28 = vpack.c.bf16 %v1846_v47, %v1842_v51  ;;  %v4385_v51 = vpack.c.bf16 %v1870_v39, %v1866_v9  ;;  %v2180_v9 = vld [vmem:[%s7013_s5 + $0x10] sm:$0xff] }
 0x639   :  { %v2184_v39 = vld [vmem:[%s7013_s5 + $0x30] sm:$0xff] }
 0x63b   :  { %4314 = vmatpush1.bf16.msra.mxu0 %v5538_v41  ;;  %4346 = vmatpush1.bf16.msra.mxu1 %v5551_v45 }
 0x63c   :  { %4316 = vmatprep.subr.bf16.mxu0 %v5564_v49  ;;  %4348 = vmatprep.subr.bf16.mxu1 %v5577_v53 }
 0x63f   :  { %4318 = vmatpush1.bf16.msra.mxu0 %v5587_v56  ;;  %4350 = vmatpush1.bf16.msra.mxu1 %v5600_v60 }
 0x640   :  { %4320 = vmatprep.subr.bf16.mxu0 %v5613_v0  ;;  %4352 = vmatprep.subr.bf16.mxu1 %v5623_v4 }
 0x643   :  { %4322 = vmatpush1.bf16.msra.mxu0 %v5633_v7  ;;  %4354 = vmatpush1.bf16.msra.mxu1 %v5643_v12 }
 0x644   :  { %4324 = vmatprep.subr.bf16.mxu0 %v5656_v17  ;;  %4356 = vmatprep.subr.bf16.mxu1 %v5666_v21 }
 0x647   :  { %4326 = vmatpush1.bf16.msra.mxu0 %v5676_v26  ;;  %4358 = vmatpush1.bf16.msra.mxu1 %v5686_v30 }
 0x648   :  { %4328 = vmatprep.subr.bf16.mxu0 %v5699_v35  ;;  %4360 = vmatprep.subr.bf16.mxu1 %v5709_v40 }
 0x64b   :  { %4330 = vmatpush1.bf16.msra.mxu0 %v5719_v44  ;;  %4362 = vmatpush1.bf16.msra.mxu1 %v5729_v48 }
 0x64c   :  { %4332 = vmatprep.subr.bf16.mxu0 %v5742_v54  ;;  %4364 = vmatprep.subr.bf16.mxu1 %v5752_v58 }
 0x64f   :  { %4334 = vmatpush1.bf16.msra.mxu0 %v5756_v59  ;;  %4366 = vmatpush1.bf16.msra.mxu1 %v5760_v61  ;;  %v1834_v61 = vld [vmem:[%s7012_s4] sm:$0xff] }
 0x650   :  { %4368 = vmatprep.subr.bf16.mxu0 %v4367_v24  ;;  %4400 = vmatprep.subr.bf16.mxu1 %v4399_v32  ;;  %v4369_v29 = vpack.c.bf16 %v1838_v16, %v1834_v61  ;;  %v1857_v24 = vld [vmem:[%s7012_s4 + $0xb8] sm:$0xff]  ;;  %v4405_v32 = vpack.c.bf16 %v1848_v62, %v1844_v52 }
 0x705   :  { %v1546_v36 = vpop.f32.mrb[12].mxu0  ;;  %v1617_v37 = vpop.f32.mrb[12].mxu1 }
 0x706   :  { %v4979_v41 = vadd.f32 %v1546_v36, %v5816_v6  ;;  %v1548_v45 = vpop.f32.mrb[13].mxu0  ;;  %v1619_v49 = vpop.f32.mrb[13].mxu1  ;;  %v4995_v0 = vadd.f32 %v1617_v37, %v5827_v27  ;;  %v1850_v36 = vld [vmem:[%s7012_s4 + $0x80] sm:$0xff] }
 0x707   :  { %v4980_v53 = vadd.f32 %v1548_v45, %v5820_v8  ;;  %v4996_v4 = vadd.f32 %v1619_v49, %v5833_v34  ;;  %v1854_v37 = vld [vmem:[%s7012_s4 + $0xa0] sm:$0xff]  ;;  %v4407_v45 = vpack.c.bf16 %v1857_v24, %v1853_v23  ;;  %v1852_v49 = vld [vmem:[%s7012_s4 + $0x90] sm:$0xff]  ;;  %v1883_v23 = vld [vmem:[%s7012_s4 + $0x188] sm:$0xff] }
 0x708   :  { %v3772_v56 = vmul.f32 -1.442695, %v4979_v41  ;;  %v3774_v7 = vmul.f32 -1.442695, %v4995_v0  ;;  %v4375_v41 = vpack.c.bf16 %v1855_v19, %v1851_v15  ;;  %v1861_v0 = vld [vmem:[%s7012_s4 + $0xd8] sm:$0xff]  ;;  %v1876_v15 = vld [vmem:[%s7012_s4 + $0x150] sm:$0xff] }
 0x709   :  { %v3773_v60 = vmul.f32 -1.442695, %v4980_v53  ;;  %v1856_v53 = vld [vmem:[%s7012_s4 + $0xb0] sm:$0xff]  ;;  %v1887_v24 = vld [vmem:[%s7012_s4 + $0x1a8] sm:$0xff] }
 0x70a   :  { %5194 = vpow2.f32 %v3772_v56  ;;  %v1859_v56 = vld [vmem:[%s7012_s4 + $0xc8] sm:$0xff]  ;;  %v1880_v19 = vld [vmem:[%s7012_s4 + $0x170] sm:$0xff] }
 0x70b   :  { %5196 = vpow2.f32 %v3773_v60  ;;  %v1863_v60 = vld [vmem:[%s7012_s4 + $0xe8] sm:$0xff] }
 0x70c   :  { %5198 = vtanh.f32 %v4996_v4  ;;  %v1865_v4 = vld [vmem:[%s7012_s4 + $0xf8] sm:$0xff] }
 0x70d   :  { %5200 = vpow2.f32 %v3774_v7  ;;  %v4377_v7 = vpack.c.bf16 %v1854_v37, %v1850_v36  ;;  %v4421_v37 = vpack.c.bf16 %v1880_v19, %v1876_v15  ;;  %v2199_v15 = vld [vmem:[%s7013_s5 + $0xa8] sm:$0xff]  ;;  %v2197_v19 = vld [vmem:[%s7013_s5 + $0x98] sm:$0xff] }
 0x714   :  { %v5195_v12 = vpop.eup %5194 }
 0x715   :  { %v1635_v17 = vadd.f32 1.0, %v5195_v12  ;;  %v5197_v21 = vpop.eup %5196  ;;  %v4409_v12 = vpack.c.bf16 %v1856_v53, %v1852_v49  ;;  %v4391_v49 = vpack.c.bf16 %v1887_v24, %v1883_v23  ;;  %v2201_v24 = vld [vmem:[%s7013_s5 + $0xb8] sm:$0xff] }
 0x716   :  { %v1636_v26 = vadd.f32 1.0, %v5197_v21  ;;  %v5199_v30 = vpop.eup %5198  ;;  %v1862_v21 = vld [vmem:[%s7012_s4 + $0xe0] sm:$0xff] }
 0x717   :  { %5202 = vrcp.f32 %v1635_v17  ;;  %v5201_v35 = vpop.eup %5200  ;;  %v1858_v17 = vld [vmem:[%s7012_s4 + $0xc0] sm:$0xff] }
 0x718   :  { %5204 = vrcp.f32 %v1636_v26  ;;  %v1637_v54 = vadd.f32 1.0, %v5201_v35  ;;  %v4379_v26 = vpack.c.bf16 %v1863_v60, %v1859_v56  ;;  %v1860_v35 = vld [vmem:[%s7012_s4 + $0xd0] sm:$0xff]  ;;  %v4381_v61 = vpack.c.bf16 %v1862_v21, %v1858_v17 }
 0x719   :  { %v1884_v56 = vld [vmem:[%s7012_s4 + $0x190] sm:$0xff] }
 0x71a   :  { %5206 = vrcp.f32 %v1637_v54  ;;  %v1869_v54 = vld [vmem:[%s7012_s4 + $0x118] sm:$0xff]  ;;  %v1888_v60 = vld [vmem:[%s7012_s4 + $0x1b0] sm:$0xff] }
 0x71b   :  { %v4425_v21 = vpack.c.bf16 %v1888_v60, %v1884_v56  ;;  %v2207_v56 = vld [vmem:[%s7013_s5 + $0xe8] sm:$0xff]  ;;  %v2205_v60 = vld [vmem:[%s7013_s5 + $0xd8] sm:$0xff] }
 0x721   :  { %v5203_v40 = vpop.eup %5202 }
 0x722   :  { %v1646_v44 = vmul.f32 %v5203_v40, %v5199_v30  ;;  %v5205_v48 = vpop.eup %5204  ;;  %v4411_v30 = vpack.c.bf16 %v1865_v4, %v1861_v0  ;;  %v1864_v40 = vld [vmem:[%s7012_s4 + $0xf0] sm:$0xff]  ;;  %v1891_v0 = vld [vmem:[%s7012_s4 + $0x1c8] sm:$0xff] }
 0x723   :  { %v1645_v58 = vmul.f32 %v5205_v48, %v6066_v46  ;;  %v4403_v46 = vpack.c.bf16 %v1849_v11, %v1845_v25  ;;  %v1871_v48 = vld [vmem:[%s7012_s4 + $0x128] sm:$0xff]  ;;  %v4413_v16 = vpack.c.bf16 %v1864_v40, %v1860_v35  ;;  %v1868_v25 = vld [vmem:[%s7012_s4 + $0x110] sm:$0xff]  ;;  %v1894_v40 = vld [vmem:[%s7012_s4 + $0x1e0] sm:$0xff] }
 0x724   :  { %v5207_v33 = vpop.eup %5206  ;;  %v1872_v11 = vld [vmem:[%s7012_s4 + $0x130] sm:$0xff]  ;;  %v1895_v4 = vld [vmem:[%s7012_s4 + $0x1e8] sm:$0xff] }
 0x725   :  { %v6122_v59 = vadd.f32 %v1646_v44, %v1645_v58  ;;  %v1867_v44 = vld [vmem:[%s7012_s4 + $0x108] sm:$0xff]  ;;  %v1873_v58 = vld [vmem:[%s7012_s4 + $0x138] sm:$0xff]  ;;  %v4417_v47 = vpack.c.bf16 %v1872_v11, %v1868_v25 }
 0x726   :  { %v4383_v20 = vpack.c.bf16 %v1871_v48, %v1867_v44  ;;  %v4415_v10 = vpack.c.bf16 %v1873_v58, %v1869_v54  ;;  %v1892_v44 = vld [vmem:[%s7012_s4 + $0x1d0] sm:$0xff]  ;;  %v2191_v25 = vld [vmem:[%s7013_s5 + $0x68] sm:$0xff]  ;;  %v2189_v11 = vld [vmem:[%s7013_s5 + $0x58] sm:$0xff] }
 0x727   :  { %5208 = vtanh.f32 %v6122_v59  ;;  %v1896_v48 = vld [vmem:[%s7012_s4 + $0x1f0] sm:$0xff] }
 0x728   :  { %v4429_v58 = vpack.c.bf16 %v1896_v48, %v1892_v44  ;;  %v2215_v44 = vld [vmem:[%s7013_s5 + $0x128] sm:$0xff]  ;;  %v2213_v48 = vld [vmem:[%s7013_s5 + $0x118] sm:$0xff] }
 0x731   :  { %v5209_v2 = vpop.eup %5208 }
 0x732   :  { %v6155_v22 = vmul.f32 %v5209_v2, %v5207_v33  ;;  %v1875_v33 = vld [vmem:[%s7012_s4 + $0x148] sm:$0xff] }
 0x733   :  { %v1879_v2 = vld [vmem:[%s7012_s4 + $0x168] sm:$0xff] }
 0x734   :  { %1720 = vmatmul.mubr.f32.vlgmr.msra.gmra.mrb[14].mxu0 %v6155_v22  ;;  %1791 = vmatmul.mubr.f32.vlgmr.msra.gmra.mrb[14].mxu1 %v6155_v22  ;;  %v4387_v52 = vpack.c.bf16 %v1879_v2, %v1875_v33  ;;  %v2193_v2 = vld [vmem:[%s7013_s5 + $0x78] sm:$0xff] }
 0x735   :  { %4370 = vmatpush1.bf16.msra.mxu0 %v4369_v29  ;;  %4402 = vmatpush1.bf16.msra.mxu1 %v4401_v42  ;;  %v1877_v29 = vld [vmem:[%s7012_s4 + $0x158] sm:$0xff] }
 0x736   :  { %4372 = vmatprep.subr.bf16.mxu0 %v4371_v55  ;;  %4404 = vmatprep.subr.bf16.mxu1 %v4403_v46  ;;  %v1881_v42 = vld [vmem:[%s7012_s4 + $0x178] sm:$0xff]  ;;  %v1874_v55 = vld [vmem:[%s7012_s4 + $0x140] sm:$0xff] }
 0x737   :  { %1984 = vmatprep.mubr.f32.mxu0 %v5354_v3  ;;  %2097 = vmatprep.mubr.f32.mxu1 %v5354_v3  ;;  %v1878_v46 = vld [vmem:[%s7012_s4 + $0x160] sm:$0xff]  ;;  %v4419_v62 = vpack.c.bf16 %v1881_v42, %v1877_v29 }
 0x738   :  { %v4389_v36 = vpack.c.bf16 %v1878_v46, %v1874_v55  ;;  %v2186_v29 = vld [vmem:[%s7013_s5 + $0x40] sm:$0xff]  ;;  %v2188_v55 = vld [vmem:[%s7013_s5 + $0x50] sm:$0xff] }
 0x739   :  { %4374 = vmatpush1.bf16.msra.mxu0 %v4373_v28  ;;  %4406 = vmatpush1.bf16.msra.mxu1 %v4405_v32  ;;  %v1885_v28 = vld [vmem:[%s7012_s4 + $0x198] sm:$0xff]  ;;  %v2190_v42 = vld [vmem:[%s7013_s5 + $0x60] sm:$0xff]  ;;  %v2192_v46 = vld [vmem:[%s7013_s5 + $0x70] sm:$0xff] }
 0x73a   :  { %4376 = vmatprep.subr.bf16.mxu0 %v4375_v41  ;;  %4408 = vmatprep.subr.bf16.mxu1 %v4407_v45  ;;  %v1889_v32 = vld [vmem:[%s7012_s4 + $0x1b8] sm:$0xff]  ;;  %v1882_v41 = vld [vmem:[%s7012_s4 + $0x180] sm:$0xff] }
 0x73b   :  { %v1886_v45 = vld [vmem:[%s7012_s4 + $0x1a0] sm:$0xff]  ;;  %v4423_v53 = vpack.c.bf16 %v1889_v32, %v1885_v28 }
 0x73c   :  { %v4393_v17 = vpack.c.bf16 %v1886_v45, %v1882_v41  ;;  %v2194_v28 = vld [vmem:[%s7013_s5 + $0x80] sm:$0xff]  ;;  %v2196_v41 = vld [vmem:[%s7013_s5 + $0x90] sm:$0xff] }
 0x73d   :  { %4378 = vmatpush1.bf16.msra.mxu0 %v4377_v7  ;;  %4410 = vmatpush1.bf16.msra.mxu1 %v4409_v12  ;;  %v1893_v7 = vld [vmem:[%s7012_s4 + $0x1d8] sm:$0xff]  ;;  %v2198_v32 = vld [vmem:[%s7013_s5 + $0xa0] sm:$0xff]  ;;  %v2200_v45 = vld [vmem:[%s7013_s5 + $0xb0] sm:$0xff] }
 0x73e   :  { %4380 = vmatprep.subr.bf16.mxu0 %v4379_v26  ;;  %4412 = vmatprep.subr.bf16.mxu1 %v4411_v30  ;;  %v1897_v12 = vld [vmem:[%s7012_s4 + $0x1f8] sm:$0xff]  ;;  %v1890_v26 = vld [vmem:[%s7012_s4 + $0x1c0] sm:$0xff]  ;;  %v4395_v30 = vpack.c.bf16 %v1895_v4, %v1891_v0 }
 0x73f   :  { %v4427_v35 = vpack.c.bf16 %v1897_v12, %v1893_v7  ;;  %v4397_v54 = vpack.c.bf16 %v1894_v40, %v1890_v26  ;;  %v2209_v4 = vld [vmem:[%s7013_s5 + $0xf8] sm:$0xff]  ;;  %v2202_v7 = vld [vmem:[%s7013_s5 + $0xc0] sm:$0xff]  ;;  %v2204_v26 = vld [vmem:[%s7013_s5 + $0xd0] sm:$0xff] }
 0x740   :  { %v2206_v12 = vld [vmem:[%s7013_s5 + $0xe0] sm:$0xff]  ;;  %v2211_v40 = vld [vmem:[%s7013_s5 + $0x108] sm:$0xff] }
 0x741   :  { %4382 = vmatpush1.bf16.msra.mxu0 %v4381_v61  ;;  %4414 = vmatpush1.bf16.msra.mxu1 %v4413_v16 }
 0x742   :  { %4384 = vmatprep.subr.bf16.mxu0 %v4383_v20  ;;  %4416 = vmatprep.subr.bf16.mxu1 %v4415_v10  ;;  %v6370_v20 = vpack.c.bf16 %v2184_v39, %v2180_v9  ;;  %v2187_v10 = vld [vmem:[%s7013_s5 + $0x48] sm:$0xff] }
 0x743   :  { %v6384_v33 = vpack.c.bf16 %v2191_v25, %v2187_v10  ;;  %v2219_v9 = vld [vmem:[%s7013_s5 + $0x148] sm:$0xff]  ;;  %v2221_v25 = vld [vmem:[%s7013_s5 + $0x158] sm:$0xff] }
 0x744   :  { %v2223_v10 = vld [vmem:[%s7013_s5 + $0x168] sm:$0xff] }
 0x745   :  { %4386 = vmatpush1.bf16.msra.mxu0 %v4385_v51  ;;  %4418 = vmatpush1.bf16.msra.mxu1 %v4417_v47  ;;  %v6395_v51 = vpack.c.bf16 %v2193_v2, %v2189_v11  ;;  %v6397_v47 = vpack.c.bf16 %v2190_v42, %v2186_v29  ;;  %v2225_v11 = vld [vmem:[%s7013_s5 + $0x178] sm:$0xff]  ;;  %v6530_v2 = vpack.c.bf16 %v2223_v10, %v2219_v9  ;;  %v2218_v42 = vld [vmem:[%s7013_s5 + $0x140] sm:$0xff]  ;;  %v2236_v9 = vld [vmem:[%s7013_s5 + $0x1d0] sm:$0xff] }
 0x746   :  { %4388 = vmatprep.subr.bf16.mxu0 %v4387_v52  ;;  %4420 = vmatprep.subr.bf16.mxu1 %v4419_v62  ;;  %v6406_v52 = vpack.c.bf16 %v2192_v46, %v2188_v55  ;;  %v2195_v62 = vld [vmem:[%s7013_s5 + $0x88] sm:$0xff]  ;;  %v6532_v29 = vpack.c.bf16 %v2225_v11, %v2221_v25  ;;  %v2222_v55 = vld [vmem:[%s7013_s5 + $0x160] sm:$0xff]  ;;  %v2220_v46 = vld [vmem:[%s7013_s5 + $0x150] sm:$0xff] }
 0x747   :  { %v6420_v23 = vpack.c.bf16 %v2199_v15, %v2195_v62  ;;  %v6544_v62 = vpack.c.bf16 %v2222_v55, %v2218_v42  ;;  %v2224_v15 = vld [vmem:[%s7013_s5 + $0x170] sm:$0xff] }
 0x748   :  { %v2240_v10 = vld [vmem:[%s7013_s5 + $0x1f0] sm:$0xff] }
 0x749   :  { %4390 = vmatpush1.bf16.msra.mxu0 %v4389_v36  ;;  %4422 = vmatpush1.bf16.msra.mxu1 %v4421_v37  ;;  %v6431_v36 = vpack.c.bf16 %v2201_v24, %v2197_v19  ;;  %v6433_v37 = vpack.c.bf16 %v2198_v32, %v2194_v28  ;;  %v2227_v19 = vld [vmem:[%s7013_s5 + $0x188] sm:$0xff]  ;;  %v6557_v28 = vpack.c.bf16 %v2224_v15, %v2220_v46 }
 0x74a   :  { %4392 = vmatprep.subr.bf16.mxu0 %v4391_v49  ;;  %4424 = vmatprep.subr.bf16.mxu1 %v4423_v53  ;;  %v6442_v49 = vpack.c.bf16 %v2200_v45, %v2196_v41  ;;  %v2203_v53 = vld [vmem:[%s7013_s5 + $0xc8] sm:$0xff]  ;;  %v2229_v41 = vld [vmem:[%s7013_s5 + $0x198] sm:$0xff]  ;;  %v6622_v25 = vpack.c.bf16 %v2240_v10, %v2236_v9 }
 0x74b   :  { %v6456_v0 = vpack.c.bf16 %v2207_v56, %v2203_v53  ;;  %v2231_v24 = vld [vmem:[%s7013_s5 + $0x1a8] sm:$0xff]  ;;  %v2233_v45 = vld [vmem:[%s7013_s5 + $0x1b8] sm:$0xff]  ;;  %v2226_v53 = vld [vmem:[%s7013_s5 + $0x180] sm:$0xff] }
 0x74c   :  { %v6559_v32 = vpack.c.bf16 %v2231_v24, %v2227_v19  ;;  %v6570_v56 = vpack.c.bf16 %v2233_v45, %v2229_v41 }
 0x74d   :  { %4394 = vmatpush1.bf16.msra.mxu0 %v4393_v17  ;;  %4426 = vmatpush1.bf16.msra.mxu1 %v4425_v21  ;;  %v6467_v17 = vpack.c.bf16 %v2209_v4, %v2205_v60  ;;  %v6469_v21 = vpack.c.bf16 %v2206_v12, %v2202_v7  ;;  %v2230_v60 = vld [vmem:[%s7013_s5 + $0x1a0] sm:$0xff]  ;;  %v2228_v4 = vld [vmem:[%s7013_s5 + $0x190] sm:$0xff] }
 0x74e   :  { %4396 = vmatprep.subr.bf16.mxu0 %v4395_v30  ;;  %4428 = vmatprep.subr.bf16.mxu1 %v4427_v35  ;;  %v2208_v30 = vld [vmem:[%s7013_s5 + $0xf0] sm:$0xff]  ;;  %v6582_v12 = vpack.c.bf16 %v2230_v60, %v2226_v53 }
 0x74f   :  { %v6478_v35 = vpack.c.bf16 %v2208_v30, %v2204_v26  ;;  %v2232_v7 = vld [vmem:[%s7013_s5 + $0x1b0] sm:$0xff]  ;;  %v2235_v30 = vld [vmem:[%s7013_s5 + $0x1c8] sm:$0xff] }
 0x750   :  { %v6586_v26 = vpack.c.bf16 %v2232_v7, %v2228_v4 }
 0x751   :  { %4398 = vmatpush1.bf16.msra.mxu0 %v4397_v54  ;;  %4430 = vmatpush1.bf16.msra.mxu1 %v4429_v58  ;;  %v6492_v54 = vpack.c.bf16 %v2215_v44, %v2211_v40  ;;  %v2217_v58 = vld [vmem:[%s7013_s5 + $0x138] sm:$0xff]  ;;  %v2239_v40 = vld [vmem:[%s7013_s5 + $0x1e8] sm:$0xff] }
 0x752   :  { %v2237_v44 = vld [vmem:[%s7013_s5 + $0x1d8] sm:$0xff] }
 0x754   :  { %1985 = vmatmul.mubr.f32.vlgmr.msra.gmra.mrb[16].mxu0 %v5839_v18  ;;  %2098 = vmatmul.mubr.f32.vlgmr.msra.gmra.mrb[16].mxu1 %v5839_v18  ;;  %v2179_v18 = vld [vmem:[%s7013_s5 + $0x8] sm:$0xff] }
 0x755   :  { %1990 = vmatprep.mubr.f32.mxu0 %v5354_v3  ;;  %2103 = vmatprep.mubr.f32.mxu1 %v5354_v3 }
 0x758   :  { %1991 = vmatmul.mubr.f32.gmra.mrb[18].mxu0 %v5885_v38  ;;  %2104 = vmatmul.mubr.f32.gmra.mrb[18].mxu1 %v5885_v38  ;;  %v2183_v38 = vld [vmem:[%s7013_s5 + $0x28] sm:$0xff] }
 0x759   :  { %1996 = vmatprep.mubr.f32.mxu0 %v5354_v3  ;;  %2109 = vmatprep.mubr.f32.mxu1 %v5354_v3 }
 0x75c   :  { %1997 = vmatmul.mubr.f32.gmra.mrb[20].mxu0 %v5931_v50  ;;  %2110 = vmatmul.mubr.f32.gmra.mrb[20].mxu1 %v5931_v50  ;;  %v2181_v50 = vld [vmem:[%s7013_s5 + $0x18] sm:$0xff] }
 0x75d   :  { %2002 = vmatprep.mubr.f32.mxu0 %v5354_v3  ;;  %2115 = vmatprep.mubr.f32.mxu1 %v5354_v3 }
 0x760   :  { %2003 = vmatmul.mubr.f32.gmra.mrb[22].mxu0 %v5977_v14  ;;  %2116 = vmatmul.mubr.f32.gmra.mrb[22].mxu1 %v5977_v14  ;;  %v6348_v14 = vpack.c.bf16 %v2183_v38, %v2179_v18  ;;  %v2210_v18 = vld [vmem:[%s7013_s5 + $0x100] sm:$0xff] }
 0x761   :  { %2008 = vmatprep.mubr.f32.mxu0 %v5354_v3  ;;  %2121 = vmatprep.mubr.f32.mxu1 %v5354_v3  ;;  %v2214_v38 = vld [vmem:[%s7013_s5 + $0x120] sm:$0xff] }
 0x762   :  { %4432 = vmatprep.subr.bf16.mxu0 %v6348_v14 }
 0x764   :  { %2009 = vmatmul.mubr.f32.gmra.mrb[24].mxu0 %v6023_v43  ;;  %2122 = vmatmul.mubr.f32.gmra.mrb[24].mxu1 %v6023_v43  ;;  %v2185_v43 = vld [vmem:[%s7013_s5 + $0x38] sm:$0xff] }
 0x765   :  { %2014 = vmatprep.mubr.f32.mxu0 %v5354_v3  ;;  %2127 = vmatprep.mubr.f32.mxu1 %v5354_v3  ;;  %v6359_v61 = vpack.c.bf16 %v2185_v43, %v2181_v50  ;;  %v6503_v50 = vpack.c.bf16 %v2217_v58, %v2213_v48  ;;  %v6505_v43 = vpack.c.bf16 %v2214_v38, %v2210_v18  ;;  %v2241_v58 = vld [vmem:[%s7013_s5 + $0x1f8] sm:$0xff]  ;;  %v2234_v18 = vld [vmem:[%s7013_s5 + $0x1c0] sm:$0xff] }
 0x766   :  { %v6600_v48 = vpack.c.bf16 %v2239_v40, %v2235_v30  ;;  %v2238_v38 = vld [vmem:[%s7013_s5 + $0x1e0] sm:$0xff] }
 0x767   :  { %4464 = vmatprep.subr.bf16.mxu1 %v6359_v61 }
 0x768   :  { %2015 = vmatmul.mubr.f32.gmra.mrb[26].mxu0 %v6069_v57  ;;  %2128 = vmatmul.mubr.f32.gmra.mrb[26].mxu1 %v6069_v57  ;;  %v2178_v57 = vld [vmem:[%s7013_s5] sm:$0xff] }
 0x769   :  { %2020 = vmatprep.mubr.f32.mxu0 %v5354_v3  ;;  %2133 = vmatprep.mubr.f32.mxu1 %v5354_v3 }
 0x76a   :  { %4466 = vmatpush1.bf16.msra.mxu1 %v6370_v20 }
 0x76b   :  { %4468 = vmatprep.subr.bf16.mxu1 %v6395_v51 }
 0x76c   :  { %2021 = vmatmul.mubr.f32.gmra.mrb[28].mxu0 %v6155_v22  ;;  %2134 = vmatmul.mubr.f32.gmra.mrb[28].mxu1 %v6155_v22  ;;  %v2182_v22 = vld [vmem:[%s7013_s5 + $0x20] sm:$0xff] }
 0x76d   :  { %2026 = vmatprep.mubr.f32.mxu0 %v5354_v3  ;;  %2139 = vmatprep.mubr.f32.mxu1 %v5354_v3  ;;  %v6361_v16 = vpack.c.bf16 %v2182_v22, %v2178_v57  ;;  %v2212_v57 = vld [vmem:[%s7013_s5 + $0x110] sm:$0xff] }
 0x76e   :  { %4470 = vmatpush1.bf16.msra.mxu1 %v6406_v52  ;;  %v2216_v22 = vld [vmem:[%s7013_s5 + $0x130] sm:$0xff] }
 0x76f   :  { %4434 = vmatpush1.bf16.msra.mxu0 %v6361_v16  ;;  %4472 = vmatprep.subr.bf16.mxu1 %v6431_v36  ;;  %v6517_v39 = vpack.c.bf16 %v2216_v22, %v2212_v57  ;;  %v6611_v57 = vpack.c.bf16 %v2241_v58, %v2237_v44  ;;  %v6613_v22 = vpack.c.bf16 %v2238_v38, %v2234_v18 }
 0x770   :  { %4436 = vmatprep.subr.bf16.mxu0 %v6384_v33 }
 0x772   :  { %4474 = vmatpush1.bf16.msra.mxu1 %v6442_v49 }
 0x773   :  { %4438 = vmatpush1.bf16.msra.mxu0 %v6397_v47  ;;  %4476 = vmatprep.subr.bf16.mxu1 %v6467_v17 }
 0x774   :  { %4440 = vmatprep.subr.bf16.mxu0 %v6420_v23 }
 0x776   :  { %4478 = vmatpush1.bf16.msra.mxu1 %v6478_v35 }
 0x777   :  { %4442 = vmatpush1.bf16.msra.mxu0 %v6433_v37  ;;  %4480 = vmatprep.subr.bf16.mxu1 %v6503_v50 }
 0x778   :  { %4444 = vmatprep.subr.bf16.mxu0 %v6456_v0 }
 0x77a   :  { %4482 = vmatpush1.bf16.msra.mxu1 %v6517_v39 }
 0x77b   :  { %4446 = vmatpush1.bf16.msra.mxu0 %v6469_v21  ;;  %4484 = vmatprep.subr.bf16.mxu1 %v6532_v29 }
 0x77c   :  { %4448 = vmatprep.subr.bf16.mxu0 %v6492_v54 }
 0x77e   :  { %4486 = vmatpush1.bf16.msra.mxu1 %v6557_v28 }
 0x77f   :  { %4450 = vmatpush1.bf16.msra.mxu0 %v6505_v43  ;;  %4488 = vmatprep.subr.bf16.mxu1 %v6570_v56 }
 0x780   :  { %4452 = vmatprep.subr.bf16.mxu0 %v6530_v2 }
 0x782   :  { %4490 = vmatpush1.bf16.msra.mxu1 %v6586_v26 }
 0x783   :  { %4454 = vmatpush1.bf16.msra.mxu0 %v6544_v62  ;;  %4492 = vmatprep.subr.bf16.mxu1 %v6611_v57 }
 0x784   :  { %4456 = vmatprep.subr.bf16.mxu0 %v6559_v32 }
 0x786   :  { %4494 = vmatpush1.bf16.msra.mxu1 %v6622_v25 }
 0x787   :  { %4458 = vmatpush1.bf16.msra.mxu0 %v6582_v12  ;;  %4528 = vmatprep.subr.bf16.mxu1 %v6359_v61 }
 0x788   :  { %4460 = vmatprep.subr.bf16.mxu0 %v6600_v48 }
 0x78b   :  { %4462 = vmatpush1.bf16.msra.mxu0 %v6613_v22 }
 0x78c   :  { %4496 = vmatprep.subr.bf16.mxu0 %v6348_v14 }
 0x807   :  { %v1721_v11 = vpop.f32.mrb[14].mxu0  ;;  %v1792_v42 = vpop.f32.mrb[14].mxu1 }
 0x808   :  { %v4981_v55 = vadd.f32 %v1721_v11, %v5816_v6  ;;  %v1723_v46 = vpop.f32.mrb[15].mxu0  ;;  %v1794_v15 = vpop.f32.mrb[15].mxu1  ;;  %v4997_v45 = vadd.f32 %v1792_v42, %v5827_v27 }
 0x809   :  { %v4982_v19 = vadd.f32 %v1723_v46, %v5820_v8  ;;  %v4998_v53 = vadd.f32 %v1794_v15, %v5833_v34 }
 0x80a   :  { %v3775_v24 = vmul.f32 -1.442695, %v4981_v55  ;;  %v3777_v60 = vmul.f32 -1.442695, %v4997_v45 }
 0x80b   :  { %v3776_v41 = vmul.f32 -1.442695, %v4982_v19 }
 0x80c   :  { %5210 = vpow2.f32 %v3775_v24 }
 0x80d   :  { %5212 = vpow2.f32 %v3776_v41 }
 0x80e   :  { %5214 = vtanh.f32 %v4998_v53 }
 0x80f   :  { %5216 = vpow2.f32 %v3777_v60 }
 0x816   :  { %v5211_v4 = vpop.eup %5210 }
 0x817   :  { %v1810_v7 = vadd.f32 1.0, %v5211_v4  ;;  %v5213_v30 = vpop.eup %5212 }
 0x818   :  { %v1811_v6 = vadd.f32 1.0, %v5213_v30  ;;  %v5215_v40 = vpop.eup %5214 }
 0x819   :  { %5218 = vrcp.f32 %v1810_v7  ;;  %v5217_v44 = vpop.eup %5216 }
 0x81a   :  { %5220 = vrcp.f32 %v1811_v6  ;;  %v1812_v38 = vadd.f32 1.0, %v5217_v44 }
 0x81c   :  { %5222 = vrcp.f32 %v1812_v38 }
 0x823   :  { %v5219_v8 = vpop.eup %5218 }
 0x824   :  { %v1821_v58 = vmul.f32 %v5219_v8, %v5215_v40  ;;  %v5221_v18 = vpop.eup %5220 }
 0x825   :  { %v1820_v9 = vmul.f32 %v5221_v18, %v6122_v59  ;;  %v1898_v59 = vld [vmem:[%s7014_s6] sm:$0xf] }
 0x826   :  { %v5223_v34 = vpop.eup %5222  ;;  %v6677_v42 = vrot.slane %v1898_v59, %v48_v1  ;;  %v6681_v55 = vrot.slane %v1898_v59, %v52_v5  ;;  %v6687_v4 = vrot.slane %v1898_v59, %v56_v13  ;;  %v6691_v1 = vrot.slane %v1898_v59, %v60_v31 }
 0x827   :  { %v1822_v27 = vadd.f32 %v1821_v58, %v1820_v9 }
 0x829   :  { %5224 = vtanh.f32 %v1822_v27 }
 0x833   :  { %v5225_v10 = vpop.eup %5224 }
 0x834   :  { %v1824_v11 = vmul.f32 %v5225_v10, %v5223_v34 }
 0x836   :  { %2027 = vmatmul.mubr.f32.gmra.mrb[30].mxu0 %v1824_v11  ;;  %2140 = vmatmul.mubr.f32.gmra.mrb[30].mxu1 %v1824_v11 }
 0x837   :  { %2310 = vmatprep.mubr.f32.mxu0 %v5354_v3  ;;  %2381 = vmatprep.mubr.f32.mxu1 %v5354_v3 }
 0x83a   :  { %2311 = vmatmul.mubr.f32.vlgmr.msra.gmra.mrb[16].mxu0 %v5354_v3  ;;  %2382 = vmatmul.mubr.f32.vlgmr.msra.gmra.mrb[16].mxu1 %v5354_v3 }
 0x83b   :  { %4498 = vmatpush1.bf16.msra.mxu0 %v6361_v16  ;;  %4530 = vmatpush1.bf16.msra.mxu1 %v6370_v20 }
 0x83c   :  { %4500 = vmatprep.subr.bf16.mxu0 %v6384_v33  ;;  %4532 = vmatprep.subr.bf16.mxu1 %v6395_v51 }
 0x83d   :  { %2484 = vmatprep.mubr.f32.mxu0 %v5354_v3  ;;  %2555 = vmatprep.mubr.f32.mxu1 %v5354_v3 }
 0x83f   :  { %4502 = vmatpush1.bf16.msra.mxu0 %v6397_v47  ;;  %4534 = vmatpush1.bf16.msra.mxu1 %v6406_v52 }
 0x840   :  { %4504 = vmatprep.subr.bf16.mxu0 %v6420_v23  ;;  %4536 = vmatprep.subr.bf16.mxu1 %v6431_v36 }
 0x843   :  { %4506 = vmatpush1.bf16.msra.mxu0 %v6433_v37  ;;  %4538 = vmatpush1.bf16.msra.mxu1 %v6442_v49 }
 0x844   :  { %4508 = vmatprep.subr.bf16.mxu0 %v6456_v0  ;;  %4540 = vmatprep.subr.bf16.mxu1 %v6467_v17 }
 0x847   :  { %4510 = vmatpush1.bf16.msra.mxu0 %v6469_v21  ;;  %4542 = vmatpush1.bf16.msra.mxu1 %v6478_v35 }
 0x848   :  { %4512 = vmatprep.subr.bf16.mxu0 %v6492_v54  ;;  %4544 = vmatprep.subr.bf16.mxu1 %v6503_v50 }
 0x84b   :  { %4514 = vmatpush1.bf16.msra.mxu0 %v6505_v43  ;;  %4546 = vmatpush1.bf16.msra.mxu1 %v6517_v39 }
 0x84c   :  { %4516 = vmatprep.subr.bf16.mxu0 %v6530_v2  ;;  %4548 = vmatprep.subr.bf16.mxu1 %v6532_v29 }
 0x84f   :  { %4518 = vmatpush1.bf16.msra.mxu0 %v6544_v62  ;;  %4550 = vmatpush1.bf16.msra.mxu1 %v6557_v28 }
 0x850   :  { %4520 = vmatprep.subr.bf16.mxu0 %v6559_v32  ;;  %4552 = vmatprep.subr.bf16.mxu1 %v6570_v56 }
 0x853   :  { %4522 = vmatpush1.bf16.msra.mxu0 %v6582_v12  ;;  %4554 = vmatpush1.bf16.msra.mxu1 %v6586_v26 }
 0x854   :  { %4524 = vmatprep.subr.bf16.mxu0 %v6600_v48  ;;  %4556 = vmatprep.subr.bf16.mxu1 %v6611_v57 }
 0x857   :  { %4526 = vmatpush1.bf16.msra.mxu0 %v6613_v22  ;;  %4558 = vmatpush1.bf16.msra.mxu1 %v6622_v25 }
 0x858   :  { %4560 = vmatprep.subr.bf16.mxu0 %v6348_v14  ;;  %4592 = vmatprep.subr.bf16.mxu1 %v6359_v61 }
 0x90d   :  { %v2312_v46 = vpop.f32.mrb[16].mxu0  ;;  %v2383_v15 = vpop.f32.mrb[16].mxu1 }
 0x90e   :  { %v4999_v19 = vadd.f32 %v2312_v46, %v6677_v42  ;;  %v2314_v24 = vpop.f32.mrb[17].mxu0  ;;  %v2385_v41 = vpop.f32.mrb[17].mxu1  ;;  %v5015_v5 = vadd.f32 %v2383_v15, %v6687_v4 }
 0x90f   :  { %v5000_v45 = vadd.f32 %v2314_v24, %v6681_v55  ;;  %v5016_v7 = vadd.f32 %v2385_v41, %v6691_v1 }
 0x910   :  { %v3778_v53 = vmul.f32 -1.442695, %v4999_v19  ;;  %v3780_v30 = vmul.f32 -1.442695, %v5015_v5 }
 0x911   :  { %v3779_v60 = vmul.f32 -1.442695, %v5000_v45 }
 0x912   :  { %5226 = vpow2.f32 %v3778_v53 }
 0x913   :  { %5228 = vpow2.f32 %v3779_v60 }
 0x914   :  { %5230 = vtanh.f32 %v5016_v7 }
 0x915   :  { %5232 = vpow2.f32 %v3780_v30 }
 0x91c   :  { %v5227_v6 = vpop.eup %5226 }
 0x91d   :  { %v2401_v40 = vadd.f32 1.0, %v5227_v6  ;;  %v5229_v44 = vpop.eup %5228 }
 0x91e   :  { %v2402_v8 = vadd.f32 1.0, %v5229_v44  ;;  %v5231_v13 = vpop.eup %5230 }
 0x91f   :  { %5234 = vrcp.f32 %v2401_v40  ;;  %v5233_v58 = vpop.eup %5232 }
 0x920   :  { %5236 = vrcp.f32 %v2402_v8  ;;  %v2403_v31 = vadd.f32 1.0, %v5233_v58 }
 0x922   :  { %5238 = vrcp.f32 %v2403_v31 }
 0x929   :  { %v5235_v18 = vpop.eup %5234 }
 0x92a   :  { %v2412_v38 = vmul.f32 %v5235_v18, %v5231_v13  ;;  %v5237_v63 = vpop.eup %5236 }
 0x92b   :  { %v2411_v9 = vmul.f32 0.0, %v5237_v63 }
 0x92c   :  { %v5239_v34 = vpop.eup %5238 }
 0x92d   :  { %v6695_v27 = vadd.f32 %v2412_v38, %v2411_v9 }
 0x92f   :  { %5240 = vtanh.f32 %v6695_v27 }
 0x939   :  { %v5241_v10 = vpop.eup %5240 }
 0x93a   :  { %v2415_v11 = vmul.f32 %v5241_v10, %v5239_v34 }
 0x93c   :  { %2485 = vmatmul.mubr.f32.vlgmr.msra.gmra.mrb[18].mxu0 %v2415_v11  ;;  %2556 = vmatmul.mubr.f32.vlgmr.msra.gmra.mrb[18].mxu1 %v2415_v11 }
 0x93d   :  { %4562 = vmatpush1.bf16.msra.mxu0 %v6361_v16  ;;  %4594 = vmatpush1.bf16.msra.mxu1 %v6370_v20 }
 0x93e   :  { %4564 = vmatprep.subr.bf16.mxu0 %v6384_v33  ;;  %4596 = vmatprep.subr.bf16.mxu1 %v6395_v51 }
 0x93f   :  { %2658 = vmatprep.mubr.f32.mxu0 %v5354_v3  ;;  %2729 = vmatprep.mubr.f32.mxu1 %v5354_v3 }
 0x941   :  { %4566 = vmatpush1.bf16.msra.mxu0 %v6397_v47  ;;  %4598 = vmatpush1.bf16.msra.mxu1 %v6406_v52 }
 0x942   :  { %4568 = vmatprep.subr.bf16.mxu0 %v6420_v23  ;;  %4600 = vmatprep.subr.bf16.mxu1 %v6431_v36 }
 0x945   :  { %4570 = vmatpush1.bf16.msra.mxu0 %v6433_v37  ;;  %4602 = vmatpush1.bf16.msra.mxu1 %v6442_v49 }
 0x946   :  { %4572 = vmatprep.subr.bf16.mxu0 %v6456_v0  ;;  %4604 = vmatprep.subr.bf16.mxu1 %v6467_v17 }
 0x949   :  { %4574 = vmatpush1.bf16.msra.mxu0 %v6469_v21  ;;  %4606 = vmatpush1.bf16.msra.mxu1 %v6478_v35 }
 0x94a   :  { %4576 = vmatprep.subr.bf16.mxu0 %v6492_v54  ;;  %4608 = vmatprep.subr.bf16.mxu1 %v6503_v50 }
 0x94d   :  { %4578 = vmatpush1.bf16.msra.mxu0 %v6505_v43  ;;  %4610 = vmatpush1.bf16.msra.mxu1 %v6517_v39 }
 0x94e   :  { %4580 = vmatprep.subr.bf16.mxu0 %v6530_v2  ;;  %4612 = vmatprep.subr.bf16.mxu1 %v6532_v29 }
 0x951   :  { %4582 = vmatpush1.bf16.msra.mxu0 %v6544_v62  ;;  %4614 = vmatpush1.bf16.msra.mxu1 %v6557_v28 }
 0x952   :  { %4584 = vmatprep.subr.bf16.mxu0 %v6559_v32  ;;  %4616 = vmatprep.subr.bf16.mxu1 %v6570_v56 }
 0x955   :  { %4586 = vmatpush1.bf16.msra.mxu0 %v6582_v12  ;;  %4618 = vmatpush1.bf16.msra.mxu1 %v6586_v26 }
 0x956   :  { %4588 = vmatprep.subr.bf16.mxu0 %v6600_v48  ;;  %4620 = vmatprep.subr.bf16.mxu1 %v6611_v57 }
 0x959   :  { %4590 = vmatpush1.bf16.msra.mxu0 %v6613_v22  ;;  %4622 = vmatpush1.bf16.msra.mxu1 %v6622_v25 }
 0x95a   :  { %4624 = vmatprep.subr.bf16.mxu0 %v6348_v14  ;;  %4656 = vmatprep.subr.bf16.mxu1 %v6359_v61 }
 0xa0f   :  { %v2486_v59 = vpop.f32.mrb[18].mxu0  ;;  %v2557_v46 = vpop.f32.mrb[18].mxu1 }
 0xa10   :  { %v5001_v15 = vadd.f32 %v2486_v59, %v6677_v42  ;;  %v2488_v19 = vpop.f32.mrb[19].mxu0  ;;  %v2559_v24 = vpop.f32.mrb[19].mxu1  ;;  %v5017_v60 = vadd.f32 %v2557_v46, %v6687_v4 }
 0xa11   :  { %v5002_v41 = vadd.f32 %v2488_v19, %v6681_v55  ;;  %v5018_v5 = vadd.f32 %v2559_v24, %v6691_v1 }
 0xa12   :  { %v3781_v45 = vmul.f32 -1.442695, %v5001_v15  ;;  %v3783_v7 = vmul.f32 -1.442695, %v5017_v60 }
 0xa13   :  { %v3782_v53 = vmul.f32 -1.442695, %v5002_v41 }
 0xa14   :  { %5242 = vpow2.f32 %v3781_v45 }
 0xa15   :  { %5244 = vpow2.f32 %v3782_v53 }
 0xa16   :  { %5246 = vtanh.f32 %v5018_v5 }
 0xa17   :  { %5248 = vpow2.f32 %v3783_v7 }
 0xa1e   :  { %v5243_v30 = vpop.eup %5242 }
 0xa1f   :  { %v2575_v6 = vadd.f32 1.0, %v5243_v30  ;;  %v5245_v40 = vpop.eup %5244 }
 0xa20   :  { %v2576_v44 = vadd.f32 1.0, %v5245_v40  ;;  %v5247_v8 = vpop.eup %5246 }
 0xa21   :  { %5250 = vrcp.f32 %v2575_v6  ;;  %v5249_v13 = vpop.eup %5248 }
 0xa22   :  { %5252 = vrcp.f32 %v2576_v44  ;;  %v2577_v63 = vadd.f32 1.0, %v5249_v13 }
 0xa24   :  { %5254 = vrcp.f32 %v2577_v63 }
 0xa2b   :  { %v5251_v58 = vpop.eup %5250 }
 0xa2c   :  { %v2586_v18 = vmul.f32 %v5251_v58, %v5247_v8  ;;  %v5253_v38 = vpop.eup %5252 }
 0xa2d   :  { %v2585_v31 = vmul.f32 %v5253_v38, %v6695_v27 }
 0xa2e   :  { %v5255_v34 = vpop.eup %5254 }
 0xa2f   :  { %v6737_v9 = vadd.f32 %v2586_v18, %v2585_v31 }
 0xa31   :  { %5256 = vtanh.f32 %v6737_v9 }
 0xa3b   :  { %v5257_v10 = vpop.eup %5256 }
 0xa3c   :  { %v2589_v11 = vmul.f32 %v5257_v10, %v5255_v34 }
 0xa3e   :  { %2659 = vmatmul.mubr.f32.vlgmr.msra.gmra.mrb[20].mxu0 %v2589_v11  ;;  %2730 = vmatmul.mubr.f32.vlgmr.msra.gmra.mrb[20].mxu1 %v2589_v11 }
 0xa3f   :  { %4626 = vmatpush1.bf16.msra.mxu0 %v6361_v16  ;;  %4658 = vmatpush1.bf16.msra.mxu1 %v6370_v20 }
 0xa40   :  { %4628 = vmatprep.subr.bf16.mxu0 %v6384_v33  ;;  %4660 = vmatprep.subr.bf16.mxu1 %v6395_v51 }
 0xa41   :  { %2832 = vmatprep.mubr.f32.mxu0 %v5354_v3  ;;  %2903 = vmatprep.mubr.f32.mxu1 %v5354_v3 }
 0xa43   :  { %4630 = vmatpush1.bf16.msra.mxu0 %v6397_v47  ;;  %4662 = vmatpush1.bf16.msra.mxu1 %v6406_v52 }
 0xa44   :  { %4632 = vmatprep.subr.bf16.mxu0 %v6420_v23  ;;  %4664 = vmatprep.subr.bf16.mxu1 %v6431_v36 }
 0xa47   :  { %4634 = vmatpush1.bf16.msra.mxu0 %v6433_v37  ;;  %4666 = vmatpush1.bf16.msra.mxu1 %v6442_v49 }
 0xa48   :  { %4636 = vmatprep.subr.bf16.mxu0 %v6456_v0  ;;  %4668 = vmatprep.subr.bf16.mxu1 %v6467_v17 }
 0xa4b   :  { %4638 = vmatpush1.bf16.msra.mxu0 %v6469_v21  ;;  %4670 = vmatpush1.bf16.msra.mxu1 %v6478_v35 }
 0xa4c   :  { %4640 = vmatprep.subr.bf16.mxu0 %v6492_v54  ;;  %4672 = vmatprep.subr.bf16.mxu1 %v6503_v50 }
 0xa4f   :  { %4642 = vmatpush1.bf16.msra.mxu0 %v6505_v43  ;;  %4674 = vmatpush1.bf16.msra.mxu1 %v6517_v39 }
 0xa50   :  { %4644 = vmatprep.subr.bf16.mxu0 %v6530_v2  ;;  %4676 = vmatprep.subr.bf16.mxu1 %v6532_v29 }
 0xa53   :  { %4646 = vmatpush1.bf16.msra.mxu0 %v6544_v62  ;;  %4678 = vmatpush1.bf16.msra.mxu1 %v6557_v28 }
 0xa54   :  { %4648 = vmatprep.subr.bf16.mxu0 %v6559_v32  ;;  %4680 = vmatprep.subr.bf16.mxu1 %v6570_v56 }
 0xa57   :  { %4650 = vmatpush1.bf16.msra.mxu0 %v6582_v12  ;;  %4682 = vmatpush1.bf16.msra.mxu1 %v6586_v26 }
 0xa58   :  { %4652 = vmatprep.subr.bf16.mxu0 %v6600_v48  ;;  %4684 = vmatprep.subr.bf16.mxu1 %v6611_v57 }
 0xa5b   :  { %4654 = vmatpush1.bf16.msra.mxu0 %v6613_v22  ;;  %4686 = vmatpush1.bf16.msra.mxu1 %v6622_v25 }
 0xa5c   :  { %4688 = vmatprep.subr.bf16.mxu0 %v6348_v14  ;;  %4720 = vmatprep.subr.bf16.mxu1 %v6359_v61 }
 0xb11   :  { %v2660_v27 = vpop.f32.mrb[20].mxu0  ;;  %v2731_v59 = vpop.f32.mrb[20].mxu1 }
 0xb12   :  { %v5003_v46 = vadd.f32 %v2660_v27, %v6677_v42  ;;  %v2662_v15 = vpop.f32.mrb[21].mxu0  ;;  %v2733_v19 = vpop.f32.mrb[21].mxu1  ;;  %v5019_v53 = vadd.f32 %v2731_v59, %v6687_v4 }
 0xb13   :  { %v5004_v24 = vadd.f32 %v2662_v15, %v6681_v55  ;;  %v5020_v60 = vadd.f32 %v2733_v19, %v6691_v1 }
 0xb14   :  { %v3784_v41 = vmul.f32 -1.442695, %v5003_v46  ;;  %v3786_v5 = vmul.f32 -1.442695, %v5019_v53 }
 0xb15   :  { %v3785_v45 = vmul.f32 -1.442695, %v5004_v24 }
 0xb16   :  { %5258 = vpow2.f32 %v3784_v41 }
 0xb17   :  { %5260 = vpow2.f32 %v3785_v45 }
 0xb18   :  { %5262 = vtanh.f32 %v5020_v60 }
 0xb19   :  { %5264 = vpow2.f32 %v3786_v5 }
 0xb20   :  { %v5259_v7 = vpop.eup %5258 }
 0xb21   :  { %v2749_v30 = vadd.f32 1.0, %v5259_v7  ;;  %v5261_v6 = vpop.eup %5260 }
 0xb22   :  { %v2750_v40 = vadd.f32 1.0, %v5261_v6  ;;  %v5263_v44 = vpop.eup %5262 }
 0xb23   :  { %5266 = vrcp.f32 %v2749_v30  ;;  %v5265_v8 = vpop.eup %5264 }
 0xb24   :  { %5268 = vrcp.f32 %v2750_v40  ;;  %v2751_v38 = vadd.f32 1.0, %v5265_v8 }
 0xb26   :  { %5270 = vrcp.f32 %v2751_v38 }
 0xb2d   :  { %v5267_v13 = vpop.eup %5266 }
 0xb2e   :  { %v2760_v58 = vmul.f32 %v5267_v13, %v5263_v44  ;;  %v5269_v18 = vpop.eup %5268 }
 0xb2f   :  { %v2759_v63 = vmul.f32 %v5269_v18, %v6737_v9 }
 0xb30   :  { %v5271_v34 = vpop.eup %5270 }
 0xb31   :  { %v6779_v31 = vadd.f32 %v2760_v58, %v2759_v63 }
 0xb33   :  { %5272 = vtanh.f32 %v6779_v31 }
 0xb3d   :  { %v5273_v10 = vpop.eup %5272 }
 0xb3e   :  { %v2763_v11 = vmul.f32 %v5273_v10, %v5271_v34 }
 0xb40   :  { %2833 = vmatmul.mubr.f32.vlgmr.msra.gmra.mrb[22].mxu0 %v2763_v11  ;;  %2904 = vmatmul.mubr.f32.vlgmr.msra.gmra.mrb[22].mxu1 %v2763_v11 }
 0xb41   :  { %4690 = vmatpush1.bf16.msra.mxu0 %v6361_v16  ;;  %4722 = vmatpush1.bf16.msra.mxu1 %v6370_v20 }
 0xb42   :  { %4692 = vmatprep.subr.bf16.mxu0 %v6384_v33  ;;  %4724 = vmatprep.subr.bf16.mxu1 %v6395_v51 }
 0xb43   :  { %3006 = vmatprep.mubr.f32.mxu0 %v5354_v3  ;;  %3077 = vmatprep.mubr.f32.mxu1 %v5354_v3 }
 0xb45   :  { %4694 = vmatpush1.bf16.msra.mxu0 %v6397_v47  ;;  %4726 = vmatpush1.bf16.msra.mxu1 %v6406_v52 }
 0xb46   :  { %4696 = vmatprep.subr.bf16.mxu0 %v6420_v23  ;;  %4728 = vmatprep.subr.bf16.mxu1 %v6431_v36 }
 0xb49   :  { %4698 = vmatpush1.bf16.msra.mxu0 %v6433_v37  ;;  %4730 = vmatpush1.bf16.msra.mxu1 %v6442_v49 }
 0xb4a   :  { %4700 = vmatprep.subr.bf16.mxu0 %v6456_v0  ;;  %4732 = vmatprep.subr.bf16.mxu1 %v6467_v17 }
 0xb4d   :  { %4702 = vmatpush1.bf16.msra.mxu0 %v6469_v21  ;;  %4734 = vmatpush1.bf16.msra.mxu1 %v6478_v35 }
 0xb4e   :  { %4704 = vmatprep.subr.bf16.mxu0 %v6492_v54  ;;  %4736 = vmatprep.subr.bf16.mxu1 %v6503_v50 }
 0xb51   :  { %4706 = vmatpush1.bf16.msra.mxu0 %v6505_v43  ;;  %4738 = vmatpush1.bf16.msra.mxu1 %v6517_v39 }
 0xb52   :  { %4708 = vmatprep.subr.bf16.mxu0 %v6530_v2  ;;  %4740 = vmatprep.subr.bf16.mxu1 %v6532_v29 }
 0xb55   :  { %4710 = vmatpush1.bf16.msra.mxu0 %v6544_v62  ;;  %4742 = vmatpush1.bf16.msra.mxu1 %v6557_v28 }
 0xb56   :  { %4712 = vmatprep.subr.bf16.mxu0 %v6559_v32  ;;  %4744 = vmatprep.subr.bf16.mxu1 %v6570_v56 }
 0xb59   :  { %4714 = vmatpush1.bf16.msra.mxu0 %v6582_v12  ;;  %4746 = vmatpush1.bf16.msra.mxu1 %v6586_v26 }
 0xb5a   :  { %4716 = vmatprep.subr.bf16.mxu0 %v6600_v48  ;;  %4748 = vmatprep.subr.bf16.mxu1 %v6611_v57 }
 0xb5d   :  { %4718 = vmatpush1.bf16.msra.mxu0 %v6613_v22  ;;  %4750 = vmatpush1.bf16.msra.mxu1 %v6622_v25 }
 0xb5e   :  { %4752 = vmatprep.subr.bf16.mxu0 %v6348_v14  ;;  %4784 = vmatprep.subr.bf16.mxu1 %v6359_v61 }
 0xc13   :  { %v2834_v9 = vpop.f32.mrb[22].mxu0  ;;  %v2905_v27 = vpop.f32.mrb[22].mxu1 }
 0xc14   :  { %v5005_v59 = vadd.f32 %v2834_v9, %v6677_v42  ;;  %v2836_v46 = vpop.f32.mrb[23].mxu0  ;;  %v2907_v15 = vpop.f32.mrb[23].mxu1  ;;  %v5021_v45 = vadd.f32 %v2905_v27, %v6687_v4 }
 0xc15   :  { %v5006_v19 = vadd.f32 %v2836_v46, %v6681_v55  ;;  %v5022_v53 = vadd.f32 %v2907_v15, %v6691_v1 }
 0xc16   :  { %v3787_v24 = vmul.f32 -1.442695, %v5005_v59  ;;  %v3789_v60 = vmul.f32 -1.442695, %v5021_v45 }
 0xc17   :  { %v3788_v41 = vmul.f32 -1.442695, %v5006_v19 }
 0xc18   :  { %5274 = vpow2.f32 %v3787_v24 }
 0xc19   :  { %5276 = vpow2.f32 %v3788_v41 }
 0xc1a   :  { %5278 = vtanh.f32 %v5022_v53 }
 0xc1b   :  { %5280 = vpow2.f32 %v3789_v60 }
 0xc22   :  { %v5275_v5 = vpop.eup %5274 }
 0xc23   :  { %v2923_v7 = vadd.f32 1.0, %v5275_v5  ;;  %v5277_v30 = vpop.eup %5276 }
 0xc24   :  { %v2924_v6 = vadd.f32 1.0, %v5277_v30  ;;  %v5279_v40 = vpop.eup %5278 }
 0xc25   :  { %5282 = vrcp.f32 %v2923_v7  ;;  %v5281_v44 = vpop.eup %5280 }
 0xc26   :  { %5284 = vrcp.f32 %v2924_v6  ;;  %v2925_v18 = vadd.f32 1.0, %v5281_v44 }
 0xc28   :  { %5286 = vrcp.f32 %v2925_v18 }
 0xc2f   :  { %v5283_v8 = vpop.eup %5282 }
 0xc30   :  { %v2934_v13 = vmul.f32 %v5283_v8, %v5279_v40  ;;  %v5285_v58 = vpop.eup %5284 }
 0xc31   :  { %v2933_v38 = vmul.f32 %v5285_v58, %v6779_v31 }
 0xc32   :  { %v5287_v34 = vpop.eup %5286 }
 0xc33   :  { %v6821_v63 = vadd.f32 %v2934_v13, %v2933_v38 }
 0xc35   :  { %5288 = vtanh.f32 %v6821_v63 }
 0xc3f   :  { %v5289_v10 = vpop.eup %5288 }
 0xc40   :  { %v2937_v11 = vmul.f32 %v5289_v10, %v5287_v34 }
 0xc42   :  { %3007 = vmatmul.mubr.f32.vlgmr.msra.gmra.mrb[24].mxu0 %v2937_v11  ;;  %3078 = vmatmul.mubr.f32.vlgmr.msra.gmra.mrb[24].mxu1 %v2937_v11 }
 0xc43   :  { %4754 = vmatpush1.bf16.msra.mxu0 %v6361_v16  ;;  %4786 = vmatpush1.bf16.msra.mxu1 %v6370_v20 }
 0xc44   :  { %4756 = vmatprep.subr.bf16.mxu0 %v6384_v33  ;;  %4788 = vmatprep.subr.bf16.mxu1 %v6395_v51 }
 0xc45   :  { %3180 = vmatprep.mubr.f32.mxu0 %v5354_v3  ;;  %3251 = vmatprep.mubr.f32.mxu1 %v5354_v3 }
 0xc47   :  { %4758 = vmatpush1.bf16.msra.mxu0 %v6397_v47  ;;  %4790 = vmatpush1.bf16.msra.mxu1 %v6406_v52 }
 0xc48   :  { %4760 = vmatprep.subr.bf16.mxu0 %v6420_v23  ;;  %4792 = vmatprep.subr.bf16.mxu1 %v6431_v36 }
 0xc4b   :  { %4762 = vmatpush1.bf16.msra.mxu0 %v6433_v37  ;;  %4794 = vmatpush1.bf16.msra.mxu1 %v6442_v49 }
 0xc4c   :  { %4764 = vmatprep.subr.bf16.mxu0 %v6456_v0  ;;  %4796 = vmatprep.subr.bf16.mxu1 %v6467_v17 }
 0xc4f   :  { %4766 = vmatpush1.bf16.msra.mxu0 %v6469_v21  ;;  %4798 = vmatpush1.bf16.msra.mxu1 %v6478_v35 }
 0xc50   :  { %4768 = vmatprep.subr.bf16.mxu0 %v6492_v54  ;;  %4800 = vmatprep.subr.bf16.mxu1 %v6503_v50 }
 0xc53   :  { %4770 = vmatpush1.bf16.msra.mxu0 %v6505_v43  ;;  %4802 = vmatpush1.bf16.msra.mxu1 %v6517_v39 }
 0xc54   :  { %4772 = vmatprep.subr.bf16.mxu0 %v6530_v2  ;;  %4804 = vmatprep.subr.bf16.mxu1 %v6532_v29 }
 0xc57   :  { %4774 = vmatpush1.bf16.msra.mxu0 %v6544_v62  ;;  %4806 = vmatpush1.bf16.msra.mxu1 %v6557_v28 }
 0xc58   :  { %4776 = vmatprep.subr.bf16.mxu0 %v6559_v32  ;;  %4808 = vmatprep.subr.bf16.mxu1 %v6570_v56 }
 0xc5b   :  { %4778 = vmatpush1.bf16.msra.mxu0 %v6582_v12  ;;  %4810 = vmatpush1.bf16.msra.mxu1 %v6586_v26 }
 0xc5c   :  { %4780 = vmatprep.subr.bf16.mxu0 %v6600_v48  ;;  %4812 = vmatprep.subr.bf16.mxu1 %v6611_v57 }
 0xc5f   :  { %4782 = vmatpush1.bf16.msra.mxu0 %v6613_v22  ;;  %4814 = vmatpush1.bf16.msra.mxu1 %v6622_v25 }
 0xc60   :  { %4816 = vmatprep.subr.bf16.mxu0 %v6348_v14  ;;  %4848 = vmatprep.subr.bf16.mxu1 %v6359_v61 }
 0xd15   :  { %v3008_v31 = vpop.f32.mrb[24].mxu0  ;;  %v3079_v9 = vpop.f32.mrb[24].mxu1 }
 0xd16   :  { %v5007_v27 = vadd.f32 %v3008_v31, %v6677_v42  ;;  %v3010_v59 = vpop.f32.mrb[25].mxu0  ;;  %v3081_v46 = vpop.f32.mrb[25].mxu1  ;;  %v5023_v41 = vadd.f32 %v3079_v9, %v6687_v4 }
 0xd17   :  { %v5008_v15 = vadd.f32 %v3010_v59, %v6681_v55  ;;  %v5024_v45 = vadd.f32 %v3081_v46, %v6691_v1 }
 0xd18   :  { %v3790_v19 = vmul.f32 -1.442695, %v5007_v27  ;;  %v3792_v53 = vmul.f32 -1.442695, %v5023_v41 }
 0xd19   :  { %v3791_v24 = vmul.f32 -1.442695, %v5008_v15 }
 0xd1a   :  { %5290 = vpow2.f32 %v3790_v19 }
 0xd1b   :  { %5292 = vpow2.f32 %v3791_v24 }
 0xd1c   :  { %5294 = vtanh.f32 %v5024_v45 }
 0xd1d   :  { %5296 = vpow2.f32 %v3792_v53 }
 0xd24   :  { %v5291_v60 = vpop.eup %5290 }
 0xd25   :  { %v3097_v5 = vadd.f32 1.0, %v5291_v60  ;;  %v5293_v7 = vpop.eup %5292 }
 0xd26   :  { %v3098_v30 = vadd.f32 1.0, %v5293_v7  ;;  %v5295_v6 = vpop.eup %5294 }
 0xd27   :  { %5298 = vrcp.f32 %v3097_v5  ;;  %v5297_v40 = vpop.eup %5296 }
 0xd28   :  { %5300 = vrcp.f32 %v3098_v30  ;;  %v3099_v58 = vadd.f32 1.0, %v5297_v40 }
 0xd2a   :  { %5302 = vrcp.f32 %v3099_v58 }
 0xd31   :  { %v5299_v44 = vpop.eup %5298 }
 0xd32   :  { %v3108_v8 = vmul.f32 %v5299_v44, %v5295_v6  ;;  %v5301_v13 = vpop.eup %5300 }
 0xd33   :  { %v3107_v18 = vmul.f32 %v5301_v13, %v6821_v63 }
 0xd34   :  { %v5303_v34 = vpop.eup %5302 }
 0xd35   :  { %v6863_v38 = vadd.f32 %v3108_v8, %v3107_v18 }
 0xd37   :  { %5304 = vtanh.f32 %v6863_v38 }
 0xd41   :  { %v5305_v10 = vpop.eup %5304 }
 0xd42   :  { %v3111_v11 = vmul.f32 %v5305_v10, %v5303_v34  ;;  %v3638_v10 = vld [vmem:[%s7015_s7 + $0x18] sm:$0xff] }
 0xd44   :  { %3181 = vmatmul.mubr.f32.vlgmr.msra.gmra.mrb[26].mxu0 %v3111_v11  ;;  %3252 = vmatmul.mubr.f32.vlgmr.msra.gmra.mrb[26].mxu1 %v3111_v11 }
 0xd45   :  { %4818 = vmatpush1.bf16.msra.mxu0 %v6361_v16  ;;  %4850 = vmatpush1.bf16.msra.mxu1 %v6370_v20 }
 0xd46   :  { %4820 = vmatprep.subr.bf16.mxu0 %v6384_v33  ;;  %4852 = vmatprep.subr.bf16.mxu1 %v6395_v51 }
 0xd47   :  { %3354 = vmatprep.mubr.f32.mxu0 %v5354_v3  ;;  %3425 = vmatprep.mubr.f32.mxu1 %v5354_v3 }
 0xd49   :  { %4822 = vmatpush1.bf16.msra.mxu0 %v6397_v47  ;;  %4854 = vmatpush1.bf16.msra.mxu1 %v6406_v52 }
 0xd4a   :  { %4824 = vmatprep.subr.bf16.mxu0 %v6420_v23  ;;  %4856 = vmatprep.subr.bf16.mxu1 %v6431_v36 }
 0xd4d   :  { %4826 = vmatpush1.bf16.msra.mxu0 %v6433_v37  ;;  %4858 = vmatpush1.bf16.msra.mxu1 %v6442_v49 }
 0xd4e   :  { %4828 = vmatprep.subr.bf16.mxu0 %v6456_v0  ;;  %4860 = vmatprep.subr.bf16.mxu1 %v6467_v17 }
 0xd51   :  { %4830 = vmatpush1.bf16.msra.mxu0 %v6469_v21  ;;  %4862 = vmatpush1.bf16.msra.mxu1 %v6478_v35 }
 0xd52   :  { %4832 = vmatprep.subr.bf16.mxu0 %v6492_v54  ;;  %4864 = vmatprep.subr.bf16.mxu1 %v6503_v50 }
 0xd55   :  { %4834 = vmatpush1.bf16.msra.mxu0 %v6505_v43  ;;  %4866 = vmatpush1.bf16.msra.mxu1 %v6517_v39 }
 0xd56   :  { %4836 = vmatprep.subr.bf16.mxu0 %v6530_v2  ;;  %4868 = vmatprep.subr.bf16.mxu1 %v6532_v29 }
 0xd59   :  { %4838 = vmatpush1.bf16.msra.mxu0 %v6544_v62  ;;  %4870 = vmatpush1.bf16.msra.mxu1 %v6557_v28 }
 0xd5a   :  { %4840 = vmatprep.subr.bf16.mxu0 %v6559_v32  ;;  %4872 = vmatprep.subr.bf16.mxu1 %v6570_v56 }
 0xd5d   :  { %4842 = vmatpush1.bf16.msra.mxu0 %v6582_v12  ;;  %4874 = vmatpush1.bf16.msra.mxu1 %v6586_v26 }
 0xd5e   :  { %4844 = vmatprep.subr.bf16.mxu0 %v6600_v48  ;;  %4876 = vmatprep.subr.bf16.mxu1 %v6611_v57 }
 0xd61   :  { %4846 = vmatpush1.bf16.msra.mxu0 %v6613_v22  ;;  %4878 = vmatpush1.bf16.msra.mxu1 %v6622_v25 }
 0xd62   :  { %4880 = vmatprep.subr.bf16.mxu0 %v6348_v14  ;;  %4912 = vmatprep.subr.bf16.mxu1 %v6359_v61 }
 0xe17   :  { %v3182_v63 = vpop.f32.mrb[26].mxu0  ;;  %v3253_v31 = vpop.f32.mrb[26].mxu1 }
 0xe18   :  { %v5009_v9 = vadd.f32 %v3182_v63, %v6677_v42  ;;  %v3184_v27 = vpop.f32.mrb[27].mxu0  ;;  %v3255_v59 = vpop.f32.mrb[27].mxu1  ;;  %v5025_v24 = vadd.f32 %v3253_v31, %v6687_v4  ;;  %v3639_v63 = vld [vmem:[%s7015_s7 + $0x20] sm:$0xff]  ;;  %v3640_v31 = vld [vmem:[%s7015_s7 + $0x28] sm:$0xff] }
 0xe19   :  { %v5010_v46 = vadd.f32 %v3184_v27, %v6681_v55  ;;  %v5026_v41 = vadd.f32 %v3255_v59, %v6691_v1  ;;  %v3641_v27 = vld [vmem:[%s7015_s7 + $0x30] sm:$0xff]  ;;  %v3642_v59 = vld [vmem:[%s7015_s7 + $0x38] sm:$0xff] }
 0xe1a   :  { %v3793_v15 = vmul.f32 -1.442695, %v5009_v9  ;;  %v3795_v45 = vmul.f32 -1.442695, %v5025_v24  ;;  %v4950_v9 = vpack.c.bf16 %v3640_v31, %v3639_v63 }
 0xe1b   :  { %v3794_v19 = vmul.f32 -1.442695, %v5010_v46  ;;  %v4953_v46 = vpack.c.bf16 %v3642_v59, %v3641_v27 }
 0xe1c   :  { %5306 = vpow2.f32 %v3793_v15  ;;  %v3643_v15 = vld [vmem:[%s7015_s7 + $0x40] sm:$0xff] }
 0xe1d   :  { %5308 = vpow2.f32 %v3794_v19  ;;  %v3644_v19 = vld [vmem:[%s7015_s7 + $0x48] sm:$0xff] }
 0xe1e   :  { %5310 = vtanh.f32 %v5026_v41  ;;  %v4956_v24 = vpack.c.bf16 %v3644_v19, %v3643_v15  ;;  %v3645_v41 = vld [vmem:[%s7015_s7 + $0x50] sm:$0xff] }
 0xe1f   :  { %5312 = vpow2.f32 %v3795_v45  ;;  %v3646_v45 = vld [vmem:[%s7015_s7 + $0x58] sm:$0xff] }
 0xe26   :  { %v5307_v14 = vpop.eup %5306 }
 0xe27   :  { %v3271_v53 = vadd.f32 1.0, %v5307_v14  ;;  %v5309_v61 = vpop.eup %5308  ;;  %v4959_v14 = vpack.c.bf16 %v3646_v45, %v3645_v41 }
 0xe28   :  { %v3272_v60 = vadd.f32 1.0, %v5309_v61  ;;  %v5311_v5 = vpop.eup %5310  ;;  %v3648_v61 = vld [vmem:[%s7015_s7 + $0x68] sm:$0xff] }
 0xe29   :  { %5314 = vrcp.f32 %v3271_v53  ;;  %v5313_v7 = vpop.eup %5312  ;;  %v3647_v53 = vld [vmem:[%s7015_s7 + $0x60] sm:$0xff] }
 0xe2a   :  { %5316 = vrcp.f32 %v3272_v60  ;;  %v3273_v44 = vadd.f32 1.0, %v5313_v7  ;;  %v4962_v60 = vpack.c.bf16 %v3648_v61, %v3647_v53  ;;  %v3650_v7 = vld [vmem:[%s7015_s7 + $0x78] sm:$0xff] }
 0xe2c   :  { %5318 = vrcp.f32 %v3273_v44 }
 0xe33   :  { %v5315_v30 = vpop.eup %5314 }
 0xe34   :  { %v3282_v6 = vmul.f32 %v5315_v30, %v5311_v5  ;;  %v5317_v40 = vpop.eup %5316  ;;  %v3649_v5 = vld [vmem:[%s7015_s7 + $0x70] sm:$0xff] }
 0xe35   :  { %v3281_v8 = vmul.f32 %v5317_v40, %v6863_v38  ;;  %v3637_v38 = vld [vmem:[%s7015_s7 + $0x10] sm:$0xff]  ;;  %v4965_v30 = vpack.c.bf16 %v3650_v7, %v3649_v5 }
 0xe36   :  { %v5319_v58 = vpop.eup %5318  ;;  %v4947_v11 = vpack.c.bf16 %v3638_v10, %v3637_v38 }
 0xe37   :  { %v6905_v13 = vadd.f32 %v3282_v6, %v3281_v8 }
 0xe39   :  { %5320 = vtanh.f32 %v6905_v13 }
 0xe43   :  { %v5321_v18 = vpop.eup %5320 }
 0xe44   :  { %v3285_v34 = vmul.f32 %v5321_v18, %v5319_v58 }
 0xe46   :  { %3355 = vmatmul.mubr.f32.vlgmr.msra.gmra.mrb[28].mxu0 %v3285_v34  ;;  %3426 = vmatmul.mubr.f32.vlgmr.msra.gmra.mrb[28].mxu1 %v3285_v34 }
 0xe47   :  { %4882 = vmatpush1.bf16.msra.mxu0 %v6361_v16  ;;  %4914 = vmatpush1.bf16.msra.mxu1 %v6370_v20 }
 0xe48   :  { %4884 = vmatprep.subr.bf16.mxu0 %v6384_v33  ;;  %4916 = vmatprep.subr.bf16.mxu1 %v6395_v51 }
 0xe49   :  { %3528 = vmatprep.mubr.f32.mxu0 %v5354_v3  ;;  %3599 = vmatprep.mubr.f32.mxu1 %v5354_v3 }
 0xe4b   :  { %4886 = vmatpush1.bf16.msra.mxu0 %v6397_v47  ;;  %4918 = vmatpush1.bf16.msra.mxu1 %v6406_v52 }
 0xe4c   :  { %4888 = vmatprep.subr.bf16.mxu0 %v6420_v23  ;;  %4920 = vmatprep.subr.bf16.mxu1 %v6431_v36 }
 0xe4f   :  { %4890 = vmatpush1.bf16.msra.mxu0 %v6433_v37  ;;  %4922 = vmatpush1.bf16.msra.mxu1 %v6442_v49 }
 0xe50   :  { %4892 = vmatprep.subr.bf16.mxu0 %v6456_v0  ;;  %4924 = vmatprep.subr.bf16.mxu1 %v6467_v17 }
 0xe53   :  { %4894 = vmatpush1.bf16.msra.mxu0 %v6469_v21  ;;  %4926 = vmatpush1.bf16.msra.mxu1 %v6478_v35 }
 0xe54   :  { %4896 = vmatprep.subr.bf16.mxu0 %v6492_v54  ;;  %4928 = vmatprep.subr.bf16.mxu1 %v6503_v50 }
 0xe57   :  { %4898 = vmatpush1.bf16.msra.mxu0 %v6505_v43  ;;  %4930 = vmatpush1.bf16.msra.mxu1 %v6517_v39 }
 0xe58   :  { %4900 = vmatprep.subr.bf16.mxu0 %v6530_v2  ;;  %4932 = vmatprep.subr.bf16.mxu1 %v6532_v29 }
 0xe5b   :  { %4902 = vmatpush1.bf16.msra.mxu0 %v6544_v62  ;;  %4934 = vmatpush1.bf16.msra.mxu1 %v6557_v28 }
 0xe5c   :  { %4904 = vmatprep.subr.bf16.mxu0 %v6559_v32  ;;  %4936 = vmatprep.subr.bf16.mxu1 %v6570_v56 }
 0xe5f   :  { %4906 = vmatpush1.bf16.msra.mxu0 %v6582_v12  ;;  %4938 = vmatpush1.bf16.msra.mxu1 %v6586_v26 }
 0xe60   :  { %4908 = vmatprep.subr.bf16.mxu0 %v6600_v48  ;;  %4940 = vmatprep.subr.bf16.mxu1 %v6611_v57  ;;  %v3635_v48 = vld [vmem:[%s7015_s7] sm:$0xff]  ;;  %v3636_v57 = vld [vmem:[%s7015_s7 + $0x8] sm:$0xff] }
 0xe63   :  { %4910 = vmatpush1.bf16.msra.mxu0 %v6613_v22  ;;  %4942 = vmatpush1.bf16.msra.mxu1 %v6622_v25  ;;  %v4944_v22 = vpack.c.bf16 %v3636_v57, %v3635_v48  ;;  %v5355_v25 = vmov 0.0|0.0  }
 0xe64   :  { %4943 = vmatprep.subr.bf16.mxu0 %v5355_v25 }
 0xf19   :  { %v3356_v16 = vpop.f32.mrb[28].mxu0  ;;  %v3427_v20 = vpop.f32.mrb[28].mxu1 }
 0xf1a   :  { %v5011_v33 = vadd.f32 %v3356_v16, %v6677_v42  ;;  %v3358_v51 = vpop.f32.mrb[29].mxu0  ;;  %v3429_v47 = vpop.f32.mrb[29].mxu1  ;;  %v5027_v37 = vadd.f32 %v3427_v20, %v6687_v4 }
 0xf1b   :  { %v5012_v52 = vadd.f32 %v3358_v51, %v6681_v55  ;;  %v5028_v49 = vadd.f32 %v3429_v47, %v6691_v1 }
 0xf1c   :  { %v3796_v23 = vmul.f32 -1.442695, %v5011_v33  ;;  %v3798_v0 = vmul.f32 -1.442695, %v5027_v37 }
 0xf1d   :  { %v3797_v36 = vmul.f32 -1.442695, %v5012_v52 }
 0xf1e   :  { %5322 = vpow2.f32 %v3796_v23 }
 0xf1f   :  { %5324 = vpow2.f32 %v3797_v36 }
 0xf20   :  { %5326 = vtanh.f32 %v5028_v49 }
 0xf21   :  { %5328 = vpow2.f32 %v3798_v0 }
 0xf28   :  { %v5323_v17 = vpop.eup %5322 }
 0xf29   :  { %v3445_v21 = vadd.f32 1.0, %v5323_v17  ;;  %v5325_v35 = vpop.eup %5324 }
 0xf2a   :  { %v3446_v54 = vadd.f32 1.0, %v5325_v35  ;;  %v5327_v50 = vpop.eup %5326 }
 0xf2b   :  { %5330 = vrcp.f32 %v3445_v21  ;;  %v5329_v43 = vpop.eup %5328 }
 0xf2c   :  { %5332 = vrcp.f32 %v3446_v54  ;;  %v3447_v62 = vadd.f32 1.0, %v5329_v43  ;;  %v3802_v54 = vld [vmem:[%s7016_s8] ss:$0 sm:$0xff] }
 0xf2e   :  { %5334 = vrcp.f32 %v3447_v62 }
 0xf35   :  { %v5331_v39 = vpop.eup %5330 }
 0xf36   :  { %v3456_v2 = vmul.f32 %v5331_v39, %v5327_v50  ;;  %v5333_v29 = vpop.eup %5332 }
 0xf37   :  { %v3455_v28 = vmul.f32 %v5333_v29, %v6905_v13 }
 0xf38   :  { %v5335_v56 = vpop.eup %5334 }
 0xf39   :  { %v6945_v32 = vadd.f32 %v3456_v2, %v3455_v28 }
 0xf3b   :  { %5336 = vtanh.f32 %v6945_v32 }
 0xf45   :  { %v5337_v12 = vpop.eup %5336 }
 0xf46   :  { %v3459_v26 = vmul.f32 %v5337_v12, %v5335_v56 }
 0xf48   :  { %3529 = vmatmul.mubr.f32.vlgmr.msra.gmra.mrb[30].mxu0 %v3459_v26  ;;  %3600 = vmatmul.mubr.f32.vlgmr.msra.gmra.mrb[30].mxu1 %v3459_v26 }
 0xf49   :  { %4945 = vmatpush3.bf16.msra.mxu0 %v4944_v22  ;;  %3852 = vmatprep.mubr.msk.f32.mxu0 %vm5356_vm2, %v5354_v3 }
 0xf4a   :  { %4946 = vmatprep.subr.bf16.mxu0 %v5355_v25 }
 0xf4d   :  { %4948 = vmatpush3.bf16.msra.mxu0 %v4947_v11 }
 0xf4e   :  { %4949 = vmatprep.subr.bf16.mxu0 %v5355_v25 }
 0xf51   :  { %4951 = vmatpush3.bf16.msra.mxu0 %v4950_v9 }
 0xf52   :  { %4952 = vmatprep.subr.bf16.mxu0 %v5355_v25 }
 0xf55   :  { %4954 = vmatpush3.bf16.msra.mxu0 %v4953_v46 }
 0xf56   :  { %4955 = vmatprep.subr.bf16.mxu0 %v5355_v25 }
 0xf59   :  { %4957 = vmatpush3.bf16.msra.mxu0 %v4956_v24 }
 0xf5a   :  { %4958 = vmatprep.subr.bf16.mxu0 %v5355_v25 }
 0xf5d   :  { %4960 = vmatpush3.bf16.msra.mxu0 %v4959_v14 }
 0xf5e   :  { %4961 = vmatprep.subr.bf16.mxu0 %v5355_v25 }
 0xf61   :  { %4963 = vmatpush3.bf16.msra.mxu0 %v4962_v60 }
 0xf62   :  { %4964 = vmatprep.subr.bf16.mxu0 %v5355_v25 }
 0xf65   :  { %4966 = vmatpush3.bf16.msra.mxu0 %v4965_v30 }
0x101b   :  { %v3530_v6 = vpop.f32.mrb[30].mxu0  ;;  %v3601_v40 = vpop.f32.mrb[30].mxu1 }
0x101c   :  { %v5013_v44 = vadd.f32 %v3530_v6, %v6677_v42  ;;  %v3532_v3 = vpop.f32.mrb[31].mxu0  ;;  %v3603_v8 = vpop.f32.mrb[31].mxu1  ;;  %v5029_v34 = vadd.f32 %v3601_v40, %v6687_v4 }
0x101d   :  { %v5014_v13 = vadd.f32 %v3532_v3, %v6681_v55  ;;  %v5030_v16 = vadd.f32 %v3603_v8, %v6691_v1 }
0x101e   :  { %v3799_v58 = vmul.f32 -1.442695, %v5013_v44  ;;  %v3801_v20 = vmul.f32 -1.442695, %v5029_v34 }
0x101f   :  { %v3800_v18 = vmul.f32 -1.442695, %v5014_v13 }
0x1020   :  { %5338 = vpow2.f32 %v3799_v58 }
0x1021   :  { %5340 = vpow2.f32 %v3800_v18 }
0x1022   :  { %5342 = vtanh.f32 %v5030_v16 }
0x1023   :  { %5344 = vpow2.f32 %v3801_v20 }
0x102a   :  { %v5339_v33 = vpop.eup %5338 }
0x102b   :  { %v3619_v51 = vadd.f32 1.0, %v5339_v33  ;;  %v5341_v47 = vpop.eup %5340 }
0x102c   :  { %v3620_v42 = vadd.f32 1.0, %v5341_v47  ;;  %v5343_v52 = vpop.eup %5342 }
0x102d   :  { %5346 = vrcp.f32 %v3619_v51  ;;  %v5345_v23 = vpop.eup %5344 }
0x102e   :  { %5348 = vrcp.f32 %v3620_v42  ;;  %v3621_v49 = vadd.f32 1.0, %v5345_v23 }
0x1030   :  { %5350 = vrcp.f32 %v3621_v49 }
0x1037   :  { %v5347_v55 = vpop.eup %5346 }
0x1038   :  { %v3630_v36 = vmul.f32 %v5347_v55, %v5343_v52  ;;  %v5349_v37 = vpop.eup %5348 }
0x1039   :  { %v3629_v0 = vmul.f32 %v5349_v37, %v6945_v32 }
0x103a   :  { %v5351_v1 = vpop.eup %5350 }
0x103b   :  { %v3631_v4 = vadd.f32 %v3630_v36, %v3629_v0 }
0x103d   :  { %5352 = vtanh.f32 %v3631_v4 }
0x1047   :  { %v5353_v17 = vpop.eup %5352 }
0x1048   :  { %v3633_v21 = vmul.f32 %v5353_v17, %v5351_v1 }
0x104a   :  { %v3634_v35 = vmax.f32 %v3633_v21, 0.0 }
0x104c   :  { %3853 = vmatmul.mubr.f32.vlgmr.msra.gmra.mrb[32].mxu0 %v3634_v35 }
0x111f   :  { %v3724_v50 = vpop.f32.mrb[32].mxu0 }
0x1120   :  { %v3725_v43 = vadd.f32 %v3802_v54, %v3724_v50  ;;  %v3854_v39 = vpop.f32.mrb[33].mxu0 }
0x1122   :  { %3729 = vst.msk [vmem:[%s7017_s9] sm:$0xff] %vm3728_vm3, %v3725_v43 }

</bundles_post_ra>
